<compile_context>
chip_gen: v5e
topology: v5e:2x2
jax: 0.10.0
libtpu: 0.0.40
codegen_flags: <defaults>
</compile_context>

<pallas_src>
import math

import jax
import jax.numpy as jnp
import numpy as np
from jax import lax
from jax.experimental import pallas as pl
from jax.experimental.pallas import tpu as pltpu


# --------------------------------------------------------------------------
# Pallas kernel: fused, fully unrolled, length-masked bidirectional LSTM
# recurrences for several independent weight groups in ONE kernel launch.
#
# Per group g the kernel receives (inputs):
#   lens   : (N, 1)  int32     valid length per row
#   gx_f   : (L, N, 4*H2) f32  precomputed x @ W_ih_f + b_f  (time-major)
#   gx_b   : (L, N, 4*H2) f32  precomputed x @ W_ih_b + b_b
#   whh_f  : (H2, 4*H2)  bf16  recurrent weights
#   whh_b  : (H2, 4*H2)  bf16
# and writes (outputs):
#   out    : (L, N, 2*H2) f32  [:, :, :H2] fwd hidden, [:, :, H2:] bwd hidden
#   h_fin  : (N, 2*H2)   f32   [fwd final | bwd final]  (== nn.LSTM h_n layout)
# --------------------------------------------------------------------------
def _run_bilstm_group(L, N, H2, lens_ref, gxf_ref, gxb_ref,
                      whhf_ref, whhb_ref, out_ref, hfin_ref):
    lens = lens_ref[...]                                    # (N, 1) int32

    # hoisted loop invariants (read weights once, build all masks once)
    whh_f = whhf_ref[...]                                   # (H2, 4*H2) bf16
    whh_b = whhb_ref[...]
    masks = [jnp.broadcast_to(jnp.int32(t) < lens, (N, H2)) for t in range(L)]

    def cell(gx_t, h, c, whh):
        # recurrent matmul: bf16 operands, f32 accumulate; gate/state math in f32
        gates = gx_t + jnp.dot(h.astype(jnp.bfloat16), whh,
                               preferred_element_type=jnp.float32)   # (N, 4*H2)
        sig = jax.nn.sigmoid(gates)        # one EUP pass over all 4 gate blocks
        tah = jnp.tanh(gates)
        i = sig[:, 0 * H2:1 * H2]
        f = sig[:, 1 * H2:2 * H2]
        g = tah[:, 2 * H2:3 * H2]
        o = sig[:, 3 * H2:4 * H2]
        c_new = f * c + i * g
        h_new = o * jnp.tanh(c_new)
        return h_new, c_new

    zeros = jnp.zeros((N, H2), jnp.float32)
    hf, cf, hb, cb = zeros, zeros, zeros, zeros

    # Static unroll: fwd step (time t) and bwd step (time L-1-t) are independent
    # chains advanced in the same iteration so their matmul latencies overlap.
    for t in range(L):
        m = masks[t]
        hf_new, cf_new = cell(gxf_ref[t], hf, cf, whh_f)
        out_ref[t, :, 0:H2] = jnp.where(m, hf_new, 0.0)
        hf = jnp.where(m, hf_new, hf)
        cf = jnp.where(m, cf_new, cf)

        tb = L - 1 - t
        mb = masks[tb]
        hb_new, cb_new = cell(gxb_ref[tb], hb, cb, whh_b)
        out_ref[tb, :, H2:2 * H2] = jnp.where(mb, hb_new, 0.0)
        hb = jnp.where(mb, hb_new, hb)
        cb = jnp.where(mb, cb_new, cb)

    # fwd final state == state at t = len-1; bwd final state == state after t = 0
    hfin_ref[...] = jnp.concatenate([hf, hb], axis=-1)      # (N, 2*H2)


def make_multi_bilstm_kernel(group_shapes):
    """group_shapes: list of (L, N, H2) — one entry per independent weight group."""
    n_groups = len(group_shapes)

    def kernel(*refs):
        in_refs, out_refs = refs[:5 * n_groups], refs[5 * n_groups:]
        for g, (L, N, H2) in enumerate(group_shapes):
            _run_bilstm_group(L, N, H2,
                              *in_refs[5 * g:5 * g + 5],
                              *out_refs[2 * g:2 * g + 2])

    return kernel


def bilstm_multi_pallas(groups):
    """groups: list of (x_bld (N, L, D) f32, lens list[int], params dict).

    Returns list of (out (L, N, 2*H2) time-major, h_final (N, 2*H2)) per group,
    all produced by a single pallas_call.
    """
    hi = lax.Precision.HIGHEST
    flat_inputs, shapes, out_shapes = [], [], []
    for x_bld, lens, p in groups:
        N, L, D = x_bld.shape
        H2 = p["whh_f"].shape[0]
        lens2d = jnp.asarray(lens, jnp.int32).reshape(N, 1)
        # Batched input projection for all timesteps, produced directly in
        # time-major layout (fused into the matmul output, no extra HBM pass).
        gxf = jnp.einsum("nld,dk->lnk", x_bld, p["wih_f"], precision=hi) + p["b_f"]
        gxb = jnp.einsum("nld,dk->lnk", x_bld, p["wih_b"], precision=hi) + p["b_b"]
        flat_inputs += [lens2d,
                        gxf.astype(jnp.float32), gxb.astype(jnp.float32),
                        p["whh_f"].astype(jnp.bfloat16), p["whh_b"].astype(jnp.bfloat16)]
        shapes.append((L, N, H2))
        out_shapes += [jax.ShapeDtypeStruct((L, N, 2 * H2), jnp.float32),
                       jax.ShapeDtypeStruct((N, 2 * H2), jnp.float32)]

    vmem = pl.BlockSpec(memory_space=pltpu.MemorySpace.VMEM)
    # Everything (a few KB) is VMEM-resident, so a single grid-less invocation is right.
    # For production sizes: tile N with a BlockSpec grid marked "parallel" (megacore /
    # v7x 2 TCs), stream gx/out tiles, and set vmem_limit_bytes for v7x's 64 MiB VMEM.
    outs = pl.pallas_call(
        make_multi_bilstm_kernel(shapes),
        out_shape=tuple(out_shapes),
        in_specs=[vmem] * len(flat_inputs),
        out_specs=tuple([vmem] * len(out_shapes)),
    )(*flat_inputs)
    return [(outs[2 * g], outs[2 * g + 1]) for g in range(len(groups))]


# --------------------------------------------------------------------------
# Pure-JAX f32 reference (same masked-recurrence semantics) for validation.
# --------------------------------------------------------------------------
def bilstm_ref(x_bld, lens, p):
    N, L, D = x_bld.shape
    H2 = p["whh_f"].shape[0]
    lens = jnp.asarray(lens, jnp.int32).reshape(N, 1)
    hi = lax.Precision.HIGHEST

    def run_dir(wih, whh, b, time_order):
        h = jnp.zeros((N, H2), jnp.float32)
        c = jnp.zeros((N, H2), jnp.float32)
        outs = [None] * L
        for t in time_order:
            x_t = x_bld[:, t, :]
            gates = (jnp.dot(x_t, wih, precision=hi)
                     + jnp.dot(h, whh, precision=hi) + b)
            i = jax.nn.sigmoid(gates[:, :H2])
            f = jax.nn.sigmoid(gates[:, H2:2 * H2])
            g = jnp.tanh(gates[:, 2 * H2:3 * H2])
            o = jax.nn.sigmoid(gates[:, 3 * H2:])
            c_new = f * c + i * g
            h_new = o * jnp.tanh(c_new)
            valid = t < lens
            outs[t] = jnp.where(valid, h_new, 0.0)
            h = jnp.where(valid, h_new, h)
            c = jnp.where(valid, c_new, c)
        return jnp.stack(outs, axis=1), h

    of, hf = run_dir(p["wih_f"], p["whh_f"], p["b_f"], range(L))
    ob, hb = run_dir(p["wih_b"], p["whh_b"], p["b_b"], range(L - 1, -1, -1))
    return jnp.concatenate([of, ob], -1), jnp.concatenate([hf, hb], -1)


# --------------------------------------------------------------------------
# Deterministic parameter init (PyTorch nn.LSTM uniform(-1/sqrt(H2), 1/sqrt(H2))).
# Weights stored pre-transposed: W_ih (D, 4*H2), W_hh (H2, 4*H2), bias = b_ih + b_hh.
# --------------------------------------------------------------------------
def init_lstm_params(key, D, H2):
    k = 1.0 / math.sqrt(H2)
    ks = jax.random.split(key, 8)
    u = lambda kk, shape: jax.random.uniform(kk, shape, jnp.float32, -k, k)
    return dict(
        wih_f=u(ks[0], (D, 4 * H2)), whh_f=u(ks[1], (H2, 4 * H2)),
        b_f=u(ks[2], (1, 4 * H2)) + u(ks[3], (1, 4 * H2)),
        wih_b=u(ks[4], (D, 4 * H2)), whh_b=u(ks[5], (H2, 4 * H2)),
        b_b=u(ks[6], (1, 4 * H2)) + u(ks[7], (1, 4 * H2)),
    )


if __name__ == "__main__":
    key = jax.random.PRNGKey(0)

    # InputRNNLayer(input_size=64, hidden_size=64, cell='lstm',
    #               schema_aggregation='head+tail', share_lstm=False)
    D, H = 64, 64
    H2 = H // 2
    B = 2

    # ragged batch metadata (static in this synthetic script)
    question_lens = [8, 5]                     # tokens per example
    table_lens = [3, 2]                        # tables per example
    table_word_lens = [2, 1, 3, 4, 2]          # words per table (total 5 tables)
    column_lens = [4, 3]                       # columns per example
    column_word_lens = [1, 3, 2, 2, 1, 3, 2]   # words per column (total 7 columns)

    Lq = max(question_lens)
    Lt = max(table_word_lens)
    Lc = max(column_word_lens)
    T = sum(table_lens)
    C = sum(column_lens)

    k_q, k_s, k1, k2, k3 = jax.random.split(key, 5)
    q_params = init_lstm_params(k_q, D, H2)    # question_lstm
    s_params = init_lstm_params(k_s, D, H2)    # schema_lstm (share_lstm=False)

    question = jax.random.normal(k1, (B, Lq, D), jnp.float32)
    tables_in = jax.random.normal(k2, (T, Lt, D), jnp.float32)
    columns_in = jax.random.normal(k3, (C, Lc, D), jnp.float32)

    # Merge tables + columns into one schema batch (same schema_lstm weights);
    # pad to a common length — the length masking makes this semantics-preserving.
    Ls = max(Lt, Lc)
    tables_pad = jnp.pad(tables_in, ((0, 0), (0, Ls - Lt), (0, 0)))
    columns_pad = jnp.pad(columns_in, ((0, 0), (0, Ls - Lc), (0, 0)))
    schema_in = jnp.concatenate([tables_pad, columns_pad], axis=0)     # (T+C, Ls, D)
    schema_lens = list(table_word_lens) + list(column_word_lens)

    # --- single Pallas launch covering question + (tables || columns) ----
    (q_out_tm, _), (_, schema_hid) = bilstm_multi_pallas([
        (question, question_lens, q_params),
        (schema_in, schema_lens, s_params),
    ])
    q_out_tm = jax.block_until_ready(q_out_tm)   # (Lq, B, H) time-major
    t_hid = schema_hid[:T]                       # (T, H)  head+tail per table
    c_hid = schema_hid[T:]                       # (C, H)  head+tail per column

    # --- reference check --------------------------------------------------
    q_out_r, _ = bilstm_ref(question, question_lens, q_params)
    _, t_hid_r = bilstm_ref(tables_in, table_word_lens, s_params)
    _, c_hid_r = bilstm_ref(columns_in, column_word_lens, s_params)
    np.testing.assert_allclose(np.asarray(jnp.transpose(q_out_tm, (1, 0, 2))),
                               np.asarray(q_out_r), atol=1e-2, rtol=1e-2)
    np.testing.assert_allclose(np.asarray(t_hid), np.asarray(t_hid_r), atol=1e-2, rtol=1e-2)
    np.testing.assert_allclose(np.asarray(c_hid), np.asarray(c_hid_r), atol=1e-2, rtol=1e-2)

    # --- ragged regrouping glue (torch.split + interleave equivalent) ----
    # TODO(synk): the ragged per-example interleave has no dense Pallas equivalent;
    # it stays as static host-side slicing (as torch.split/cat does on CPU).
    pieces = []
    t_off = 0
    c_off = 0
    for b in range(B):
        pieces.append(q_out_tm[:question_lens[b], b, :])               # question tokens
        pieces.append(t_hid[t_off:t_off + table_lens[b]])              # this example's tables
        t_off += table_lens[b]
        pieces.append(c_hid[c_off:c_off + column_lens[b]])             # this example's columns
        c_off += column_lens[b]
    outputs = jnp.concatenate(pieces, axis=0)                          # (sum(q)+T+C, H)
    outputs = jax.block_until_ready(outputs)

    assert outputs.shape == (sum(question_lens) + T + C, H)
    print("KERNEL_OK")
</pallas_src>

<mosaic_0001>
module attributes {stable_mosaic.version = 11 : i64} {
  func.func @kernel(%arg0: memref<2x1xi32, #tpu.memory_space<vmem>>, %arg1: memref<8x2x128xf32, #tpu.memory_space<vmem>>, %arg2: memref<8x2x128xf32, #tpu.memory_space<vmem>>, %arg3: memref<32x128xbf16, #tpu.memory_space<vmem>>, %arg4: memref<32x128xbf16, #tpu.memory_space<vmem>>, %arg5: memref<12x1xi32, #tpu.memory_space<vmem>>, %arg6: memref<4x12x128xf32, #tpu.memory_space<vmem>>, %arg7: memref<4x12x128xf32, #tpu.memory_space<vmem>>, %arg8: memref<32x128xbf16, #tpu.memory_space<vmem>>, %arg9: memref<32x128xbf16, #tpu.memory_space<vmem>>, %arg10: memref<8x2x64xf32, #tpu.memory_space<vmem>>, %arg11: memref<2x64xf32, #tpu.memory_space<vmem>>, %arg12: memref<4x12x64xf32, #tpu.memory_space<vmem>>, %arg13: memref<12x64xf32, #tpu.memory_space<vmem>>) attributes {dimension_semantics = [], scalar_prefetch = 0 : i64, scratch_operands = 0 : i64, tpu.core_type = #tpu.core_type<tc>} {
    %c0 = arith.constant 0 : index
    %c0_0 = arith.constant 0 : index
    %0 = vector.load %arg0[%c0, %c0_0] : memref<2x1xi32, #tpu.memory_space<vmem>>, vector<2x1xi32>
    %c0_1 = arith.constant 0 : index
    %c0_2 = arith.constant 0 : index
    %1 = vector.load %arg3[%c0_1, %c0_2] : memref<32x128xbf16, #tpu.memory_space<vmem>>, vector<32x128xbf16>
    %c0_3 = arith.constant 0 : index
    %c0_4 = arith.constant 0 : index
    %2 = vector.load %arg4[%c0_3, %c0_4] : memref<32x128xbf16, #tpu.memory_space<vmem>>, vector<32x128xbf16>
    %c0_i32 = arith.constant 0 : i32
    %3 = vector.broadcast %c0_i32 : i32 to vector<2x1xi32>
    %4 = arith.cmpi slt, %3, %0 : vector<2x1xi32>
    %5 = vector.shape_cast %4 : vector<2x1xi1> to vector<2x1xi1>
    %6 = vector.broadcast %5 : vector<2x1xi1> to vector<2x32xi1>
    %c1_i32 = arith.constant 1 : i32
    %7 = vector.broadcast %c1_i32 : i32 to vector<2x1xi32>
    %8 = arith.cmpi slt, %7, %0 : vector<2x1xi32>
    %9 = vector.shape_cast %8 : vector<2x1xi1> to vector<2x1xi1>
    %10 = vector.broadcast %9 : vector<2x1xi1> to vector<2x32xi1>
    %c2_i32 = arith.constant 2 : i32
    %11 = vector.broadcast %c2_i32 : i32 to vector<2x1xi32>
    %12 = arith.cmpi slt, %11, %0 : vector<2x1xi32>
    %13 = vector.shape_cast %12 : vector<2x1xi1> to vector<2x1xi1>
    %14 = vector.broadcast %13 : vector<2x1xi1> to vector<2x32xi1>
    %c3_i32 = arith.constant 3 : i32
    %15 = vector.broadcast %c3_i32 : i32 to vector<2x1xi32>
    %16 = arith.cmpi slt, %15, %0 : vector<2x1xi32>
    %17 = vector.shape_cast %16 : vector<2x1xi1> to vector<2x1xi1>
    %18 = vector.broadcast %17 : vector<2x1xi1> to vector<2x32xi1>
    %c4_i32 = arith.constant 4 : i32
    %19 = vector.broadcast %c4_i32 : i32 to vector<2x1xi32>
    %20 = arith.cmpi slt, %19, %0 : vector<2x1xi32>
    %21 = vector.shape_cast %20 : vector<2x1xi1> to vector<2x1xi1>
    %22 = vector.broadcast %21 : vector<2x1xi1> to vector<2x32xi1>
    %c5_i32 = arith.constant 5 : i32
    %23 = vector.broadcast %c5_i32 : i32 to vector<2x1xi32>
    %24 = arith.cmpi slt, %23, %0 : vector<2x1xi32>
    %25 = vector.shape_cast %24 : vector<2x1xi1> to vector<2x1xi1>
    %26 = vector.broadcast %25 : vector<2x1xi1> to vector<2x32xi1>
    %c6_i32 = arith.constant 6 : i32
    %27 = vector.broadcast %c6_i32 : i32 to vector<2x1xi32>
    %28 = arith.cmpi slt, %27, %0 : vector<2x1xi32>
    %29 = vector.shape_cast %28 : vector<2x1xi1> to vector<2x1xi1>
    %30 = vector.broadcast %29 : vector<2x1xi1> to vector<2x32xi1>
    %c7_i32 = arith.constant 7 : i32
    %31 = vector.broadcast %c7_i32 : i32 to vector<2x1xi32>
    %32 = arith.cmpi slt, %31, %0 : vector<2x1xi32>
    %33 = vector.shape_cast %32 : vector<2x1xi1> to vector<2x1xi1>
    %34 = vector.broadcast %33 : vector<2x1xi1> to vector<2x32xi1>
    %cst = arith.constant 0.000000e+00 : f32
    %35 = vector.broadcast %cst : f32 to vector<2x32xf32>
    %c0_5 = arith.constant 0 : index
    %c0_6 = arith.constant 0 : index
    %c0_7 = arith.constant 0 : index
    %36 = vector.load %arg1[%c0_5, %c0_6, %c0_7] : memref<8x2x128xf32, #tpu.memory_space<vmem>>, vector<1x2x128xf32>
    %37 = vector.shape_cast %36 : vector<1x2x128xf32> to vector<2x128xf32>
    %38 = arith.truncf %35 : vector<2x32xf32> to vector<2x32xbf16>
    %cst_8 = arith.constant dense<0.000000e+00> : vector<2x128xf32>
    %39 = tpu.matmul %38, %1, %cst_8 {dimension_numbers = #tpu.dot_dimension_numbers<[1], [0], [0], [1], [0, 0, 1, 1], [], []>} : vector<2x32xbf16>, vector<32x128xbf16>, vector<2x128xf32> -> vector<2x128xf32>
    %40 = arith.addf %37, %39 : vector<2x128xf32>
    %41 = arith.negf %40 : vector<2x128xf32>
    %42 = math.exp %41 : vector<2x128xf32>
    %cst_9 = arith.constant 1.000000e+00 : f32
    %43 = vector.broadcast %cst_9 : f32 to vector<2x128xf32>
    %44 = arith.addf %43, %42 : vector<2x128xf32>
    %45 = arith.divf %43, %44 : vector<2x128xf32>
    %46 = math.tanh %40 : vector<2x128xf32>
    %47 = vector.extract_strided_slice %45 {offsets = [0, 0], sizes = [2, 32], strides = [1, 1]} : vector<2x128xf32> to vector<2x32xf32>
    %48 = vector.extract_strided_slice %45 {offsets = [0, 32], sizes = [2, 32], strides = [1, 1]} : vector<2x128xf32> to vector<2x32xf32>
    %49 = vector.extract_strided_slice %46 {offsets = [0, 64], sizes = [2, 32], strides = [1, 1]} : vector<2x128xf32> to vector<2x32xf32>
    %50 = vector.extract_strided_slice %45 {offsets = [0, 96], sizes = [2, 32], strides = [1, 1]} : vector<2x128xf32> to vector<2x32xf32>
    %51 = arith.mulf %48, %35 : vector<2x32xf32>
    %52 = arith.mulf %47, %49 : vector<2x32xf32>
    %53 = arith.addf %51, %52 : vector<2x32xf32>
    %54 = math.tanh %53 : vector<2x32xf32>
    %55 = arith.mulf %50, %54 : vector<2x32xf32>
    %cst_10 = arith.constant 0.000000e+00 : f32
    %56 = vector.broadcast %cst_10 : f32 to vector<2x32xf32>
    %57 = arith.select %6, %55, %56 : vector<2x32xi1>, vector<2x32xf32>
    %c0_11 = arith.constant 0 : index
    %c0_12 = arith.constant 0 : index
    %c0_13 = arith.constant 0 : index
    %58 = vector.load %arg10[%c0_11, %c0_12, %c0_13] : memref<8x2x64xf32, #tpu.memory_space<vmem>>, vector<1x2x32xf32>
    %59 = vector.shape_cast %58 : vector<1x2x32xf32> to vector<2x32xf32>
    %60 = vector.shape_cast %57 : vector<2x32xf32> to vector<1x2x32xf32>
    tpu.vector_store %arg10[%c0_11, %c0_12, %c0_13], %60 {strides = array<i32>} : memref<8x2x64xf32, #tpu.memory_space<vmem>>, vector<1x2x32xf32>,
    %61 = arith.select %6, %55, %35 : vector<2x32xi1>, vector<2x32xf32>
    %62 = arith.select %6, %53, %35 : vector<2x32xi1>, vector<2x32xf32>
    %c7 = arith.constant 7 : index
    %c0_14 = arith.constant 0 : index
    %c0_15 = arith.constant 0 : index
    %63 = vector.load %arg2[%c7, %c0_14, %c0_15] : memref<8x2x128xf32, #tpu.memory_space<vmem>>, vector<1x2x128xf32>
    %64 = vector.shape_cast %63 : vector<1x2x128xf32> to vector<2x128xf32>
    %65 = arith.truncf %35 : vector<2x32xf32> to vector<2x32xbf16>
    %cst_16 = arith.constant dense<0.000000e+00> : vector<2x128xf32>
    %66 = tpu.matmul %65, %2, %cst_16 {dimension_numbers = #tpu.dot_dimension_numbers<[1], [0], [0], [1], [0, 0, 1, 1], [], []>} : vector<2x32xbf16>, vector<32x128xbf16>, vector<2x128xf32> -> vector<2x128xf32>
    %67 = arith.addf %64, %66 : vector<2x128xf32>
    %68 = arith.negf %67 : vector<2x128xf32>
    %69 = math.exp %68 : vector<2x128xf32>
    %cst_17 = arith.constant 1.000000e+00 : f32
    %70 = vector.broadcast %cst_17 : f32 to vector<2x128xf32>
    %71 = arith.addf %70, %69 : vector<2x128xf32>
    %72 = arith.divf %70, %71 : vector<2x128xf32>
    %73 = math.tanh %67 : vector<2x128xf32>
    %74 = vector.extract_strided_slice %72 {offsets = [0, 0], sizes = [2, 32], strides = [1, 1]} : vector<2x128xf32> to vector<2x32xf32>
    %75 = vector.extract_strided_slice %72 {offsets = [0, 32], sizes = [2, 32], strides = [1, 1]} : vector<2x128xf32> to vector<2x32xf32>
    %76 = vector.extract_strided_slice %73 {offsets = [0, 64], sizes = [2, 32], strides = [1, 1]} : vector<2x128xf32> to vector<2x32xf32>
    %77 = vector.extract_strided_slice %72 {offsets = [0, 96], sizes = [2, 32], strides = [1, 1]} : vector<2x128xf32> to vector<2x32xf32>
    %78 = arith.mulf %75, %35 : vector<2x32xf32>
    %79 = arith.mulf %74, %76 : vector<2x32xf32>
    %80 = arith.addf %78, %79 : vector<2x32xf32>
    %81 = math.tanh %80 : vector<2x32xf32>
    %82 = arith.mulf %77, %81 : vector<2x32xf32>
    %cst_18 = arith.constant 0.000000e+00 : f32
    %83 = vector.broadcast %cst_18 : f32 to vector<2x32xf32>
    %84 = arith.select %34, %82, %83 : vector<2x32xi1>, vector<2x32xf32>
    %c7_19 = arith.constant 7 : index
    %c0_20 = arith.constant 0 : index
    %c32 = arith.constant 32 : index
    %85 = vector.load %arg10[%c7_19, %c0_20, %c32] : memref<8x2x64xf32, #tpu.memory_space<vmem>>, vector<1x2x32xf32>
    %86 = vector.shape_cast %85 : vector<1x2x32xf32> to vector<2x32xf32>
    %87 = vector.shape_cast %84 : vector<2x32xf32> to vector<1x2x32xf32>
    tpu.vector_store %arg10[%c7_19, %c0_20, %c32], %87 {strides = array<i32>} : memref<8x2x64xf32, #tpu.memory_space<vmem>>, vector<1x2x32xf32>,
    %88 = arith.select %34, %82, %35 : vector<2x32xi1>, vector<2x32xf32>
    %89 = arith.select %34, %80, %35 : vector<2x32xi1>, vector<2x32xf32>
    %c1 = arith.constant 1 : index
    %c0_21 = arith.constant 0 : index
    %c0_22 = arith.constant 0 : index
    %90 = vector.load %arg1[%c1, %c0_21, %c0_22] : memref<8x2x128xf32, #tpu.memory_space<vmem>>, vector<1x2x128xf32>
    %91 = vector.shape_cast %90 : vector<1x2x128xf32> to vector<2x128xf32>
    %92 = arith.truncf %61 : vector<2x32xf32> to vector<2x32xbf16>
    %cst_23 = arith.constant dense<0.000000e+00> : vector<2x128xf32>
    %93 = tpu.matmul %92, %1, %cst_23 {dimension_numbers = #tpu.dot_dimension_numbers<[1], [0], [0], [1], [0, 0, 1, 1], [], []>} : vector<2x32xbf16>, vector<32x128xbf16>, vector<2x128xf32> -> vector<2x128xf32>
    %94 = arith.addf %91, %93 : vector<2x128xf32>
    %95 = arith.negf %94 : vector<2x128xf32>
    %96 = math.exp %95 : vector<2x128xf32>
    %cst_24 = arith.constant 1.000000e+00 : f32
    %97 = vector.broadcast %cst_24 : f32 to vector<2x128xf32>
    %98 = arith.addf %97, %96 : vector<2x128xf32>
    %99 = arith.divf %97, %98 : vector<2x128xf32>
    %100 = math.tanh %94 : vector<2x128xf32>
    %101 = vector.extract_strided_slice %99 {offsets = [0, 0], sizes = [2, 32], strides = [1, 1]} : vector<2x128xf32> to vector<2x32xf32>
    %102 = vector.extract_strided_slice %99 {offsets = [0, 32], sizes = [2, 32], strides = [1, 1]} : vector<2x128xf32> to vector<2x32xf32>
    %103 = vector.extract_strided_slice %100 {offsets = [0, 64], sizes = [2, 32], strides = [1, 1]} : vector<2x128xf32> to vector<2x32xf32>
    %104 = vector.extract_strided_slice %99 {offsets = [0, 96], sizes = [2, 32], strides = [1, 1]} : vector<2x128xf32> to vector<2x32xf32>
    %105 = arith.mulf %102, %62 : vector<2x32xf32>
    %106 = arith.mulf %101, %103 : vector<2x32xf32>
    %107 = arith.addf %105, %106 : vector<2x32xf32>
    %108 = math.tanh %107 : vector<2x32xf32>
    %109 = arith.mulf %104, %108 : vector<2x32xf32>
    %cst_25 = arith.constant 0.000000e+00 : f32
    %110 = vector.broadcast %cst_25 : f32 to vector<2x32xf32>
    %111 = arith.select %10, %109, %110 : vector<2x32xi1>, vector<2x32xf32>
    %c1_26 = arith.constant 1 : index
    %c0_27 = arith.constant 0 : index
    %c0_28 = arith.constant 0 : index
    %112 = vector.load %arg10[%c1_26, %c0_27, %c0_28] : memref<8x2x64xf32, #tpu.memory_space<vmem>>, vector<1x2x32xf32>
    %113 = vector.shape_cast %112 : vector<1x2x32xf32> to vector<2x32xf32>
    %114 = vector.shape_cast %111 : vector<2x32xf32> to vector<1x2x32xf32>
    tpu.vector_store %arg10[%c1_26, %c0_27, %c0_28], %114 {strides = array<i32>} : memref<8x2x64xf32, #tpu.memory_space<vmem>>, vector<1x2x32xf32>,
    %115 = arith.select %10, %109, %61 : vector<2x32xi1>, vector<2x32xf32>
    %116 = arith.select %10, %107, %62 : vector<2x32xi1>, vector<2x32xf32>
    %c6 = arith.constant 6 : index
    %c0_29 = arith.constant 0 : index
    %c0_30 = arith.constant 0 : index
    %117 = vector.load %arg2[%c6, %c0_29, %c0_30] : memref<8x2x128xf32, #tpu.memory_space<vmem>>, vector<1x2x128xf32>
    %118 = vector.shape_cast %117 : vector<1x2x128xf32> to vector<2x128xf32>
    %119 = arith.truncf %88 : vector<2x32xf32> to vector<2x32xbf16>
    %cst_31 = arith.constant dense<0.000000e+00> : vector<2x128xf32>
    %120 = tpu.matmul %119, %2, %cst_31 {dimension_numbers = #tpu.dot_dimension_numbers<[1], [0], [0], [1], [0, 0, 1, 1], [], []>} : vector<2x32xbf16>, vector<32x128xbf16>, vector<2x128xf32> -> vector<2x128xf32>
    %121 = arith.addf %118, %120 : vector<2x128xf32>
    %122 = arith.negf %121 : vector<2x128xf32>
    %123 = math.exp %122 : vector<2x128xf32>
    %cst_32 = arith.constant 1.000000e+00 : f32
    %124 = vector.broadcast %cst_32 : f32 to vector<2x128xf32>
    %125 = arith.addf %124, %123 : vector<2x128xf32>
    %126 = arith.divf %124, %125 : vector<2x128xf32>
    %127 = math.tanh %121 : vector<2x128xf32>
    %128 = vector.extract_strided_slice %126 {offsets = [0, 0], sizes = [2, 32], strides = [1, 1]} : vector<2x128xf32> to vector<2x32xf32>
    %129 = vector.extract_strided_slice %126 {offsets = [0, 32], sizes = [2, 32], strides = [1, 1]} : vector<2x128xf32> to vector<2x32xf32>
    %130 = vector.extract_strided_slice %127 {offsets = [0, 64], sizes = [2, 32], strides = [1, 1]} : vector<2x128xf32> to vector<2x32xf32>
    %131 = vector.extract_strided_slice %126 {offsets = [0, 96], sizes = [2, 32], strides = [1, 1]} : vector<2x128xf32> to vector<2x32xf32>
    %132 = arith.mulf %129, %89 : vector<2x32xf32>
    %133 = arith.mulf %128, %130 : vector<2x32xf32>
    %134 = arith.addf %132, %133 : vector<2x32xf32>
    %135 = math.tanh %134 : vector<2x32xf32>
    %136 = arith.mulf %131, %135 : vector<2x32xf32>
    %cst_33 = arith.constant 0.000000e+00 : f32
    %137 = vector.broadcast %cst_33 : f32 to vector<2x32xf32>
    %138 = arith.select %30, %136, %137 : vector<2x32xi1>, vector<2x32xf32>
    %c6_34 = arith.constant 6 : index
    %c0_35 = arith.constant 0 : index
    %c32_36 = arith.constant 32 : index
    %139 = vector.load %arg10[%c6_34, %c0_35, %c32_36] : memref<8x2x64xf32, #tpu.memory_space<vmem>>, vector<1x2x32xf32>
    %140 = vector.shape_cast %139 : vector<1x2x32xf32> to vector<2x32xf32>
    %141 = vector.shape_cast %138 : vector<2x32xf32> to vector<1x2x32xf32>
    tpu.vector_store %arg10[%c6_34, %c0_35, %c32_36], %141 {strides = array<i32>} : memref<8x2x64xf32, #tpu.memory_space<vmem>>, vector<1x2x32xf32>,
    %142 = arith.select %30, %136, %88 : vector<2x32xi1>, vector<2x32xf32>
    %143 = arith.select %30, %134, %89 : vector<2x32xi1>, vector<2x32xf32>
    %c2 = arith.constant 2 : index
    %c0_37 = arith.constant 0 : index
    %c0_38 = arith.constant 0 : index
    %144 = vector.load %arg1[%c2, %c0_37, %c0_38] : memref<8x2x128xf32, #tpu.memory_space<vmem>>, vector<1x2x128xf32>
    %145 = vector.shape_cast %144 : vector<1x2x128xf32> to vector<2x128xf32>
    %146 = arith.truncf %115 : vector<2x32xf32> to vector<2x32xbf16>
    %cst_39 = arith.constant dense<0.000000e+00> : vector<2x128xf32>
    %147 = tpu.matmul %146, %1, %cst_39 {dimension_numbers = #tpu.dot_dimension_numbers<[1], [0], [0], [1], [0, 0, 1, 1], [], []>} : vector<2x32xbf16>, vector<32x128xbf16>, vector<2x128xf32> -> vector<2x128xf32>
    %148 = arith.addf %145, %147 : vector<2x128xf32>
    %149 = arith.negf %148 : vector<2x128xf32>
    %150 = math.exp %149 : vector<2x128xf32>
    %cst_40 = arith.constant 1.000000e+00 : f32
    %151 = vector.broadcast %cst_40 : f32 to vector<2x128xf32>
    %152 = arith.addf %151, %150 : vector<2x128xf32>
    %153 = arith.divf %151, %152 : vector<2x128xf32>
    %154 = math.tanh %148 : vector<2x128xf32>
    %155 = vector.extract_strided_slice %153 {offsets = [0, 0], sizes = [2, 32], strides = [1, 1]} : vector<2x128xf32> to vector<2x32xf32>
    %156 = vector.extract_strided_slice %153 {offsets = [0, 32], sizes = [2, 32], strides = [1, 1]} : vector<2x128xf32> to vector<2x32xf32>
    %157 = vector.extract_strided_slice %154 {offsets = [0, 64], sizes = [2, 32], strides = [1, 1]} : vector<2x128xf32> to vector<2x32xf32>
    %158 = vector.extract_strided_slice %153 {offsets = [0, 96], sizes = [2, 32], strides = [1, 1]} : vector<2x128xf32> to vector<2x32xf32>
    %159 = arith.mulf %156, %116 : vector<2x32xf32>
    %160 = arith.mulf %155, %157 : vector<2x32xf32>
    %161 = arith.addf %159, %160 : vector<2x32xf32>
    %162 = math.tanh %161 : vector<2x32xf32>
    %163 = arith.mulf %158, %162 : vector<2x32xf32>
    %cst_41 = arith.constant 0.000000e+00 : f32
    %164 = vector.broadcast %cst_41 : f32 to vector<2x32xf32>
    %165 = arith.select %14, %163, %164 : vector<2x32xi1>, vector<2x32xf32>
    %c2_42 = arith.constant 2 : index
    %c0_43 = arith.constant 0 : index
    %c0_44 = arith.constant 0 : index
    %166 = vector.load %arg10[%c2_42, %c0_43, %c0_44] : memref<8x2x64xf32, #tpu.memory_space<vmem>>, vector<1x2x32xf32>
    %167 = vector.shape_cast %166 : vector<1x2x32xf32> to vector<2x32xf32>
    %168 = vector.shape_cast %165 : vector<2x32xf32> to vector<1x2x32xf32>
    tpu.vector_store %arg10[%c2_42, %c0_43, %c0_44], %168 {strides = array<i32>} : memref<8x2x64xf32, #tpu.memory_space<vmem>>, vector<1x2x32xf32>,
    %169 = arith.select %14, %163, %115 : vector<2x32xi1>, vector<2x32xf32>
    %170 = arith.select %14, %161, %116 : vector<2x32xi1>, vector<2x32xf32>
    %c5 = arith.constant 5 : index
    %c0_45 = arith.constant 0 : index
    %c0_46 = arith.constant 0 : index
    %171 = vector.load %arg2[%c5, %c0_45, %c0_46] : memref<8x2x128xf32, #tpu.memory_space<vmem>>, vector<1x2x128xf32>
    %172 = vector.shape_cast %171 : vector<1x2x128xf32> to vector<2x128xf32>
    %173 = arith.truncf %142 : vector<2x32xf32> to vector<2x32xbf16>
    %cst_47 = arith.constant dense<0.000000e+00> : vector<2x128xf32>
    %174 = tpu.matmul %173, %2, %cst_47 {dimension_numbers = #tpu.dot_dimension_numbers<[1], [0], [0], [1], [0, 0, 1, 1], [], []>} : vector<2x32xbf16>, vector<32x128xbf16>, vector<2x128xf32> -> vector<2x128xf32>
    %175 = arith.addf %172, %174 : vector<2x128xf32>
    %176 = arith.negf %175 : vector<2x128xf32>
    %177 = math.exp %176 : vector<2x128xf32>
    %cst_48 = arith.constant 1.000000e+00 : f32
    %178 = vector.broadcast %cst_48 : f32 to vector<2x128xf32>
    %179 = arith.addf %178, %177 : vector<2x128xf32>
    %180 = arith.divf %178, %179 : vector<2x128xf32>
    %181 = math.tanh %175 : vector<2x128xf32>
    %182 = vector.extract_strided_slice %180 {offsets = [0, 0], sizes = [2, 32], strides = [1, 1]} : vector<2x128xf32> to vector<2x32xf32>
    %183 = vector.extract_strided_slice %180 {offsets = [0, 32], sizes = [2, 32], strides = [1, 1]} : vector<2x128xf32> to vector<2x32xf32>
    %184 = vector.extract_strided_slice %181 {offsets = [0, 64], sizes = [2, 32], strides = [1, 1]} : vector<2x128xf32> to vector<2x32xf32>
    %185 = vector.extract_strided_slice %180 {offsets = [0, 96], sizes = [2, 32], strides = [1, 1]} : vector<2x128xf32> to vector<2x32xf32>
    %186 = arith.mulf %183, %143 : vector<2x32xf32>
    %187 = arith.mulf %182, %184 : vector<2x32xf32>
    %188 = arith.addf %186, %187 : vector<2x32xf32>
    %189 = math.tanh %188 : vector<2x32xf32>
    %190 = arith.mulf %185, %189 : vector<2x32xf32>
    %cst_49 = arith.constant 0.000000e+00 : f32
    %191 = vector.broadcast %cst_49 : f32 to vector<2x32xf32>
    %192 = arith.select %26, %190, %191 : vector<2x32xi1>, vector<2x32xf32>
    %c5_50 = arith.constant 5 : index
    %c0_51 = arith.constant 0 : index
    %c32_52 = arith.constant 32 : index
    %193 = vector.load %arg10[%c5_50, %c0_51, %c32_52] : memref<8x2x64xf32, #tpu.memory_space<vmem>>, vector<1x2x32xf32>
    %194 = vector.shape_cast %193 : vector<1x2x32xf32> to vector<2x32xf32>
    %195 = vector.shape_cast %192 : vector<2x32xf32> to vector<1x2x32xf32>
    tpu.vector_store %arg10[%c5_50, %c0_51, %c32_52], %195 {strides = array<i32>} : memref<8x2x64xf32, #tpu.memory_space<vmem>>, vector<1x2x32xf32>,
    %196 = arith.select %26, %190, %142 : vector<2x32xi1>, vector<2x32xf32>
    %197 = arith.select %26, %188, %143 : vector<2x32xi1>, vector<2x32xf32>
    %c3 = arith.constant 3 : index
    %c0_53 = arith.constant 0 : index
    %c0_54 = arith.constant 0 : index
    %198 = vector.load %arg1[%c3, %c0_53, %c0_54] : memref<8x2x128xf32, #tpu.memory_space<vmem>>, vector<1x2x128xf32>
    %199 = vector.shape_cast %198 : vector<1x2x128xf32> to vector<2x128xf32>
    %200 = arith.truncf %169 : vector<2x32xf32> to vector<2x32xbf16>
    %cst_55 = arith.constant dense<0.000000e+00> : vector<2x128xf32>
    %201 = tpu.matmul %200, %1, %cst_55 {dimension_numbers = #tpu.dot_dimension_numbers<[1], [0], [0], [1], [0, 0, 1, 1], [], []>} : vector<2x32xbf16>, vector<32x128xbf16>, vector<2x128xf32> -> vector<2x128xf32>
    %202 = arith.addf %199, %201 : vector<2x128xf32>
    %203 = arith.negf %202 : vector<2x128xf32>
    %204 = math.exp %203 : vector<2x128xf32>
    %cst_56 = arith.constant 1.000000e+00 : f32
    %205 = vector.broadcast %cst_56 : f32 to vector<2x128xf32>
    %206 = arith.addf %205, %204 : vector<2x128xf32>
    %207 = arith.divf %205, %206 : vector<2x128xf32>
    %208 = math.tanh %202 : vector<2x128xf32>
    %209 = vector.extract_strided_slice %207 {offsets = [0, 0], sizes = [2, 32], strides = [1, 1]} : vector<2x128xf32> to vector<2x32xf32>
    %210 = vector.extract_strided_slice %207 {offsets = [0, 32], sizes = [2, 32], strides = [1, 1]} : vector<2x128xf32> to vector<2x32xf32>
    %211 = vector.extract_strided_slice %208 {offsets = [0, 64], sizes = [2, 32], strides = [1, 1]} : vector<2x128xf32> to vector<2x32xf32>
    %212 = vector.extract_strided_slice %207 {offsets = [0, 96], sizes = [2, 32], strides = [1, 1]} : vector<2x128xf32> to vector<2x32xf32>
    %213 = arith.mulf %210, %170 : vector<2x32xf32>
    %214 = arith.mulf %209, %211 : vector<2x32xf32>
    %215 = arith.addf %213, %214 : vector<2x32xf32>
    %216 = math.tanh %215 : vector<2x32xf32>
    %217 = arith.mulf %212, %216 : vector<2x32xf32>
    %cst_57 = arith.constant 0.000000e+00 : f32
    %218 = vector.broadcast %cst_57 : f32 to vector<2x32xf32>
    %219 = arith.select %18, %217, %218 : vector<2x32xi1>, vector<2x32xf32>
    %c3_58 = arith.constant 3 : index
    %c0_59 = arith.constant 0 : index
    %c0_60 = arith.constant 0 : index
    %220 = vector.load %arg10[%c3_58, %c0_59, %c0_60] : memref<8x2x64xf32, #tpu.memory_space<vmem>>, vector<1x2x32xf32>
    %221 = vector.shape_cast %220 : vector<1x2x32xf32> to vector<2x32xf32>
    %222 = vector.shape_cast %219 : vector<2x32xf32> to vector<1x2x32xf32>
    tpu.vector_store %arg10[%c3_58, %c0_59, %c0_60], %222 {strides = array<i32>} : memref<8x2x64xf32, #tpu.memory_space<vmem>>, vector<1x2x32xf32>,
    %223 = arith.select %18, %217, %169 : vector<2x32xi1>, vector<2x32xf32>
    %224 = arith.select %18, %215, %170 : vector<2x32xi1>, vector<2x32xf32>
    %c4 = arith.constant 4 : index
    %c0_61 = arith.constant 0 : index
    %c0_62 = arith.constant 0 : index
    %225 = vector.load %arg2[%c4, %c0_61, %c0_62] : memref<8x2x128xf32, #tpu.memory_space<vmem>>, vector<1x2x128xf32>
    %226 = vector.shape_cast %225 : vector<1x2x128xf32> to vector<2x128xf32>
    %227 = arith.truncf %196 : vector<2x32xf32> to vector<2x32xbf16>
    %cst_63 = arith.constant dense<0.000000e+00> : vector<2x128xf32>
    %228 = tpu.matmul %227, %2, %cst_63 {dimension_numbers = #tpu.dot_dimension_numbers<[1], [0], [0], [1], [0, 0, 1, 1], [], []>} : vector<2x32xbf16>, vector<32x128xbf16>, vector<2x128xf32> -> vector<2x128xf32>
    %229 = arith.addf %226, %228 : vector<2x128xf32>
    %230 = arith.negf %229 : vector<2x128xf32>
    %231 = math.exp %230 : vector<2x128xf32>
    %cst_64 = arith.constant 1.000000e+00 : f32
    %232 = vector.broadcast %cst_64 : f32 to vector<2x128xf32>
    %233 = arith.addf %232, %231 : vector<2x128xf32>
    %234 = arith.divf %232, %233 : vector<2x128xf32>
    %235 = math.tanh %229 : vector<2x128xf32>
    %236 = vector.extract_strided_slice %234 {offsets = [0, 0], sizes = [2, 32], strides = [1, 1]} : vector<2x128xf32> to vector<2x32xf32>
    %237 = vector.extract_strided_slice %234 {offsets = [0, 32], sizes = [2, 32], strides = [1, 1]} : vector<2x128xf32> to vector<2x32xf32>
    %238 = vector.extract_strided_slice %235 {offsets = [0, 64], sizes = [2, 32], strides = [1, 1]} : vector<2x128xf32> to vector<2x32xf32>
    %239 = vector.extract_strided_slice %234 {offsets = [0, 96], sizes = [2, 32], strides = [1, 1]} : vector<2x128xf32> to vector<2x32xf32>
    %240 = arith.mulf %237, %197 : vector<2x32xf32>
    %241 = arith.mulf %236, %238 : vector<2x32xf32>
    %242 = arith.addf %240, %241 : vector<2x32xf32>
    %243 = math.tanh %242 : vector<2x32xf32>
    %244 = arith.mulf %239, %243 : vector<2x32xf32>
    %cst_65 = arith.constant 0.000000e+00 : f32
    %245 = vector.broadcast %cst_65 : f32 to vector<2x32xf32>
    %246 = arith.select %22, %244, %245 : vector<2x32xi1>, vector<2x32xf32>
    %c4_66 = arith.constant 4 : index
    %c0_67 = arith.constant 0 : index
    %c32_68 = arith.constant 32 : index
    %247 = vector.load %arg10[%c4_66, %c0_67, %c32_68] : memref<8x2x64xf32, #tpu.memory_space<vmem>>, vector<1x2x32xf32>
    %248 = vector.shape_cast %247 : vector<1x2x32xf32> to vector<2x32xf32>
    %249 = vector.shape_cast %246 : vector<2x32xf32> to vector<1x2x32xf32>
    tpu.vector_store %arg10[%c4_66, %c0_67, %c32_68], %249 {strides = array<i32>} : memref<8x2x64xf32, #tpu.memory_space<vmem>>, vector<1x2x32xf32>,
    %250 = arith.select %22, %244, %196 : vector<2x32xi1>, vector<2x32xf32>
    %251 = arith.select %22, %242, %197 : vector<2x32xi1>, vector<2x32xf32>
    %c4_69 = arith.constant 4 : index
    %c0_70 = arith.constant 0 : index
    %c0_71 = arith.constant 0 : index
    %252 = vector.load %arg1[%c4_69, %c0_70, %c0_71] : memref<8x2x128xf32, #tpu.memory_space<vmem>>, vector<1x2x128xf32>
    %253 = vector.shape_cast %252 : vector<1x2x128xf32> to vector<2x128xf32>
    %254 = arith.truncf %223 : vector<2x32xf32> to vector<2x32xbf16>
    %cst_72 = arith.constant dense<0.000000e+00> : vector<2x128xf32>
    %255 = tpu.matmul %254, %1, %cst_72 {dimension_numbers = #tpu.dot_dimension_numbers<[1], [0], [0], [1], [0, 0, 1, 1], [], []>} : vector<2x32xbf16>, vector<32x128xbf16>, vector<2x128xf32> -> vector<2x128xf32>
    %256 = arith.addf %253, %255 : vector<2x128xf32>
    %257 = arith.negf %256 : vector<2x128xf32>
    %258 = math.exp %257 : vector<2x128xf32>
    %cst_73 = arith.constant 1.000000e+00 : f32
    %259 = vector.broadcast %cst_73 : f32 to vector<2x128xf32>
    %260 = arith.addf %259, %258 : vector<2x128xf32>
    %261 = arith.divf %259, %260 : vector<2x128xf32>
    %262 = math.tanh %256 : vector<2x128xf32>
    %263 = vector.extract_strided_slice %261 {offsets = [0, 0], sizes = [2, 32], strides = [1, 1]} : vector<2x128xf32> to vector<2x32xf32>
    %264 = vector.extract_strided_slice %261 {offsets = [0, 32], sizes = [2, 32], strides = [1, 1]} : vector<2x128xf32> to vector<2x32xf32>
    %265 = vector.extract_strided_slice %262 {offsets = [0, 64], sizes = [2, 32], strides = [1, 1]} : vector<2x128xf32> to vector<2x32xf32>
    %266 = vector.extract_strided_slice %261 {offsets = [0, 96], sizes = [2, 32], strides = [1, 1]} : vector<2x128xf32> to vector<2x32xf32>
    %267 = arith.mulf %264, %224 : vector<2x32xf32>
    %268 = arith.mulf %263, %265 : vector<2x32xf32>
    %269 = arith.addf %267, %268 : vector<2x32xf32>
    %270 = math.tanh %269 : vector<2x32xf32>
    %271 = arith.mulf %266, %270 : vector<2x32xf32>
    %cst_74 = arith.constant 0.000000e+00 : f32
    %272 = vector.broadcast %cst_74 : f32 to vector<2x32xf32>
    %273 = arith.select %22, %271, %272 : vector<2x32xi1>, vector<2x32xf32>
    %c4_75 = arith.constant 4 : index
    %c0_76 = arith.constant 0 : index
    %c0_77 = arith.constant 0 : index
    %274 = vector.load %arg10[%c4_75, %c0_76, %c0_77] : memref<8x2x64xf32, #tpu.memory_space<vmem>>, vector<1x2x32xf32>
    %275 = vector.shape_cast %274 : vector<1x2x32xf32> to vector<2x32xf32>
    %276 = vector.shape_cast %273 : vector<2x32xf32> to vector<1x2x32xf32>
    tpu.vector_store %arg10[%c4_75, %c0_76, %c0_77], %276 {strides = array<i32>} : memref<8x2x64xf32, #tpu.memory_space<vmem>>, vector<1x2x32xf32>,
    %277 = arith.select %22, %271, %223 : vector<2x32xi1>, vector<2x32xf32>
    %278 = arith.select %22, %269, %224 : vector<2x32xi1>, vector<2x32xf32>
    %c3_78 = arith.constant 3 : index
    %c0_79 = arith.constant 0 : index
    %c0_80 = arith.constant 0 : index
    %279 = vector.load %arg2[%c3_78, %c0_79, %c0_80] : memref<8x2x128xf32, #tpu.memory_space<vmem>>, vector<1x2x128xf32>
    %280 = vector.shape_cast %279 : vector<1x2x128xf32> to vector<2x128xf32>
    %281 = arith.truncf %250 : vector<2x32xf32> to vector<2x32xbf16>
    %cst_81 = arith.constant dense<0.000000e+00> : vector<2x128xf32>
    %282 = tpu.matmul %281, %2, %cst_81 {dimension_numbers = #tpu.dot_dimension_numbers<[1], [0], [0], [1], [0, 0, 1, 1], [], []>} : vector<2x32xbf16>, vector<32x128xbf16>, vector<2x128xf32> -> vector<2x128xf32>
    %283 = arith.addf %280, %282 : vector<2x128xf32>
    %284 = arith.negf %283 : vector<2x128xf32>
    %285 = math.exp %284 : vector<2x128xf32>
    %cst_82 = arith.constant 1.000000e+00 : f32
    %286 = vector.broadcast %cst_82 : f32 to vector<2x128xf32>
    %287 = arith.addf %286, %285 : vector<2x128xf32>
    %288 = arith.divf %286, %287 : vector<2x128xf32>
    %289 = math.tanh %283 : vector<2x128xf32>
    %290 = vector.extract_strided_slice %288 {offsets = [0, 0], sizes = [2, 32], strides = [1, 1]} : vector<2x128xf32> to vector<2x32xf32>
    %291 = vector.extract_strided_slice %288 {offsets = [0, 32], sizes = [2, 32], strides = [1, 1]} : vector<2x128xf32> to vector<2x32xf32>
    %292 = vector.extract_strided_slice %289 {offsets = [0, 64], sizes = [2, 32], strides = [1, 1]} : vector<2x128xf32> to vector<2x32xf32>
    %293 = vector.extract_strided_slice %288 {offsets = [0, 96], sizes = [2, 32], strides = [1, 1]} : vector<2x128xf32> to vector<2x32xf32>
    %294 = arith.mulf %291, %251 : vector<2x32xf32>
    %295 = arith.mulf %290, %292 : vector<2x32xf32>
    %296 = arith.addf %294, %295 : vector<2x32xf32>
    %297 = math.tanh %296 : vector<2x32xf32>
    %298 = arith.mulf %293, %297 : vector<2x32xf32>
    %cst_83 = arith.constant 0.000000e+00 : f32
    %299 = vector.broadcast %cst_83 : f32 to vector<2x32xf32>
    %300 = arith.select %18, %298, %299 : vector<2x32xi1>, vector<2x32xf32>
    %c3_84 = arith.constant 3 : index
    %c0_85 = arith.constant 0 : index
    %c32_86 = arith.constant 32 : index
    %301 = vector.load %arg10[%c3_84, %c0_85, %c32_86] : memref<8x2x64xf32, #tpu.memory_space<vmem>>, vector<1x2x32xf32>
    %302 = vector.shape_cast %301 : vector<1x2x32xf32> to vector<2x32xf32>
    %303 = vector.shape_cast %300 : vector<2x32xf32> to vector<1x2x32xf32>
    tpu.vector_store %arg10[%c3_84, %c0_85, %c32_86], %303 {strides = array<i32>} : memref<8x2x64xf32, #tpu.memory_space<vmem>>, vector<1x2x32xf32>,
    %304 = arith.select %18, %298, %250 : vector<2x32xi1>, vector<2x32xf32>
    %305 = arith.select %18, %296, %251 : vector<2x32xi1>, vector<2x32xf32>
    %c5_87 = arith.constant 5 : index
    %c0_88 = arith.constant 0 : index
    %c0_89 = arith.constant 0 : index
    %306 = vector.load %arg1[%c5_87, %c0_88, %c0_89] : memref<8x2x128xf32, #tpu.memory_space<vmem>>, vector<1x2x128xf32>
    %307 = vector.shape_cast %306 : vector<1x2x128xf32> to vector<2x128xf32>
    %308 = arith.truncf %277 : vector<2x32xf32> to vector<2x32xbf16>
    %cst_90 = arith.constant dense<0.000000e+00> : vector<2x128xf32>
    %309 = tpu.matmul %308, %1, %cst_90 {dimension_numbers = #tpu.dot_dimension_numbers<[1], [0], [0], [1], [0, 0, 1, 1], [], []>} : vector<2x32xbf16>, vector<32x128xbf16>, vector<2x128xf32> -> vector<2x128xf32>
    %310 = arith.addf %307, %309 : vector<2x128xf32>
    %311 = arith.negf %310 : vector<2x128xf32>
    %312 = math.exp %311 : vector<2x128xf32>
    %cst_91 = arith.constant 1.000000e+00 : f32
    %313 = vector.broadcast %cst_91 : f32 to vector<2x128xf32>
    %314 = arith.addf %313, %312 : vector<2x128xf32>
    %315 = arith.divf %313, %314 : vector<2x128xf32>
    %316 = math.tanh %310 : vector<2x128xf32>
    %317 = vector.extract_strided_slice %315 {offsets = [0, 0], sizes = [2, 32], strides = [1, 1]} : vector<2x128xf32> to vector<2x32xf32>
    %318 = vector.extract_strided_slice %315 {offsets = [0, 32], sizes = [2, 32], strides = [1, 1]} : vector<2x128xf32> to vector<2x32xf32>
    %319 = vector.extract_strided_slice %316 {offsets = [0, 64], sizes = [2, 32], strides = [1, 1]} : vector<2x128xf32> to vector<2x32xf32>
    %320 = vector.extract_strided_slice %315 {offsets = [0, 96], sizes = [2, 32], strides = [1, 1]} : vector<2x128xf32> to vector<2x32xf32>
    %321 = arith.mulf %318, %278 : vector<2x32xf32>
    %322 = arith.mulf %317, %319 : vector<2x32xf32>
    %323 = arith.addf %321, %322 : vector<2x32xf32>
    %324 = math.tanh %323 : vector<2x32xf32>
    %325 = arith.mulf %320, %324 : vector<2x32xf32>
    %cst_92 = arith.constant 0.000000e+00 : f32
    %326 = vector.broadcast %cst_92 : f32 to vector<2x32xf32>
    %327 = arith.select %26, %325, %326 : vector<2x32xi1>, vector<2x32xf32>
    %c5_93 = arith.constant 5 : index
    %c0_94 = arith.constant 0 : index
    %c0_95 = arith.constant 0 : index
    %328 = vector.load %arg10[%c5_93, %c0_94, %c0_95] : memref<8x2x64xf32, #tpu.memory_space<vmem>>, vector<1x2x32xf32>
    %329 = vector.shape_cast %328 : vector<1x2x32xf32> to vector<2x32xf32>
    %330 = vector.shape_cast %327 : vector<2x32xf32> to vector<1x2x32xf32>
    tpu.vector_store %arg10[%c5_93, %c0_94, %c0_95], %330 {strides = array<i32>} : memref<8x2x64xf32, #tpu.memory_space<vmem>>, vector<1x2x32xf32>,
    %331 = arith.select %26, %325, %277 : vector<2x32xi1>, vector<2x32xf32>
    %332 = arith.select %26, %323, %278 : vector<2x32xi1>, vector<2x32xf32>
    %c2_96 = arith.constant 2 : index
    %c0_97 = arith.constant 0 : index
    %c0_98 = arith.constant 0 : index
    %333 = vector.load %arg2[%c2_96, %c0_97, %c0_98] : memref<8x2x128xf32, #tpu.memory_space<vmem>>, vector<1x2x128xf32>
    %334 = vector.shape_cast %333 : vector<1x2x128xf32> to vector<2x128xf32>
    %335 = arith.truncf %304 : vector<2x32xf32> to vector<2x32xbf16>
    %cst_99 = arith.constant dense<0.000000e+00> : vector<2x128xf32>
    %336 = tpu.matmul %335, %2, %cst_99 {dimension_numbers = #tpu.dot_dimension_numbers<[1], [0], [0], [1], [0, 0, 1, 1], [], []>} : vector<2x32xbf16>, vector<32x128xbf16>, vector<2x128xf32> -> vector<2x128xf32>
    %337 = arith.addf %334, %336 : vector<2x128xf32>
    %338 = arith.negf %337 : vector<2x128xf32>
    %339 = math.exp %338 : vector<2x128xf32>
    %cst_100 = arith.constant 1.000000e+00 : f32
    %340 = vector.broadcast %cst_100 : f32 to vector<2x128xf32>
    %341 = arith.addf %340, %339 : vector<2x128xf32>
    %342 = arith.divf %340, %341 : vector<2x128xf32>
    %343 = math.tanh %337 : vector<2x128xf32>
    %344 = vector.extract_strided_slice %342 {offsets = [0, 0], sizes = [2, 32], strides = [1, 1]} : vector<2x128xf32> to vector<2x32xf32>
    %345 = vector.extract_strided_slice %342 {offsets = [0, 32], sizes = [2, 32], strides = [1, 1]} : vector<2x128xf32> to vector<2x32xf32>
    %346 = vector.extract_strided_slice %343 {offsets = [0, 64], sizes = [2, 32], strides = [1, 1]} : vector<2x128xf32> to vector<2x32xf32>
    %347 = vector.extract_strided_slice %342 {offsets = [0, 96], sizes = [2, 32], strides = [1, 1]} : vector<2x128xf32> to vector<2x32xf32>
    %348 = arith.mulf %345, %305 : vector<2x32xf32>
    %349 = arith.mulf %344, %346 : vector<2x32xf32>
    %350 = arith.addf %348, %349 : vector<2x32xf32>
    %351 = math.tanh %350 : vector<2x32xf32>
    %352 = arith.mulf %347, %351 : vector<2x32xf32>
    %cst_101 = arith.constant 0.000000e+00 : f32
    %353 = vector.broadcast %cst_101 : f32 to vector<2x32xf32>
    %354 = arith.select %14, %352, %353 : vector<2x32xi1>, vector<2x32xf32>
    %c2_102 = arith.constant 2 : index
    %c0_103 = arith.constant 0 : index
    %c32_104 = arith.constant 32 : index
    %355 = vector.load %arg10[%c2_102, %c0_103, %c32_104] : memref<8x2x64xf32, #tpu.memory_space<vmem>>, vector<1x2x32xf32>
    %356 = vector.shape_cast %355 : vector<1x2x32xf32> to vector<2x32xf32>
    %357 = vector.shape_cast %354 : vector<2x32xf32> to vector<1x2x32xf32>
    tpu.vector_store %arg10[%c2_102, %c0_103, %c32_104], %357 {strides = array<i32>} : memref<8x2x64xf32, #tpu.memory_space<vmem>>, vector<1x2x32xf32>,
    %358 = arith.select %14, %352, %304 : vector<2x32xi1>, vector<2x32xf32>
    %359 = arith.select %14, %350, %305 : vector<2x32xi1>, vector<2x32xf32>
    %c6_105 = arith.constant 6 : index
    %c0_106 = arith.constant 0 : index
    %c0_107 = arith.constant 0 : index
    %360 = vector.load %arg1[%c6_105, %c0_106, %c0_107] : memref<8x2x128xf32, #tpu.memory_space<vmem>>, vector<1x2x128xf32>
    %361 = vector.shape_cast %360 : vector<1x2x128xf32> to vector<2x128xf32>
    %362 = arith.truncf %331 : vector<2x32xf32> to vector<2x32xbf16>
    %cst_108 = arith.constant dense<0.000000e+00> : vector<2x128xf32>
    %363 = tpu.matmul %362, %1, %cst_108 {dimension_numbers = #tpu.dot_dimension_numbers<[1], [0], [0], [1], [0, 0, 1, 1], [], []>} : vector<2x32xbf16>, vector<32x128xbf16>, vector<2x128xf32> -> vector<2x128xf32>
    %364 = arith.addf %361, %363 : vector<2x128xf32>
    %365 = arith.negf %364 : vector<2x128xf32>
    %366 = math.exp %365 : vector<2x128xf32>
    %cst_109 = arith.constant 1.000000e+00 : f32
    %367 = vector.broadcast %cst_109 : f32 to vector<2x128xf32>
    %368 = arith.addf %367, %366 : vector<2x128xf32>
    %369 = arith.divf %367, %368 : vector<2x128xf32>
    %370 = math.tanh %364 : vector<2x128xf32>
    %371 = vector.extract_strided_slice %369 {offsets = [0, 0], sizes = [2, 32], strides = [1, 1]} : vector<2x128xf32> to vector<2x32xf32>
    %372 = vector.extract_strided_slice %369 {offsets = [0, 32], sizes = [2, 32], strides = [1, 1]} : vector<2x128xf32> to vector<2x32xf32>
    %373 = vector.extract_strided_slice %370 {offsets = [0, 64], sizes = [2, 32], strides = [1, 1]} : vector<2x128xf32> to vector<2x32xf32>
    %374 = vector.extract_strided_slice %369 {offsets = [0, 96], sizes = [2, 32], strides = [1, 1]} : vector<2x128xf32> to vector<2x32xf32>
    %375 = arith.mulf %372, %332 : vector<2x32xf32>
    %376 = arith.mulf %371, %373 : vector<2x32xf32>
    %377 = arith.addf %375, %376 : vector<2x32xf32>
    %378 = math.tanh %377 : vector<2x32xf32>
    %379 = arith.mulf %374, %378 : vector<2x32xf32>
    %cst_110 = arith.constant 0.000000e+00 : f32
    %380 = vector.broadcast %cst_110 : f32 to vector<2x32xf32>
    %381 = arith.select %30, %379, %380 : vector<2x32xi1>, vector<2x32xf32>
    %c6_111 = arith.constant 6 : index
    %c0_112 = arith.constant 0 : index
    %c0_113 = arith.constant 0 : index
    %382 = vector.load %arg10[%c6_111, %c0_112, %c0_113] : memref<8x2x64xf32, #tpu.memory_space<vmem>>, vector<1x2x32xf32>
    %383 = vector.shape_cast %382 : vector<1x2x32xf32> to vector<2x32xf32>
    %384 = vector.shape_cast %381 : vector<2x32xf32> to vector<1x2x32xf32>
    tpu.vector_store %arg10[%c6_111, %c0_112, %c0_113], %384 {strides = array<i32>} : memref<8x2x64xf32, #tpu.memory_space<vmem>>, vector<1x2x32xf32>,
    %385 = arith.select %30, %379, %331 : vector<2x32xi1>, vector<2x32xf32>
    %386 = arith.select %30, %377, %332 : vector<2x32xi1>, vector<2x32xf32>
    %c1_114 = arith.constant 1 : index
    %c0_115 = arith.constant 0 : index
    %c0_116 = arith.constant 0 : index
    %387 = vector.load %arg2[%c1_114, %c0_115, %c0_116] : memref<8x2x128xf32, #tpu.memory_space<vmem>>, vector<1x2x128xf32>
    %388 = vector.shape_cast %387 : vector<1x2x128xf32> to vector<2x128xf32>
    %389 = arith.truncf %358 : vector<2x32xf32> to vector<2x32xbf16>
    %cst_117 = arith.constant dense<0.000000e+00> : vector<2x128xf32>
    %390 = tpu.matmul %389, %2, %cst_117 {dimension_numbers = #tpu.dot_dimension_numbers<[1], [0], [0], [1], [0, 0, 1, 1], [], []>} : vector<2x32xbf16>, vector<32x128xbf16>, vector<2x128xf32> -> vector<2x128xf32>
    %391 = arith.addf %388, %390 : vector<2x128xf32>
    %392 = arith.negf %391 : vector<2x128xf32>
    %393 = math.exp %392 : vector<2x128xf32>
    %cst_118 = arith.constant 1.000000e+00 : f32
    %394 = vector.broadcast %cst_118 : f32 to vector<2x128xf32>
    %395 = arith.addf %394, %393 : vector<2x128xf32>
    %396 = arith.divf %394, %395 : vector<2x128xf32>
    %397 = math.tanh %391 : vector<2x128xf32>
    %398 = vector.extract_strided_slice %396 {offsets = [0, 0], sizes = [2, 32], strides = [1, 1]} : vector<2x128xf32> to vector<2x32xf32>
    %399 = vector.extract_strided_slice %396 {offsets = [0, 32], sizes = [2, 32], strides = [1, 1]} : vector<2x128xf32> to vector<2x32xf32>
    %400 = vector.extract_strided_slice %397 {offsets = [0, 64], sizes = [2, 32], strides = [1, 1]} : vector<2x128xf32> to vector<2x32xf32>
    %401 = vector.extract_strided_slice %396 {offsets = [0, 96], sizes = [2, 32], strides = [1, 1]} : vector<2x128xf32> to vector<2x32xf32>
    %402 = arith.mulf %399, %359 : vector<2x32xf32>
    %403 = arith.mulf %398, %400 : vector<2x32xf32>
    %404 = arith.addf %402, %403 : vector<2x32xf32>
    %405 = math.tanh %404 : vector<2x32xf32>
    %406 = arith.mulf %401, %405 : vector<2x32xf32>
    %cst_119 = arith.constant 0.000000e+00 : f32
    %407 = vector.broadcast %cst_119 : f32 to vector<2x32xf32>
    %408 = arith.select %10, %406, %407 : vector<2x32xi1>, vector<2x32xf32>
    %c1_120 = arith.constant 1 : index
    %c0_121 = arith.constant 0 : index
    %c32_122 = arith.constant 32 : index
    %409 = vector.load %arg10[%c1_120, %c0_121, %c32_122] : memref<8x2x64xf32, #tpu.memory_space<vmem>>, vector<1x2x32xf32>
    %410 = vector.shape_cast %409 : vector<1x2x32xf32> to vector<2x32xf32>
    %411 = vector.shape_cast %408 : vector<2x32xf32> to vector<1x2x32xf32>
    tpu.vector_store %arg10[%c1_120, %c0_121, %c32_122], %411 {strides = array<i32>} : memref<8x2x64xf32, #tpu.memory_space<vmem>>, vector<1x2x32xf32>,
    %412 = arith.select %10, %406, %358 : vector<2x32xi1>, vector<2x32xf32>
    %413 = arith.select %10, %404, %359 : vector<2x32xi1>, vector<2x32xf32>
    %c7_123 = arith.constant 7 : index
    %c0_124 = arith.constant 0 : index
    %c0_125 = arith.constant 0 : index
    %414 = vector.load %arg1[%c7_123, %c0_124, %c0_125] : memref<8x2x128xf32, #tpu.memory_space<vmem>>, vector<1x2x128xf32>
    %415 = vector.shape_cast %414 : vector<1x2x128xf32> to vector<2x128xf32>
    %416 = arith.truncf %385 : vector<2x32xf32> to vector<2x32xbf16>
    %cst_126 = arith.constant dense<0.000000e+00> : vector<2x128xf32>
    %417 = tpu.matmul %416, %1, %cst_126 {dimension_numbers = #tpu.dot_dimension_numbers<[1], [0], [0], [1], [0, 0, 1, 1], [], []>} : vector<2x32xbf16>, vector<32x128xbf16>, vector<2x128xf32> -> vector<2x128xf32>
    %418 = arith.addf %415, %417 : vector<2x128xf32>
    %419 = arith.negf %418 : vector<2x128xf32>
    %420 = math.exp %419 : vector<2x128xf32>
    %cst_127 = arith.constant 1.000000e+00 : f32
    %421 = vector.broadcast %cst_127 : f32 to vector<2x128xf32>
    %422 = arith.addf %421, %420 : vector<2x128xf32>
    %423 = arith.divf %421, %422 : vector<2x128xf32>
    %424 = math.tanh %418 : vector<2x128xf32>
    %425 = vector.extract_strided_slice %423 {offsets = [0, 0], sizes = [2, 32], strides = [1, 1]} : vector<2x128xf32> to vector<2x32xf32>
    %426 = vector.extract_strided_slice %423 {offsets = [0, 32], sizes = [2, 32], strides = [1, 1]} : vector<2x128xf32> to vector<2x32xf32>
    %427 = vector.extract_strided_slice %424 {offsets = [0, 64], sizes = [2, 32], strides = [1, 1]} : vector<2x128xf32> to vector<2x32xf32>
    %428 = vector.extract_strided_slice %423 {offsets = [0, 96], sizes = [2, 32], strides = [1, 1]} : vector<2x128xf32> to vector<2x32xf32>
    %429 = arith.mulf %426, %386 : vector<2x32xf32>
    %430 = arith.mulf %425, %427 : vector<2x32xf32>
    %431 = arith.addf %429, %430 : vector<2x32xf32>
    %432 = math.tanh %431 : vector<2x32xf32>
    %433 = arith.mulf %428, %432 : vector<2x32xf32>
    %cst_128 = arith.constant 0.000000e+00 : f32
    %434 = vector.broadcast %cst_128 : f32 to vector<2x32xf32>
    %435 = arith.select %34, %433, %434 : vector<2x32xi1>, vector<2x32xf32>
    %c7_129 = arith.constant 7 : index
    %c0_130 = arith.constant 0 : index
    %c0_131 = arith.constant 0 : index
    %436 = vector.load %arg10[%c7_129, %c0_130, %c0_131] : memref<8x2x64xf32, #tpu.memory_space<vmem>>, vector<1x2x32xf32>
    %437 = vector.shape_cast %436 : vector<1x2x32xf32> to vector<2x32xf32>
    %438 = vector.shape_cast %435 : vector<2x32xf32> to vector<1x2x32xf32>
    tpu.vector_store %arg10[%c7_129, %c0_130, %c0_131], %438 {strides = array<i32>} : memref<8x2x64xf32, #tpu.memory_space<vmem>>, vector<1x2x32xf32>,
    %439 = arith.select %34, %433, %385 : vector<2x32xi1>, vector<2x32xf32>
    %c0_132 = arith.constant 0 : index
    %c0_133 = arith.constant 0 : index
    %c0_134 = arith.constant 0 : index
    %440 = vector.load %arg2[%c0_132, %c0_133, %c0_134] : memref<8x2x128xf32, #tpu.memory_space<vmem>>, vector<1x2x128xf32>
    %441 = vector.shape_cast %440 : vector<1x2x128xf32> to vector<2x128xf32>
    %442 = arith.truncf %412 : vector<2x32xf32> to vector<2x32xbf16>
    %cst_135 = arith.constant dense<0.000000e+00> : vector<2x128xf32>
    %443 = tpu.matmul %442, %2, %cst_135 {dimension_numbers = #tpu.dot_dimension_numbers<[1], [0], [0], [1], [0, 0, 1, 1], [], []>} : vector<2x32xbf16>, vector<32x128xbf16>, vector<2x128xf32> -> vector<2x128xf32>
    %444 = arith.addf %441, %443 : vector<2x128xf32>
    %445 = arith.negf %444 : vector<2x128xf32>
    %446 = math.exp %445 : vector<2x128xf32>
    %cst_136 = arith.constant 1.000000e+00 : f32
    %447 = vector.broadcast %cst_136 : f32 to vector<2x128xf32>
    %448 = arith.addf %447, %446 : vector<2x128xf32>
    %449 = arith.divf %447, %448 : vector<2x128xf32>
    %450 = math.tanh %444 : vector<2x128xf32>
    %451 = vector.extract_strided_slice %449 {offsets = [0, 0], sizes = [2, 32], strides = [1, 1]} : vector<2x128xf32> to vector<2x32xf32>
    %452 = vector.extract_strided_slice %449 {offsets = [0, 32], sizes = [2, 32], strides = [1, 1]} : vector<2x128xf32> to vector<2x32xf32>
    %453 = vector.extract_strided_slice %450 {offsets = [0, 64], sizes = [2, 32], strides = [1, 1]} : vector<2x128xf32> to vector<2x32xf32>
    %454 = vector.extract_strided_slice %449 {offsets = [0, 96], sizes = [2, 32], strides = [1, 1]} : vector<2x128xf32> to vector<2x32xf32>
    %455 = arith.mulf %452, %413 : vector<2x32xf32>
    %456 = arith.mulf %451, %453 : vector<2x32xf32>
    %457 = arith.addf %455, %456 : vector<2x32xf32>
    %458 = math.tanh %457 : vector<2x32xf32>
    %459 = arith.mulf %454, %458 : vector<2x32xf32>
    %cst_137 = arith.constant 0.000000e+00 : f32
    %460 = vector.broadcast %cst_137 : f32 to vector<2x32xf32>
    %461 = arith.select %6, %459, %460 : vector<2x32xi1>, vector<2x32xf32>
    %c0_138 = arith.constant 0 : index
    %c0_139 = arith.constant 0 : index
    %c32_140 = arith.constant 32 : index
    %462 = vector.load %arg10[%c0_138, %c0_139, %c32_140] : memref<8x2x64xf32, #tpu.memory_space<vmem>>, vector<1x2x32xf32>
    %463 = vector.shape_cast %462 : vector<1x2x32xf32> to vector<2x32xf32>
    %464 = vector.shape_cast %461 : vector<2x32xf32> to vector<1x2x32xf32>
    tpu.vector_store %arg10[%c0_138, %c0_139, %c32_140], %464 {strides = array<i32>} : memref<8x2x64xf32, #tpu.memory_space<vmem>>, vector<1x2x32xf32>,
    %465 = arith.select %6, %459, %412 : vector<2x32xi1>, vector<2x32xf32>
    %466 = tpu.concatenate %439, %465 in 1 : vector<2x32xf32>, vector<2x32xf32> -> vector<2x64xf32>
    %c0_141 = arith.constant 0 : index
    %c0_142 = arith.constant 0 : index
    %467 = vector.load %arg11[%c0_141, %c0_142] : memref<2x64xf32, #tpu.memory_space<vmem>>, vector<2x64xf32>
    tpu.vector_store %arg11[%c0_141, %c0_142], %466 {strides = array<i32>} : memref<2x64xf32, #tpu.memory_space<vmem>>, vector<2x64xf32>,
    %c0_143 = arith.constant 0 : index
    %c0_144 = arith.constant 0 : index
    %468 = vector.load %arg5[%c0_143, %c0_144] : memref<12x1xi32, #tpu.memory_space<vmem>>, vector<12x1xi32>
    %c0_145 = arith.constant 0 : index
    %c0_146 = arith.constant 0 : index
    %469 = vector.load %arg8[%c0_145, %c0_146] : memref<32x128xbf16, #tpu.memory_space<vmem>>, vector<32x128xbf16>
    %c0_147 = arith.constant 0 : index
    %c0_148 = arith.constant 0 : index
    %470 = vector.load %arg9[%c0_147, %c0_148] : memref<32x128xbf16, #tpu.memory_space<vmem>>, vector<32x128xbf16>
    %c0_i32_149 = arith.constant 0 : i32
    %471 = vector.broadcast %c0_i32_149 : i32 to vector<12x1xi32>
    %472 = arith.cmpi slt, %471, %468 : vector<12x1xi32>
    %473 = vector.shape_cast %472 : vector<12x1xi1> to vector<12x1xi1>
    %474 = vector.broadcast %473 : vector<12x1xi1> to vector<12x32xi1>
    %c1_i32_150 = arith.constant 1 : i32
    %475 = vector.broadcast %c1_i32_150 : i32 to vector<12x1xi32>
    %476 = arith.cmpi slt, %475, %468 : vector<12x1xi32>
    %477 = vector.shape_cast %476 : vector<12x1xi1> to vector<12x1xi1>
    %478 = vector.broadcast %477 : vector<12x1xi1> to vector<12x32xi1>
    %c2_i32_151 = arith.constant 2 : i32
    %479 = vector.broadcast %c2_i32_151 : i32 to vector<12x1xi32>
    %480 = arith.cmpi slt, %479, %468 : vector<12x1xi32>
    %481 = vector.shape_cast %480 : vector<12x1xi1> to vector<12x1xi1>
    %482 = vector.broadcast %481 : vector<12x1xi1> to vector<12x32xi1>
    %c3_i32_152 = arith.constant 3 : i32
    %483 = vector.broadcast %c3_i32_152 : i32 to vector<12x1xi32>
    %484 = arith.cmpi slt, %483, %468 : vector<12x1xi32>
    %485 = vector.shape_cast %484 : vector<12x1xi1> to vector<12x1xi1>
    %486 = vector.broadcast %485 : vector<12x1xi1> to vector<12x32xi1>
    %cst_153 = arith.constant 0.000000e+00 : f32
    %487 = vector.broadcast %cst_153 : f32 to vector<12x32xf32>
    %c0_154 = arith.constant 0 : index
    %c0_155 = arith.constant 0 : index
    %c0_156 = arith.constant 0 : index
    %488 = vector.load %arg6[%c0_154, %c0_155, %c0_156] : memref<4x12x128xf32, #tpu.memory_space<vmem>>, vector<1x12x128xf32>
    %489 = vector.shape_cast %488 : vector<1x12x128xf32> to vector<12x128xf32>
    %490 = arith.truncf %487 : vector<12x32xf32> to vector<12x32xbf16>
    %cst_157 = arith.constant dense<0.000000e+00> : vector<12x128xf32>
    %491 = tpu.matmul %490, %469, %cst_157 {dimension_numbers = #tpu.dot_dimension_numbers<[1], [0], [0], [1], [0, 0, 1, 1], [], []>} : vector<12x32xbf16>, vector<32x128xbf16>, vector<12x128xf32> -> vector<12x128xf32>
    %492 = arith.addf %489, %491 : vector<12x128xf32>
    %493 = arith.negf %492 : vector<12x128xf32>
    %494 = math.exp %493 : vector<12x128xf32>
    %cst_158 = arith.constant 1.000000e+00 : f32
    %495 = vector.broadcast %cst_158 : f32 to vector<12x128xf32>
    %496 = arith.addf %495, %494 : vector<12x128xf32>
    %497 = arith.divf %495, %496 : vector<12x128xf32>
    %498 = math.tanh %492 : vector<12x128xf32>
    %499 = vector.extract_strided_slice %497 {offsets = [0, 0], sizes = [12, 32], strides = [1, 1]} : vector<12x128xf32> to vector<12x32xf32>
    %500 = vector.extract_strided_slice %497 {offsets = [0, 32], sizes = [12, 32], strides = [1, 1]} : vector<12x128xf32> to vector<12x32xf32>
    %501 = vector.extract_strided_slice %498 {offsets = [0, 64], sizes = [12, 32], strides = [1, 1]} : vector<12x128xf32> to vector<12x32xf32>
    %502 = vector.extract_strided_slice %497 {offsets = [0, 96], sizes = [12, 32], strides = [1, 1]} : vector<12x128xf32> to vector<12x32xf32>
    %503 = arith.mulf %500, %487 : vector<12x32xf32>
    %504 = arith.mulf %499, %501 : vector<12x32xf32>
    %505 = arith.addf %503, %504 : vector<12x32xf32>
    %506 = math.tanh %505 : vector<12x32xf32>
    %507 = arith.mulf %502, %506 : vector<12x32xf32>
    %cst_159 = arith.constant 0.000000e+00 : f32
    %508 = vector.broadcast %cst_159 : f32 to vector<12x32xf32>
    %509 = arith.select %474, %507, %508 : vector<12x32xi1>, vector<12x32xf32>
    %c0_160 = arith.constant 0 : index
    %c0_161 = arith.constant 0 : index
    %c0_162 = arith.constant 0 : index
    %510 = vector.load %arg12[%c0_160, %c0_161, %c0_162] : memref<4x12x64xf32, #tpu.memory_space<vmem>>, vector<1x12x32xf32>
    %511 = vector.shape_cast %510 : vector<1x12x32xf32> to vector<12x32xf32>
    %512 = vector.shape_cast %509 : vector<12x32xf32> to vector<1x12x32xf32>
    tpu.vector_store %arg12[%c0_160, %c0_161, %c0_162], %512 {strides = array<i32>} : memref<4x12x64xf32, #tpu.memory_space<vmem>>, vector<1x12x32xf32>,
    %513 = arith.select %474, %507, %487 : vector<12x32xi1>, vector<12x32xf32>
    %514 = arith.select %474, %505, %487 : vector<12x32xi1>, vector<12x32xf32>
    %c3_163 = arith.constant 3 : index
    %c0_164 = arith.constant 0 : index
    %c0_165 = arith.constant 0 : index
    %515 = vector.load %arg7[%c3_163, %c0_164, %c0_165] : memref<4x12x128xf32, #tpu.memory_space<vmem>>, vector<1x12x128xf32>
    %516 = vector.shape_cast %515 : vector<1x12x128xf32> to vector<12x128xf32>
    %517 = arith.truncf %487 : vector<12x32xf32> to vector<12x32xbf16>
    %cst_166 = arith.constant dense<0.000000e+00> : vector<12x128xf32>
    %518 = tpu.matmul %517, %470, %cst_166 {dimension_numbers = #tpu.dot_dimension_numbers<[1], [0], [0], [1], [0, 0, 1, 1], [], []>} : vector<12x32xbf16>, vector<32x128xbf16>, vector<12x128xf32> -> vector<12x128xf32>
    %519 = arith.addf %516, %518 : vector<12x128xf32>
    %520 = arith.negf %519 : vector<12x128xf32>
    %521 = math.exp %520 : vector<12x128xf32>
    %cst_167 = arith.constant 1.000000e+00 : f32
    %522 = vector.broadcast %cst_167 : f32 to vector<12x128xf32>
    %523 = arith.addf %522, %521 : vector<12x128xf32>
    %524 = arith.divf %522, %523 : vector<12x128xf32>
    %525 = math.tanh %519 : vector<12x128xf32>
    %526 = vector.extract_strided_slice %524 {offsets = [0, 0], sizes = [12, 32], strides = [1, 1]} : vector<12x128xf32> to vector<12x32xf32>
    %527 = vector.extract_strided_slice %524 {offsets = [0, 32], sizes = [12, 32], strides = [1, 1]} : vector<12x128xf32> to vector<12x32xf32>
    %528 = vector.extract_strided_slice %525 {offsets = [0, 64], sizes = [12, 32], strides = [1, 1]} : vector<12x128xf32> to vector<12x32xf32>
    %529 = vector.extract_strided_slice %524 {offsets = [0, 96], sizes = [12, 32], strides = [1, 1]} : vector<12x128xf32> to vector<12x32xf32>
    %530 = arith.mulf %527, %487 : vector<12x32xf32>
    %531 = arith.mulf %526, %528 : vector<12x32xf32>
    %532 = arith.addf %530, %531 : vector<12x32xf32>
    %533 = math.tanh %532 : vector<12x32xf32>
    %534 = arith.mulf %529, %533 : vector<12x32xf32>
    %cst_168 = arith.constant 0.000000e+00 : f32
    %535 = vector.broadcast %cst_168 : f32 to vector<12x32xf32>
    %536 = arith.select %486, %534, %535 : vector<12x32xi1>, vector<12x32xf32>
    %c3_169 = arith.constant 3 : index
    %c0_170 = arith.constant 0 : index
    %c32_171 = arith.constant 32 : index
    %537 = vector.load %arg12[%c3_169, %c0_170, %c32_171] : memref<4x12x64xf32, #tpu.memory_space<vmem>>, vector<1x12x32xf32>
    %538 = vector.shape_cast %537 : vector<1x12x32xf32> to vector<12x32xf32>
    %539 = vector.shape_cast %536 : vector<12x32xf32> to vector<1x12x32xf32>
    tpu.vector_store %arg12[%c3_169, %c0_170, %c32_171], %539 {strides = array<i32>} : memref<4x12x64xf32, #tpu.memory_space<vmem>>, vector<1x12x32xf32>,
    %540 = arith.select %486, %534, %487 : vector<12x32xi1>, vector<12x32xf32>
    %541 = arith.select %486, %532, %487 : vector<12x32xi1>, vector<12x32xf32>
    %c1_172 = arith.constant 1 : index
    %c0_173 = arith.constant 0 : index
    %c0_174 = arith.constant 0 : index
    %542 = vector.load %arg6[%c1_172, %c0_173, %c0_174] : memref<4x12x128xf32, #tpu.memory_space<vmem>>, vector<1x12x128xf32>
    %543 = vector.shape_cast %542 : vector<1x12x128xf32> to vector<12x128xf32>
    %544 = arith.truncf %513 : vector<12x32xf32> to vector<12x32xbf16>
    %cst_175 = arith.constant dense<0.000000e+00> : vector<12x128xf32>
    %545 = tpu.matmul %544, %469, %cst_175 {dimension_numbers = #tpu.dot_dimension_numbers<[1], [0], [0], [1], [0, 0, 1, 1], [], []>} : vector<12x32xbf16>, vector<32x128xbf16>, vector<12x128xf32> -> vector<12x128xf32>
    %546 = arith.addf %543, %545 : vector<12x128xf32>
    %547 = arith.negf %546 : vector<12x128xf32>
    %548 = math.exp %547 : vector<12x128xf32>
    %cst_176 = arith.constant 1.000000e+00 : f32
    %549 = vector.broadcast %cst_176 : f32 to vector<12x128xf32>
    %550 = arith.addf %549, %548 : vector<12x128xf32>
    %551 = arith.divf %549, %550 : vector<12x128xf32>
    %552 = math.tanh %546 : vector<12x128xf32>
    %553 = vector.extract_strided_slice %551 {offsets = [0, 0], sizes = [12, 32], strides = [1, 1]} : vector<12x128xf32> to vector<12x32xf32>
    %554 = vector.extract_strided_slice %551 {offsets = [0, 32], sizes = [12, 32], strides = [1, 1]} : vector<12x128xf32> to vector<12x32xf32>
    %555 = vector.extract_strided_slice %552 {offsets = [0, 64], sizes = [12, 32], strides = [1, 1]} : vector<12x128xf32> to vector<12x32xf32>
    %556 = vector.extract_strided_slice %551 {offsets = [0, 96], sizes = [12, 32], strides = [1, 1]} : vector<12x128xf32> to vector<12x32xf32>
    %557 = arith.mulf %554, %514 : vector<12x32xf32>
    %558 = arith.mulf %553, %555 : vector<12x32xf32>
    %559 = arith.addf %557, %558 : vector<12x32xf32>
    %560 = math.tanh %559 : vector<12x32xf32>
    %561 = arith.mulf %556, %560 : vector<12x32xf32>
    %cst_177 = arith.constant 0.000000e+00 : f32
    %562 = vector.broadcast %cst_177 : f32 to vector<12x32xf32>
    %563 = arith.select %478, %561, %562 : vector<12x32xi1>, vector<12x32xf32>
    %c1_178 = arith.constant 1 : index
    %c0_179 = arith.constant 0 : index
    %c0_180 = arith.constant 0 : index
    %564 = vector.load %arg12[%c1_178, %c0_179, %c0_180] : memref<4x12x64xf32, #tpu.memory_space<vmem>>, vector<1x12x32xf32>
    %565 = vector.shape_cast %564 : vector<1x12x32xf32> to vector<12x32xf32>
    %566 = vector.shape_cast %563 : vector<12x32xf32> to vector<1x12x32xf32>
    tpu.vector_store %arg12[%c1_178, %c0_179, %c0_180], %566 {strides = array<i32>} : memref<4x12x64xf32, #tpu.memory_space<vmem>>, vector<1x12x32xf32>,
    %567 = arith.select %478, %561, %513 : vector<12x32xi1>, vector<12x32xf32>
    %568 = arith.select %478, %559, %514 : vector<12x32xi1>, vector<12x32xf32>
    %c2_181 = arith.constant 2 : index
    %c0_182 = arith.constant 0 : index
    %c0_183 = arith.constant 0 : index
    %569 = vector.load %arg7[%c2_181, %c0_182, %c0_183] : memref<4x12x128xf32, #tpu.memory_space<vmem>>, vector<1x12x128xf32>
    %570 = vector.shape_cast %569 : vector<1x12x128xf32> to vector<12x128xf32>
    %571 = arith.truncf %540 : vector<12x32xf32> to vector<12x32xbf16>
    %cst_184 = arith.constant dense<0.000000e+00> : vector<12x128xf32>
    %572 = tpu.matmul %571, %470, %cst_184 {dimension_numbers = #tpu.dot_dimension_numbers<[1], [0], [0], [1], [0, 0, 1, 1], [], []>} : vector<12x32xbf16>, vector<32x128xbf16>, vector<12x128xf32> -> vector<12x128xf32>
    %573 = arith.addf %570, %572 : vector<12x128xf32>
    %574 = arith.negf %573 : vector<12x128xf32>
    %575 = math.exp %574 : vector<12x128xf32>
    %cst_185 = arith.constant 1.000000e+00 : f32
    %576 = vector.broadcast %cst_185 : f32 to vector<12x128xf32>
    %577 = arith.addf %576, %575 : vector<12x128xf32>
    %578 = arith.divf %576, %577 : vector<12x128xf32>
    %579 = math.tanh %573 : vector<12x128xf32>
    %580 = vector.extract_strided_slice %578 {offsets = [0, 0], sizes = [12, 32], strides = [1, 1]} : vector<12x128xf32> to vector<12x32xf32>
    %581 = vector.extract_strided_slice %578 {offsets = [0, 32], sizes = [12, 32], strides = [1, 1]} : vector<12x128xf32> to vector<12x32xf32>
    %582 = vector.extract_strided_slice %579 {offsets = [0, 64], sizes = [12, 32], strides = [1, 1]} : vector<12x128xf32> to vector<12x32xf32>
    %583 = vector.extract_strided_slice %578 {offsets = [0, 96], sizes = [12, 32], strides = [1, 1]} : vector<12x128xf32> to vector<12x32xf32>
    %584 = arith.mulf %581, %541 : vector<12x32xf32>
    %585 = arith.mulf %580, %582 : vector<12x32xf32>
    %586 = arith.addf %584, %585 : vector<12x32xf32>
    %587 = math.tanh %586 : vector<12x32xf32>
    %588 = arith.mulf %583, %587 : vector<12x32xf32>
    %cst_186 = arith.constant 0.000000e+00 : f32
    %589 = vector.broadcast %cst_186 : f32 to vector<12x32xf32>
    %590 = arith.select %482, %588, %589 : vector<12x32xi1>, vector<12x32xf32>
    %c2_187 = arith.constant 2 : index
    %c0_188 = arith.constant 0 : index
    %c32_189 = arith.constant 32 : index
    %591 = vector.load %arg12[%c2_187, %c0_188, %c32_189] : memref<4x12x64xf32, #tpu.memory_space<vmem>>, vector<1x12x32xf32>
    %592 = vector.shape_cast %591 : vector<1x12x32xf32> to vector<12x32xf32>
    %593 = vector.shape_cast %590 : vector<12x32xf32> to vector<1x12x32xf32>
    tpu.vector_store %arg12[%c2_187, %c0_188, %c32_189], %593 {strides = array<i32>} : memref<4x12x64xf32, #tpu.memory_space<vmem>>, vector<1x12x32xf32>,
    %594 = arith.select %482, %588, %540 : vector<12x32xi1>, vector<12x32xf32>
    %595 = arith.select %482, %586, %541 : vector<12x32xi1>, vector<12x32xf32>
    %c2_190 = arith.constant 2 : index
    %c0_191 = arith.constant 0 : index
    %c0_192 = arith.constant 0 : index
    %596 = vector.load %arg6[%c2_190, %c0_191, %c0_192] : memref<4x12x128xf32, #tpu.memory_space<vmem>>, vector<1x12x128xf32>
    %597 = vector.shape_cast %596 : vector<1x12x128xf32> to vector<12x128xf32>
    %598 = arith.truncf %567 : vector<12x32xf32> to vector<12x32xbf16>
    %cst_193 = arith.constant dense<0.000000e+00> : vector<12x128xf32>
    %599 = tpu.matmul %598, %469, %cst_193 {dimension_numbers = #tpu.dot_dimension_numbers<[1], [0], [0], [1], [0, 0, 1, 1], [], []>} : vector<12x32xbf16>, vector<32x128xbf16>, vector<12x128xf32> -> vector<12x128xf32>
    %600 = arith.addf %597, %599 : vector<12x128xf32>
    %601 = arith.negf %600 : vector<12x128xf32>
    %602 = math.exp %601 : vector<12x128xf32>
    %cst_194 = arith.constant 1.000000e+00 : f32
    %603 = vector.broadcast %cst_194 : f32 to vector<12x128xf32>
    %604 = arith.addf %603, %602 : vector<12x128xf32>
    %605 = arith.divf %603, %604 : vector<12x128xf32>
    %606 = math.tanh %600 : vector<12x128xf32>
    %607 = vector.extract_strided_slice %605 {offsets = [0, 0], sizes = [12, 32], strides = [1, 1]} : vector<12x128xf32> to vector<12x32xf32>
    %608 = vector.extract_strided_slice %605 {offsets = [0, 32], sizes = [12, 32], strides = [1, 1]} : vector<12x128xf32> to vector<12x32xf32>
    %609 = vector.extract_strided_slice %606 {offsets = [0, 64], sizes = [12, 32], strides = [1, 1]} : vector<12x128xf32> to vector<12x32xf32>
    %610 = vector.extract_strided_slice %605 {offsets = [0, 96], sizes = [12, 32], strides = [1, 1]} : vector<12x128xf32> to vector<12x32xf32>
    %611 = arith.mulf %608, %568 : vector<12x32xf32>
    %612 = arith.mulf %607, %609 : vector<12x32xf32>
    %613 = arith.addf %611, %612 : vector<12x32xf32>
    %614 = math.tanh %613 : vector<12x32xf32>
    %615 = arith.mulf %610, %614 : vector<12x32xf32>
    %cst_195 = arith.constant 0.000000e+00 : f32
    %616 = vector.broadcast %cst_195 : f32 to vector<12x32xf32>
    %617 = arith.select %482, %615, %616 : vector<12x32xi1>, vector<12x32xf32>
    %c2_196 = arith.constant 2 : index
    %c0_197 = arith.constant 0 : index
    %c0_198 = arith.constant 0 : index
    %618 = vector.load %arg12[%c2_196, %c0_197, %c0_198] : memref<4x12x64xf32, #tpu.memory_space<vmem>>, vector<1x12x32xf32>
    %619 = vector.shape_cast %618 : vector<1x12x32xf32> to vector<12x32xf32>
    %620 = vector.shape_cast %617 : vector<12x32xf32> to vector<1x12x32xf32>
    tpu.vector_store %arg12[%c2_196, %c0_197, %c0_198], %620 {strides = array<i32>} : memref<4x12x64xf32, #tpu.memory_space<vmem>>, vector<1x12x32xf32>,
    %621 = arith.select %482, %615, %567 : vector<12x32xi1>, vector<12x32xf32>
    %622 = arith.select %482, %613, %568 : vector<12x32xi1>, vector<12x32xf32>
    %c1_199 = arith.constant 1 : index
    %c0_200 = arith.constant 0 : index
    %c0_201 = arith.constant 0 : index
    %623 = vector.load %arg7[%c1_199, %c0_200, %c0_201] : memref<4x12x128xf32, #tpu.memory_space<vmem>>, vector<1x12x128xf32>
    %624 = vector.shape_cast %623 : vector<1x12x128xf32> to vector<12x128xf32>
    %625 = arith.truncf %594 : vector<12x32xf32> to vector<12x32xbf16>
    %cst_202 = arith.constant dense<0.000000e+00> : vector<12x128xf32>
    %626 = tpu.matmul %625, %470, %cst_202 {dimension_numbers = #tpu.dot_dimension_numbers<[1], [0], [0], [1], [0, 0, 1, 1], [], []>} : vector<12x32xbf16>, vector<32x128xbf16>, vector<12x128xf32> -> vector<12x128xf32>
    %627 = arith.addf %624, %626 : vector<12x128xf32>
    %628 = arith.negf %627 : vector<12x128xf32>
    %629 = math.exp %628 : vector<12x128xf32>
    %cst_203 = arith.constant 1.000000e+00 : f32
    %630 = vector.broadcast %cst_203 : f32 to vector<12x128xf32>
    %631 = arith.addf %630, %629 : vector<12x128xf32>
    %632 = arith.divf %630, %631 : vector<12x128xf32>
    %633 = math.tanh %627 : vector<12x128xf32>
    %634 = vector.extract_strided_slice %632 {offsets = [0, 0], sizes = [12, 32], strides = [1, 1]} : vector<12x128xf32> to vector<12x32xf32>
    %635 = vector.extract_strided_slice %632 {offsets = [0, 32], sizes = [12, 32], strides = [1, 1]} : vector<12x128xf32> to vector<12x32xf32>
    %636 = vector.extract_strided_slice %633 {offsets = [0, 64], sizes = [12, 32], strides = [1, 1]} : vector<12x128xf32> to vector<12x32xf32>
    %637 = vector.extract_strided_slice %632 {offsets = [0, 96], sizes = [12, 32], strides = [1, 1]} : vector<12x128xf32> to vector<12x32xf32>
    %638 = arith.mulf %635, %595 : vector<12x32xf32>
    %639 = arith.mulf %634, %636 : vector<12x32xf32>
    %640 = arith.addf %638, %639 : vector<12x32xf32>
    %641 = math.tanh %640 : vector<12x32xf32>
    %642 = arith.mulf %637, %641 : vector<12x32xf32>
    %cst_204 = arith.constant 0.000000e+00 : f32
    %643 = vector.broadcast %cst_204 : f32 to vector<12x32xf32>
    %644 = arith.select %478, %642, %643 : vector<12x32xi1>, vector<12x32xf32>
    %c1_205 = arith.constant 1 : index
    %c0_206 = arith.constant 0 : index
    %c32_207 = arith.constant 32 : index
    %645 = vector.load %arg12[%c1_205, %c0_206, %c32_207] : memref<4x12x64xf32, #tpu.memory_space<vmem>>, vector<1x12x32xf32>
    %646 = vector.shape_cast %645 : vector<1x12x32xf32> to vector<12x32xf32>
    %647 = vector.shape_cast %644 : vector<12x32xf32> to vector<1x12x32xf32>
    tpu.vector_store %arg12[%c1_205, %c0_206, %c32_207], %647 {strides = array<i32>} : memref<4x12x64xf32, #tpu.memory_space<vmem>>, vector<1x12x32xf32>,
    %648 = arith.select %478, %642, %594 : vector<12x32xi1>, vector<12x32xf32>
    %649 = arith.select %478, %640, %595 : vector<12x32xi1>, vector<12x32xf32>
    %c3_208 = arith.constant 3 : index
    %c0_209 = arith.constant 0 : index
    %c0_210 = arith.constant 0 : index
    %650 = vector.load %arg6[%c3_208, %c0_209, %c0_210] : memref<4x12x128xf32, #tpu.memory_space<vmem>>, vector<1x12x128xf32>
    %651 = vector.shape_cast %650 : vector<1x12x128xf32> to vector<12x128xf32>
    %652 = arith.truncf %621 : vector<12x32xf32> to vector<12x32xbf16>
    %cst_211 = arith.constant dense<0.000000e+00> : vector<12x128xf32>
    %653 = tpu.matmul %652, %469, %cst_211 {dimension_numbers = #tpu.dot_dimension_numbers<[1], [0], [0], [1], [0, 0, 1, 1], [], []>} : vector<12x32xbf16>, vector<32x128xbf16>, vector<12x128xf32> -> vector<12x128xf32>
    %654 = arith.addf %651, %653 : vector<12x128xf32>
    %655 = arith.negf %654 : vector<12x128xf32>
    %656 = math.exp %655 : vector<12x128xf32>
    %cst_212 = arith.constant 1.000000e+00 : f32
    %657 = vector.broadcast %cst_212 : f32 to vector<12x128xf32>
    %658 = arith.addf %657, %656 : vector<12x128xf32>
    %659 = arith.divf %657, %658 : vector<12x128xf32>
    %660 = math.tanh %654 : vector<12x128xf32>
    %661 = vector.extract_strided_slice %659 {offsets = [0, 0], sizes = [12, 32], strides = [1, 1]} : vector<12x128xf32> to vector<12x32xf32>
    %662 = vector.extract_strided_slice %659 {offsets = [0, 32], sizes = [12, 32], strides = [1, 1]} : vector<12x128xf32> to vector<12x32xf32>
    %663 = vector.extract_strided_slice %660 {offsets = [0, 64], sizes = [12, 32], strides = [1, 1]} : vector<12x128xf32> to vector<12x32xf32>
    %664 = vector.extract_strided_slice %659 {offsets = [0, 96], sizes = [12, 32], strides = [1, 1]} : vector<12x128xf32> to vector<12x32xf32>
    %665 = arith.mulf %662, %622 : vector<12x32xf32>
    %666 = arith.mulf %661, %663 : vector<12x32xf32>
    %667 = arith.addf %665, %666 : vector<12x32xf32>
    %668 = math.tanh %667 : vector<12x32xf32>
    %669 = arith.mulf %664, %668 : vector<12x32xf32>
    %cst_213 = arith.constant 0.000000e+00 : f32
    %670 = vector.broadcast %cst_213 : f32 to vector<12x32xf32>
    %671 = arith.select %486, %669, %670 : vector<12x32xi1>, vector<12x32xf32>
    %c3_214 = arith.constant 3 : index
    %c0_215 = arith.constant 0 : index
    %c0_216 = arith.constant 0 : index
    %672 = vector.load %arg12[%c3_214, %c0_215, %c0_216] : memref<4x12x64xf32, #tpu.memory_space<vmem>>, vector<1x12x32xf32>
    %673 = vector.shape_cast %672 : vector<1x12x32xf32> to vector<12x32xf32>
    %674 = vector.shape_cast %671 : vector<12x32xf32> to vector<1x12x32xf32>
    tpu.vector_store %arg12[%c3_214, %c0_215, %c0_216], %674 {strides = array<i32>} : memref<4x12x64xf32, #tpu.memory_space<vmem>>, vector<1x12x32xf32>,
    %675 = arith.select %486, %669, %621 : vector<12x32xi1>, vector<12x32xf32>
    %c0_217 = arith.constant 0 : index
    %c0_218 = arith.constant 0 : index
    %c0_219 = arith.constant 0 : index
    %676 = vector.load %arg7[%c0_217, %c0_218, %c0_219] : memref<4x12x128xf32, #tpu.memory_space<vmem>>, vector<1x12x128xf32>
    %677 = vector.shape_cast %676 : vector<1x12x128xf32> to vector<12x128xf32>
    %678 = arith.truncf %648 : vector<12x32xf32> to vector<12x32xbf16>
    %cst_220 = arith.constant dense<0.000000e+00> : vector<12x128xf32>
    %679 = tpu.matmul %678, %470, %cst_220 {dimension_numbers = #tpu.dot_dimension_numbers<[1], [0], [0], [1], [0, 0, 1, 1], [], []>} : vector<12x32xbf16>, vector<32x128xbf16>, vector<12x128xf32> -> vector<12x128xf32>
    %680 = arith.addf %677, %679 : vector<12x128xf32>
    %681 = arith.negf %680 : vector<12x128xf32>
    %682 = math.exp %681 : vector<12x128xf32>
    %cst_221 = arith.constant 1.000000e+00 : f32
    %683 = vector.broadcast %cst_221 : f32 to vector<12x128xf32>
    %684 = arith.addf %683, %682 : vector<12x128xf32>
    %685 = arith.divf %683, %684 : vector<12x128xf32>
    %686 = math.tanh %680 : vector<12x128xf32>
    %687 = vector.extract_strided_slice %685 {offsets = [0, 0], sizes = [12, 32], strides = [1, 1]} : vector<12x128xf32> to vector<12x32xf32>
    %688 = vector.extract_strided_slice %685 {offsets = [0, 32], sizes = [12, 32], strides = [1, 1]} : vector<12x128xf32> to vector<12x32xf32>
    %689 = vector.extract_strided_slice %686 {offsets = [0, 64], sizes = [12, 32], strides = [1, 1]} : vector<12x128xf32> to vector<12x32xf32>
    %690 = vector.extract_strided_slice %685 {offsets = [0, 96], sizes = [12, 32], strides = [1, 1]} : vector<12x128xf32> to vector<12x32xf32>
    %691 = arith.mulf %688, %649 : vector<12x32xf32>
    %692 = arith.mulf %687, %689 : vector<12x32xf32>
    %693 = arith.addf %691, %692 : vector<12x32xf32>
    %694 = math.tanh %693 : vector<12x32xf32>
    %695 = arith.mulf %690, %694 : vector<12x32xf32>
    %cst_222 = arith.constant 0.000000e+00 : f32
    %696 = vector.broadcast %cst_222 : f32 to vector<12x32xf32>
    %697 = arith.select %474, %695, %696 : vector<12x32xi1>, vector<12x32xf32>
    %c0_223 = arith.constant 0 : index
    %c0_224 = arith.constant 0 : index
    %c32_225 = arith.constant 32 : index
    %698 = vector.load %arg12[%c0_223, %c0_224, %c32_225] : memref<4x12x64xf32, #tpu.memory_space<vmem>>, vector<1x12x32xf32>
    %699 = vector.shape_cast %698 : vector<1x12x32xf32> to vector<12x32xf32>
    %700 = vector.shape_cast %697 : vector<12x32xf32> to vector<1x12x32xf32>
    tpu.vector_store %arg12[%c0_223, %c0_224, %c32_225], %700 {strides = array<i32>} : memref<4x12x64xf32, #tpu.memory_space<vmem>>, vector<1x12x32xf32>,
    %701 = arith.select %474, %695, %648 : vector<12x32xi1>, vector<12x32xf32>
    %702 = tpu.concatenate %675, %701 in 1 : vector<12x32xf32>, vector<12x32xf32> -> vector<12x64xf32>
    %c0_226 = arith.constant 0 : index
    %c0_227 = arith.constant 0 : index
    %703 = vector.load %arg13[%c0_226, %c0_227] : memref<12x64xf32, #tpu.memory_space<vmem>>, vector<12x64xf32>
    tpu.vector_store %arg13[%c0_226, %c0_227], %702 {strides = array<i32>} : memref<12x64xf32, #tpu.memory_space<vmem>>, vector<12x64xf32>,
    return
  }
}

</mosaic_0001>

<bundles_post_ra>
// kernel: tpu_custom_call.1
= control target key start
LH: loop header
LB: loop body
LE: loop exit
PB: predicated region body
PF: predicated region fallthrough
CT: control target
= control target key end

     0   :  { %19 = vsyncpa [#allocation3], 0  ;;  %v4065_v2 = vmov 0   ;;  %s4050_s0 = inlined_call_operand.vmem [shape: s32[2,1], index: 0, kind: input, shape index: {}]   ;;  %s4051_s1 = inlined_call_operand.vmem [shape: f32[8,2,128], index: 1, kind: input, shape index: {}]   ;;  %s4052_s2 = inlined_call_operand.vmem [shape: f32[8,2,128], index: 2, kind: input, shape index: {}]   ;;  %s4053_s3 = inlined_call_operand.vmem [shape: bf16[32,128], index: 3, kind: input, shape index: {}]   ;;  %s4054_s4 = inlined_call_operand.vmem [shape: bf16[32,128], index: 4, kind: input, shape index: {}]   ;;  %s4055_s5 = inlined_call_operand.vmem [shape: s32[12,1], index: 5, kind: input, shape index: {}]   ;;  %s4056_s6 = inlined_call_operand.vmem [shape: f32[4,12,128], index: 6, kind: input, shape index: {}]   ;;  %s4057_s7 = inlined_call_operand.vmem [shape: f32[4,12,128], index: 7, kind: input, shape index: {}]   ;;  %s4058_s8 = inlined_call_operand.vmem [shape: bf16[32,128], index: 8, kind: input, shape index: {}]   ;;  %s4059_s9 = inlined_call_operand.vmem [shape: bf16[32,128], index: 9, kind: input, shape index: {}]   ;;  %s4060_s10 = inlined_call_operand.hbm [shape: f32[8,2,64], index: 10, kind: output, shape index: {0}]   ;;  %s4061_s11 = inlined_call_operand.hbm [shape: f32[2,64], index: 11, kind: output, shape index: {1}]   ;;  %s4062_s12 = inlined_call_operand.vmem [shape: f32[4,12,64], index: 12, kind: output, shape index: {2}]   ;;  %s4063_s13 = inlined_call_operand.hbm [shape: f32[12,64], index: 13, kind: output, shape index: {3}]  }
   0x1   :  { %v2840_v0 = vld [vmem:[%s4053_s3 + $0x8] sm:$0xff]  ;;  %2423 = vset.pattern.permute.xlu0 %v4065_v2  ;;  %2424 = vset.pattern.permute.xlu1 %v4065_v2 }
   0x2   :  { %v2845_v1 = vld [vmem:[%s4054_s4 + $0x8] sm:$0xff] }
   0x3   :  { %20 = vsyncpa [#allocation5], 0  ;;  %122 = vmatpush.bf16.msra.mxu0 %v2840_v0  ;;  %195 = vmatpush.bf16.msra.mxu1 %v2845_v1  ;;  %v2854_v3 = vld [vmem:[%s4053_s3] sm:$0xff]  ;;  %v2293_v9 = vld [vmem:[%s4052_s2 + $0xe] sm:$0x3]  ;;  %s2759_s18 = smov 64  }
   0x4   :  { %v2859_v4 = vld [vmem:[%s4054_s4] sm:$0xff]  ;;  %264 = vmatpush.bf16.msra.mxu2 %v2840_v0  ;;  %333 = vmatpush.bf16.msra.mxu3 %v2845_v1  ;;  %vm112_vm12 = vcmask 261120   ;;  %s2761_s3 = smov [#allocation4]   ;;  %s2249_s19 = sshll.u32 %s4061_s11, 4  ;;  %s2250_s19 = int_to_ptr.hbm [resolvable:$true] %s2249_s19 }
   0x5   :  { %2425 = vset.pattern.permute.xlu2 %v4065_v2  ;;  %v99_v5 = vld [vmem:[%s4051_s1] sm:$0x3]  ;;  %s2247_s4 = sshll.u32 %s2761_s3, 4  ;;  %s2235_s22 = sshll.u32 %s4060_s10, 4  ;;  %s2248_s4 = int_to_ptr.vmem [resolvable:$true] %s2247_s4  ;;  %s2236_s22 = int_to_ptr.hbm [resolvable:$true] %s2235_s22 }
   0x6   :  { %v2893_v19 = vld [vmem:[%s4050_s0] sm:$0x3]  ;;  %s2760_s0 = smov 32   ;;  %s2762_s24 = smov [#allocation2]  }
   0x7   :  { %123 = vmatpush.bf16.msra.mxu0 %v2854_v3  ;;  %196 = vmatpush.bf16.msra.mxu1 %v2859_v4  ;;  %vm51_vm0 = vcmp.gt.s32.totalorder %v2893_v19, 0  ;;  %vm93_vm9 = vcmp.gt.s32.totalorder %v2893_v19, 7  ;;  %s2763_s11 = smov 2   ;;  %s2764_s16 = smov [#allocation6]  }
   0x8   :  { %265 = vmatpush.bf16.msra.mxu2 %v2854_v3  ;;  %334 = vmatpush.bf16.msra.mxu3 %v2859_v4  ;;  %v52_v20 = vsel %vm51_vm0, 1, %v4065_v2  ;;  %v94_v47 = vsel %vm93_vm9, 1, %v4065_v2  ;;  %s2259_s17 = sshll.u32 %s2764_s16, 4  ;;  %s2261_s21 = sshll.u32 %s4063_s13, 4  ;;  %s2260_s17 = int_to_ptr.vmem [resolvable:$true] %s2259_s17  ;;  %s2262_s21 = int_to_ptr.hbm [resolvable:$true] %s2261_s21 }
   0xa   :  { %124 = vmatmul.bf16.vlgmr.msra.gmra.mxu0 %v4065_v2  ;;  %197 = vmatmul.bf16.vlgmr.msra.gmra.mxu1 %v4065_v2 }
   0xb   :  { %402 = vmatpush.bf16.msrb.mxu0 %v2840_v0  ;;  %471 = vmatpush.bf16.msrb.mxu1 %v2845_v1 }
   0xc   :  { %540 = vmatpush.bf16.msrb.mxu2 %v2840_v0  ;;  %609 = vmatpush.bf16.msrb.mxu3 %v2845_v1 }
   0xf   :  { %403 = vmatpush.bf16.msrb.mxu0 %v2854_v3  ;;  %472 = vmatpush.bf16.msrb.mxu1 %v2859_v4 }
  0x10   :  { %541 = vmatpush.bf16.msrb.mxu2 %v2854_v3  ;;  %610 = vmatpush.bf16.msrb.mxu3 %v2859_v4 }
  0x13   :  { %678 = vmatpush.bf16.msra.mxu0 %v2840_v0  ;;  %746 = vmatpush.bf16.msra.mxu1 %v2845_v1 }
  0x17   :  { %679 = vmatpush.bf16.msra.mxu0 %v2854_v3  ;;  %747 = vmatpush.bf16.msra.mxu1 %v2859_v4 }
  0x87   :  { %v125_v6 = vpop.f32.mrf.mxu0  ;;  %v198_v7 = vpop.f32.mrf.mxu1 }
  0x88   :  { %v129_v8 = vadd.f32 %v125_v6, %v99_v5  ;;  %v202_v10 = vadd.f32 %v2293_v9, %v198_v7  ;;  %v2303_v9 = vld [vmem:[%s4051_s1 + $0x2] sm:$0x3] }
  0x8a   :  { %2426 = vtanh.f32 %v129_v8  ;;  %v2292_v15 = vmul.f32 -1.442695, %v129_v8  ;;  %v2302_v16 = vmul.f32 -1.442695, %v202_v10 }
  0x8b   :  { %2428 = vtanh.f32 %v202_v10 }
  0x8c   :  { %2430 = vpow2.f32 %v2292_v15 }
  0x8d   :  { %2432 = vpow2.f32 %v2302_v16 }
  0x8f   :  { %v127_v11 = vpop.f32.mrf.mxu0  ;;  %v200_v12 = vpop.f32.mrf.mxu1 }
  0x90   :  { %v2427_v13 = vpop.eup %2426 }
  0x91   :  { %152 = vrot.lane.b32.xlu0 %v2427_v13, %s2759_s18  ;;  %v2429_v14 = vpop.eup %2428 }
  0x92   :  { %v2431_v17 = vpop.eup %2430 }
  0x93   :  { %v133_v18 = vadd.f32 1.0, %v2431_v17  ;;  %v2433_v21 = vpop.eup %2432 }
  0x94   :  { %v206_v22 = vadd.f32 1.0, %v2433_v21 }
  0x95   :  { %2434 = vrcp.f32 %v133_v18  ;;  %v145_v31 = vand.u32 2147483648, %v133_v18  ;;  %vm139_vm2 = vweird.f32 %v133_v18  ;;  %v143_v32 = vand.u32 2147483647, %v133_v18 }
  0x96   :  { %2436 = vrcp.f32 %v206_v22  ;;  %vm212_vm5 = vweird.f32 %v206_v22  ;;  %v218_v40 = vand.u32 2147483648, %v206_v22  ;;  %v216_v41 = vand.u32 2147483647, %v206_v22 }
  0x97   :  { %v146_v35 = vor.u32 1.1754944e-38, %v145_v31  ;;  %vm144_vm4 = vcmp.eq.f32.partialorder %v143_v32, 8.507059e+37 }
  0x98   :  { %v219_v43 = vor.u32 1.1754944e-38, %v218_v40  ;;  %vm217_vm8 = vcmp.eq.f32.partialorder %v216_v41, 8.507059e+37 }
  0x99   :  { %225 = vrot.lane.b32.xlu0 %v2429_v14, %s2759_s18  ;;  %v2306_v14 = vld [vmem:[%s4052_s2 + $0xc] sm:$0x3] }
  0x9b   :  { %v2435_v23 = vpop.eup %2434 }
  0x9c   :  { %v135_v24 = vmul.f32 %v2435_v23, %v133_v18  ;;  %v2437_v26 = vpop.eup %2436  ;;  %vm140_vm1 = vweird.f32 %v2435_v23 }
  0x9d   :  { %v208_v28 = vmul.f32 %v2437_v26, %v206_v22  ;;  %vm141_vm3 = vmor %vm139_vm2, %vm140_vm1  ;;  %vm213_vm6 = vweird.f32 %v2437_v26 }
  0x9e   :  { %v136_v25 = vsub.f32 1.0, %v135_v24  ;;  %vm214_vm7 = vmor %vm212_vm5, %vm213_vm6  ;;  %vm57_vm5 = vcmp.gt.s32.totalorder %v2893_v19, 1  ;;  %vm87_vm6 = vcmp.gt.s32.totalorder %v2893_v19, 6 }
  0x9f   :  { %v209_v30 = vsub.f32 1.0, %v208_v28 }
  0xa0   :  { %v137_v27 = vmul.f32 %v2435_v23, %v136_v25 }
  0xa1   :  { %54 = vperm.xlu0 %2423, %v52_v20   ;;  %v210_v34 = vmul.f32 %v2437_v26, %v209_v30 }
  0xa2   :  { %v138_v29 = vadd.f32 %v2435_v23, %v137_v27 }
  0xa3   :  { %v211_v39 = vadd.f32 %v2437_v26, %v210_v34 }
  0xa4   :  { %v142_v33 = vsel %vm141_vm3, %v2435_v23, %v138_v29 }
  0xa5   :  { %v147_v37 = vsel %vm144_vm4, %v146_v35, %v142_v33  ;;  %v215_v42 = vsel %vm214_vm7, %v2437_v26, %v211_v39 }
  0xa6   :  { %v220_v44 = vsel %vm217_vm8, %v219_v43, %v215_v42  ;;  %v150_v48 = vmul.f32 0.0, %v147_v37 }
  0xa7   :  { %v223_v51 = vmul.f32 0.0, %v220_v44 }
 0x103   :  { %v153_v36 = vpop.permute.xlu0 %152 }
 0x104   :  { %v155_v38 = vmul.f32 %v153_v36, %v147_v37 }
 0x106   :  { %157 = vrot.lane.b32.xlu1 %v155_v38, %s2760_s0 }
 0x10b   :  { %v226_v45 = vpop.permute.xlu0 %225 }
 0x10c   :  { %v228_v46 = vmul.f32 %v226_v45, %v220_v44 }
 0x10e   :  { %230 = vrot.lane.b32.xlu1 %v228_v46, %s2760_s0 }
 0x113   :  { %v2909_v56 = vpop.permute.xlu0 %54 }
 0x114   :  { %4098 = vst [vmem:[#allocation9_spill] sm:$0xff] %v2909_v56  ;;  %vm4070_vm10 = vcmp.eq.s32.totalorder %v2909_v56, 1 }
 0x116   :  { %96 = vperm.xlu1 %2424, %v94_v47  }
 0x178   :  { %v158_v49 = vpop.permute.xlu1 %157 }
 0x179   :  { %v2901_v50 = vadd.f32 %v158_v49, %v150_v48 }
 0x17b   :  { %2438 = vtanh.f32 %v2901_v50 }
 0x180   :  { %v231_v52 = vpop.permute.xlu1 %230 }
 0x181   :  { %v2439_v53 = vpop.eup %2438  ;;  %v2904_v54 = vadd.f32 %v231_v52, %v223_v51  ;;  %v58_v51 = vsel %vm57_vm5, 1, %v4065_v2  ;;  %v2950_v52 = vsel %vm4070_vm10, %v2901_v50, 0.0  ;;  %vm81_vm5 = vcmp.gt.s32.totalorder %v2893_v19, 5 }
 0x182   :  { %163 = vrot.lane.b32.xlu2 %v2439_v53, %s2759_s18 }
 0x183   :  { %2440 = vtanh.f32 %v2904_v54 }
 0x188   :  { %v2919_v61 = vpop.permute.xlu1 %96 }
 0x189   :  { %v2441_v55 = vpop.eup %2440  ;;  %4099 = vst [vmem:[#allocation10_spill] sm:$0xff] %v2919_v61  ;;  %vm4064_vm11 = vcmp.eq.s32.totalorder %v2919_v61, 1 }
 0x18a   :  { %236 = vrot.lane.b32.xlu2 %v2441_v55, %s2759_s18  ;;  %v2962_v50 = vsel %vm4064_vm11, %v2904_v54, 0.0 }
 0x1dc   :  { %v164_v57 = vpop.permute.xlu2 %163 }
 0x1dd   :  { %v166_v58 = vmul.f32 %v164_v57, %v147_v37 }
 0x1df   :  { %v2914_v59 = vsel %vm4070_vm10, %v166_v58, 0.0 }
 0x1e0   :  { %v251_v60 = vpack.c.bf16 %v2914_v59, %v2914_v59 }
 0x1e2   :  { %253 = vrot.lane.b32.xlu2 %v251_v60, %s2760_s0  ;;  %v88_v60 = vsel %vm87_vm6, 1, %v4065_v2 }
 0x1e4   :  { %v237_v62 = vpop.permute.xlu2 %236 }
 0x1e5   :  { %v239_v63 = vmul.f32 %v237_v62, %v220_v44 }
 0x1e7   :  { %v2924_v5 = vsel %vm4064_vm11, %v239_v63, 0.0 }
 0x1e8   :  { %v320_v6 = vpack.c.bf16 %v2924_v5, %v2924_v5 }
 0x1ea   :  { %322 = vrot.lane.b32.xlu1 %v320_v6, %s2760_s0 }
 0x23c   :  { %v254_v7 = vpop.permute.xlu2 %253 }
 0x23d   :  { %2304 = vmatmul.msk.bf16.vlgmr.msra.gmra.mxu2 %vm112_vm12, %v254_v7 }
 0x23e   :  { %814 = vmatpush.bf16.msra.mxu2 %v2840_v0 }
 0x242   :  { %815 = vmatpush.bf16.msra.mxu2 %v2854_v3 }
 0x25c   :  { %v323_v8 = vpop.permute.xlu1 %322 }
 0x25d   :  { %2307 = vmatmul.msk.bf16.vlgmr.msra.gmra.mxu3 %vm112_vm12, %v323_v8 }
 0x25e   :  { %882 = vmatpush.bf16.msra.mxu3 %v2845_v1 }
 0x262   :  { %883 = vmatpush.bf16.msra.mxu3 %v2859_v4 }
 0x2c0   :  { %v267_v10 = vpop.f32.mrf.mxu2 }
 0x2c1   :  { %v271_v11 = vadd.f32 %v2303_v9, %v267_v10 }
 0x2c3   :  { %2442 = vtanh.f32 %v271_v11  ;;  %v2305_v20 = vmul.f32 -1.442695, %v271_v11 }
 0x2c8   :  { %v269_v12 = vpop.f32.mrf.mxu2 }
 0x2c9   :  { %v2443_v13 = vpop.eup %2442 }
 0x2ca   :  { %294 = vrot.lane.b32.xlu2 %v2443_v13, %s2759_s18 }
 0x2e0   :  { %v336_v15 = vpop.f32.mrf.mxu3 }
 0x2e1   :  { %v340_v16 = vadd.f32 %v2306_v14, %v336_v15 }
 0x2e3   :  { %2444 = vtanh.f32 %v340_v16  ;;  %v2308_v35 = vmul.f32 -1.442695, %v340_v16 }
 0x2e4   :  { %2446 = vpow2.f32 %v2305_v20  ;;  %v2309_v20 = vld [vmem:[%s4051_s1 + $0x4] sm:$0x3] }
 0x2e8   :  { %v338_v17 = vpop.f32.mrf.mxu3 }
 0x2e9   :  { %v2445_v18 = vpop.eup %2444 }
 0x2ea   :  { %363 = vrot.lane.b32.xlu0 %v2445_v18, %s2759_s18  ;;  %v2447_v21 = vpop.eup %2446 }
 0x2eb   :  { %v275_v22 = vadd.f32 1.0, %v2447_v21 }
 0x2ed   :  { %2448 = vrcp.f32 %v275_v22  ;;  %v287_v28 = vand.u32 2147483648, %v275_v22  ;;  %vm281_vm14 = vweird.f32 %v275_v22  ;;  %v285_v29 = vand.u32 2147483647, %v275_v22 }
 0x2ee   :  { %2450 = vpow2.f32 %v2308_v35 }
 0x2ef   :  { %v288_v31 = vor.u32 1.1754944e-38, %v287_v28  ;;  %vm286_vm0 = vcmp.eq.f32.partialorder %v285_v29, 8.507059e+37 }
 0x2f3   :  { %v2449_v23 = vpop.eup %2448 }
 0x2f4   :  { %v277_v24 = vmul.f32 %v2449_v23, %v275_v22  ;;  %vm282_vm13 = vweird.f32 %v2449_v23  ;;  %v2451_v36 = vpop.eup %2450 }
 0x2f5   :  { %vm283_vm15 = vmor %vm281_vm14, %vm282_vm13  ;;  %v344_v37 = vadd.f32 1.0, %v2451_v36 }
 0x2f6   :  { %v278_v25 = vsub.f32 1.0, %v277_v24 }
 0x2f7   :  { %2452 = vrcp.f32 %v344_v37  ;;  %v356_v43 = vand.u32 2147483648, %v344_v37  ;;  %vm350_vm2 = vweird.f32 %v344_v37  ;;  %v354_v44 = vand.u32 2147483647, %v344_v37 }
 0x2f8   :  { %v279_v26 = vmul.f32 %v2449_v23, %v278_v25 }
 0x2f9   :  { %v357_v46 = vor.u32 1.1754944e-38, %v356_v43  ;;  %vm355_vm4 = vcmp.eq.f32.partialorder %v354_v44, 8.507059e+37 }
 0x2fa   :  { %v280_v27 = vadd.f32 %v2449_v23, %v279_v26 }
 0x2fc   :  { %v284_v30 = vsel %vm283_vm15, %v2449_v23, %v280_v27  ;;  %v2312_v23 = vld [vmem:[%s4052_s2 + $0xa] sm:$0x3] }
 0x2fd   :  { %v289_v33 = vsel %vm286_vm0, %v288_v31, %v284_v30  ;;  %v2453_v38 = vpop.eup %2452 }
 0x2fe   :  { %v346_v39 = vmul.f32 %v2453_v38, %v344_v37  ;;  %vm351_vm1 = vweird.f32 %v2453_v38  ;;  %v292_v53 = vmul.f32 %v289_v33, %v2950_v52 }
 0x2ff   :  { %vm352_vm3 = vmor %vm350_vm2, %vm351_vm1 }
 0x300   :  { %v347_v40 = vsub.f32 1.0, %v346_v39 }
 0x302   :  { %v348_v41 = vmul.f32 %v2453_v38, %v347_v40 }
 0x304   :  { %v349_v42 = vadd.f32 %v2453_v38, %v348_v41 }
 0x306   :  { %v353_v45 = vsel %vm352_vm3, %v2453_v38, %v349_v42 }
 0x307   :  { %v358_v47 = vsel %vm355_vm4, %v357_v46, %v353_v45  ;;  %vm63_vm4 = vcmp.gt.s32.totalorder %v2893_v19, 2 }
 0x308   :  { %v361_v62 = vmul.f32 %v358_v47, %v2962_v50 }
 0x324   :  { %v295_v32 = vpop.permute.xlu2 %294 }
 0x325   :  { %v297_v34 = vmul.f32 %v295_v32, %v289_v33 }
 0x327   :  { %299 = vrot.lane.b32.xlu1 %v297_v34, %s2760_s0 }
 0x35c   :  { %v364_v48 = vpop.permute.xlu0 %363 }
 0x35d   :  { %v366_v49 = vmul.f32 %v364_v48, %v358_v47 }
 0x35f   :  { %368 = vrot.lane.b32.xlu2 %v366_v49, %s2760_s0 }
 0x367   :  { %60 = vperm.xlu2 %2425, %v58_v51  }
 0x399   :  { %v300_v55 = vpop.permute.xlu1 %299 }
 0x39a   :  { %v2953_v57 = vadd.f32 %v300_v55, %v292_v53 }
 0x39c   :  { %2454 = vtanh.f32 %v2953_v57 }
 0x3a2   :  { %v2455_v58 = vpop.eup %2454 }
 0x3a3   :  { %305 = vrot.lane.b32.xlu0 %v2455_v58, %s2759_s18 }
 0x3ab   :  { %90 = vperm.xlu0 %2423, %v88_v60  }
 0x3b9   :  { %v369_v63 = vpop.permute.xlu2 %368 }
 0x3ba   :  { %v2965_v6 = vadd.f32 %v369_v63, %v361_v62 }
 0x3bc   :  { %2456 = vtanh.f32 %v2965_v6 }
 0x3c1   :  { %v2969_v8 = vpop.permute.xlu2 %60 }
 0x3c2   :  { %v2457_v7 = vpop.eup %2456  ;;  %vm4097_vm7 = vcmp.eq.s32.totalorder %v2969_v8, 1 }
 0x3c3   :  { %374 = vrot.lane.b32.xlu1 %v2457_v7, %s2759_s18 }
 0x415   :  { %v306_v9 = vpop.permute.xlu0 %305 }
 0x416   :  { %v2971_v10 = vmul.f32 %v306_v9, %v289_v33 }
 0x418   :  { %v2978_v54 = vsel %vm4097_vm7, %v2971_v10, %v2914_v59 }
 0x419   :  { %v389_v11 = vpack.c.bf16 %v2978_v54, %v2978_v54 }
 0x41b   :  { %391 = vrot.lane.b32.xlu1 %v389_v11, %s2760_s0 }
 0x41d   :  { %v2983_v12 = vpop.permute.xlu0 %90 }
 0x41e   :  { %vm92_vm8 = vcmp.eq.s32.totalorder %v2983_v12, 1 }
 0x435   :  { %v375_v13 = vpop.permute.xlu1 %374 }
 0x436   :  { %v2985_v14 = vmul.f32 %v375_v13, %v358_v47  ;;  %v64_v13 = vsel %vm63_vm4, 1, %v4065_v2 }
 0x438   :  { %v2992_v15 = vsel %vm92_vm8, %v2985_v14, %v2924_v5 }
 0x439   :  { %v458_v16 = vpack.c.bf16 %v2992_v15, %v2992_v15 }
 0x43b   :  { %460 = vrot.lane.b32.xlu2 %v458_v16, %s2760_s0  ;;  %v3019_v16 = vsel %vm4097_vm7, %v2953_v57, %v2950_v52  ;;  %v3032_v52 = vsel %vm92_vm8, %v2965_v6, %v2962_v50 }
 0x48d   :  { %v392_v17 = vpop.permute.xlu1 %391 }
 0x48e   :  { %2310 = vmatmul.msk.bf16.vlgmr.msrb.gmra.mxu0 %vm112_vm12, %v392_v17 }
 0x48f   :  { %950 = vmatpush.bf16.msrb.mxu0 %v2840_v0 }
 0x493   :  { %951 = vmatpush.bf16.msrb.mxu0 %v2854_v3 }
 0x495   :  { %v461_v18 = vpop.permute.xlu2 %460 }
 0x496   :  { %2313 = vmatmul.msk.bf16.vlgmr.msrb.gmra.mxu1 %vm112_vm12, %v461_v18 }
 0x497   :  { %1018 = vmatpush.bf16.msrb.mxu1 %v2845_v1 }
 0x49b   :  { %1019 = vmatpush.bf16.msrb.mxu1 %v2859_v4 }
 0x50b   :  { %v405_v21 = vpop.f32.mrf.mxu0 }
 0x50c   :  { %v409_v22 = vadd.f32 %v2309_v20, %v405_v21 }
 0x50e   :  { %2458 = vtanh.f32 %v409_v22  ;;  %v2311_v30 = vmul.f32 -1.442695, %v409_v22  ;;  %v82_v22 = vsel %vm81_vm5, 1, %v4065_v2  ;;  %vm69_vm5 = vcmp.gt.s32.totalorder %v2893_v19, 3 }
 0x513   :  { %v407_v24 = vpop.f32.mrf.mxu0  ;;  %v474_v25 = vpop.f32.mrf.mxu1 }
 0x514   :  { %v2459_v26 = vpop.eup %2458  ;;  %v478_v27 = vadd.f32 %v2312_v23, %v474_v25 }
 0x515   :  { %432 = vrot.lane.b32.xlu0 %v2459_v26, %s2759_s18 }
 0x516   :  { %2460 = vtanh.f32 %v478_v27  ;;  %v2314_v31 = vmul.f32 -1.442695, %v478_v27 }
 0x517   :  { %2462 = vpow2.f32 %v2311_v30 }
 0x518   :  { %2464 = vpow2.f32 %v2314_v31 }
 0x51b   :  { %v476_v28 = vpop.f32.mrf.mxu1 }
 0x51c   :  { %v2461_v29 = vpop.eup %2460 }
 0x51d   :  { %501 = vrot.lane.b32.xlu1 %v2461_v29, %s2759_s18  ;;  %v2463_v32 = vpop.eup %2462 }
 0x51e   :  { %v413_v33 = vadd.f32 1.0, %v2463_v32  ;;  %v2465_v34 = vpop.eup %2464 }
 0x51f   :  { %v482_v35 = vadd.f32 1.0, %v2465_v34 }
 0x520   :  { %2466 = vrcp.f32 %v413_v33  ;;  %v425_v44 = vand.u32 2147483648, %v413_v33  ;;  %vm419_vm13 = vweird.f32 %v413_v33  ;;  %v423_v45 = vand.u32 2147483647, %v413_v33 }
 0x521   :  { %2468 = vrcp.f32 %v482_v35  ;;  %v494_v58 = vand.u32 2147483648, %v482_v35  ;;  %vm488_vm1 = vweird.f32 %v482_v35  ;;  %v492_v60 = vand.u32 2147483647, %v482_v35 }
 0x522   :  { %v426_v48 = vor.u32 1.1754944e-38, %v425_v44  ;;  %vm424_vm15 = vcmp.eq.f32.partialorder %v423_v45, 8.507059e+37 }
 0x523   :  { %v495_v63 = vor.u32 1.1754944e-38, %v494_v58  ;;  %vm493_vm3 = vcmp.eq.f32.partialorder %v492_v60, 8.507059e+37 }
 0x526   :  { %v2467_v36 = vpop.eup %2466 }
 0x527   :  { %v415_v37 = vmul.f32 %v2467_v36, %v413_v33  ;;  %v2469_v39 = vpop.eup %2468  ;;  %vm420_vm9 = vweird.f32 %v2467_v36 }
 0x528   :  { %v484_v41 = vmul.f32 %v2469_v39, %v482_v35  ;;  %vm421_vm14 = vmor %vm419_vm13, %vm420_vm9  ;;  %vm489_vm0 = vweird.f32 %v2469_v39 }
 0x529   :  { %v416_v38 = vsub.f32 1.0, %v415_v37  ;;  %vm490_vm2 = vmor %vm488_vm1, %vm489_vm0 }
 0x52a   :  { %v485_v43 = vsub.f32 1.0, %v484_v41 }
 0x52b   :  { %v417_v40 = vmul.f32 %v2467_v36, %v416_v38 }
 0x52c   :  { %v486_v47 = vmul.f32 %v2469_v39, %v485_v43 }
 0x52d   :  { %v418_v42 = vadd.f32 %v2467_v36, %v417_v40 }
 0x52e   :  { %v487_v55 = vadd.f32 %v2469_v39, %v486_v47 }
 0x52f   :  { %v422_v46 = vsel %vm421_vm14, %v2467_v36, %v418_v42 }
 0x530   :  { %v427_v49 = vsel %vm424_vm15, %v426_v48, %v422_v46  ;;  %v491_v62 = vsel %vm490_vm2, %v2469_v39, %v487_v55 }
 0x531   :  { %v496_v9 = vsel %vm493_vm3, %v495_v63, %v491_v62  ;;  %v430_v17 = vmul.f32 %v427_v49, %v3019_v16 }
 0x532   :  { %v499_v57 = vmul.f32 %v496_v9, %v3032_v52 }
 0x587   :  { %v433_v51 = vpop.permute.xlu0 %432 }
 0x588   :  { %v435_v53 = vmul.f32 %v433_v51, %v427_v49 }
 0x58a   :  { %437 = vrot.lane.b32.xlu2 %v435_v53, %s2760_s0 }
 0x58f   :  { %v502_v7 = vpop.permute.xlu1 %501 }
 0x590   :  { %v504_v11 = vmul.f32 %v502_v7, %v496_v9 }
 0x592   :  { %506 = vrot.lane.b32.xlu0 %v504_v11, %s2760_s0 }
 0x59a   :  { %66 = vperm.xlu0 %2423, %v64_v13  }
 0x5e4   :  { %v438_v18 = vpop.permute.xlu2 %437 }
 0x5e5   :  { %v3022_v20 = vadd.f32 %v438_v18, %v430_v17 }
 0x5e7   :  { %2470 = vtanh.f32 %v3022_v20 }
 0x5ed   :  { %v2471_v21 = vpop.eup %2470 }
 0x5ee   :  { %443 = vrot.lane.b32.xlu1 %v2471_v21, %s2759_s18 }
 0x5f6   :  { %84 = vperm.xlu1 %2424, %v82_v22  }
 0x604   :  { %v507_v23 = vpop.permute.xlu0 %506 }
 0x605   :  { %v3035_v24 = vadd.f32 %v507_v23, %v499_v57 }
 0x607   :  { %2472 = vtanh.f32 %v3035_v24 }
 0x60c   :  { %v3039_v26 = vpop.permute.xlu0 %66 }
 0x60d   :  { %v2473_v25 = vpop.eup %2472  ;;  %vm68_vm6 = vcmp.eq.s32.totalorder %v3039_v26, 1 }
 0x60e   :  { %512 = vrot.lane.b32.xlu2 %v2473_v25, %s2759_s18 }
 0x660   :  { %v444_v27 = vpop.permute.xlu1 %443 }
 0x661   :  { %v3041_v28 = vmul.f32 %v444_v27, %v427_v49 }
 0x663   :  { %v3048_v50 = vsel %vm68_vm6, %v3041_v28, %v2978_v54 }
 0x664   :  { %v527_v6 = vpack.c.bf16 %v3048_v50, %v3048_v50 }
 0x666   :  { %529 = vrot.lane.b32.xlu2 %v527_v6, %s2760_s0 }
 0x668   :  { %v3053_v29 = vpop.permute.xlu1 %84  ;;  %v513_v30 = vpop.permute.xlu2 %512 }
 0x669   :  { %vm4071_vm9 = vcmp.eq.s32.totalorder %v3053_v29, 1  ;;  %v3056_v31 = vmul.f32 %v513_v30, %v496_v9  ;;  %v70_v30 = vsel %vm69_vm5, 1, %v4065_v2 }
 0x66b   :  { %v3062_v32 = vsel %vm4071_vm9, %v3056_v31, %v2992_v15  ;;  %v2315_v15 = vld [vmem:[%s4051_s1 + $0x6] sm:$0x3] }
 0x66c   :  { %v596_v54 = vpack.c.bf16 %v3062_v32, %v3062_v32 }
 0x66e   :  { %598 = vrot.lane.b32.xlu0 %v596_v54, %s2760_s0  ;;  %v3089_v54 = vsel %vm68_vm6, %v3022_v20, %v3019_v16 }
 0x6c0   :  { %v530_v33 = vpop.permute.xlu2 %529 }
 0x6c1   :  { %2316 = vmatmul.msk.bf16.vlgmr.msrb.gmra.mxu2 %vm112_vm12, %v530_v33 }
 0x6c2   :  { %1086 = vmatpush.bf16.msrb.mxu2 %v2840_v0  ;;  %v2318_v0 = vld [vmem:[%s4052_s2 + $0x8] sm:$0x3] }
 0x6c6   :  { %1087 = vmatpush.bf16.msrb.mxu2 %v2854_v3 }
 0x6e0   :  { %v599_v34 = vpop.permute.xlu0 %598 }
 0x6e1   :  { %2319 = vmatmul.msk.bf16.vlgmr.msrb.gmra.mxu3 %vm112_vm12, %v599_v34 }
 0x6e2   :  { %1152 = vmatpush.bf16.msrb.mxu3 %v2845_v1 }
 0x6e6   :  { %1153 = vmatpush.bf16.msrb.mxu3 %v2859_v4 }
 0x744   :  { %v543_v35 = vpop.f32.mrf.mxu2 }
 0x745   :  { %v547_v36 = vadd.f32 %v2315_v15, %v543_v35  ;;  %v3099_v35 = vsel %vm4071_vm9, %v3035_v24, %v3032_v52 }
 0x747   :  { %2474 = vtanh.f32 %v547_v36  ;;  %v2317_v40 = vmul.f32 -1.442695, %v547_v36 }
 0x74c   :  { %v545_v37 = vpop.f32.mrf.mxu2 }
 0x74d   :  { %v2475_v38 = vpop.eup %2474 }
 0x74e   :  { %570 = vrot.lane.b32.xlu1 %v2475_v38, %s2759_s18 }
 0x764   :  { %v612_v3 = vpop.f32.mrf.mxu3 }
 0x765   :  { %v616_v39 = vadd.f32 %v2318_v0, %v612_v3 }
 0x767   :  { %2476 = vtanh.f32 %v616_v39  ;;  %v2320_v41 = vmul.f32 -1.442695, %v616_v39 }
 0x768   :  { %2478 = vpow2.f32 %v2317_v40 }
 0x769   :  { %2480 = vpow2.f32 %v2320_v41 }
 0x76c   :  { %v614_v1 = vpop.f32.mrf.mxu3 }
 0x76d   :  { %v2477_v4 = vpop.eup %2476 }
 0x76e   :  { %639 = vrot.lane.b32.xlu2 %v2477_v4, %s2759_s18  ;;  %v2479_v42 = vpop.eup %2478 }
 0x76f   :  { %v551_v43 = vadd.f32 1.0, %v2479_v42  ;;  %v2481_v44 = vpop.eup %2480 }
 0x770   :  { %v620_v45 = vadd.f32 1.0, %v2481_v44  ;;  %v2321_v44 = vld [vmem:[%s4051_s1 + $0x8] sm:$0x3] }
 0x771   :  { %2482 = vrcp.f32 %v551_v43  ;;  %v563_v60 = vand.u32 2147483648, %v551_v43  ;;  %vm557_vm14 = vweird.f32 %v551_v43  ;;  %v561_v62 = vand.u32 2147483647, %v551_v43 }
 0x772   :  { %2484 = vrcp.f32 %v620_v45  ;;  %v632_v21 = vand.u32 2147483648, %v620_v45  ;;  %vm626_vm2 = vweird.f32 %v620_v45  ;;  %v630_v22 = vand.u32 2147483647, %v620_v45 }
 0x773   :  { %v564_v9 = vor.u32 1.1754944e-38, %v563_v60  ;;  %vm562_vm0 = vcmp.eq.f32.partialorder %v561_v62, 8.507059e+37 }
 0x774   :  { %v633_v23 = vor.u32 1.1754944e-38, %v632_v21  ;;  %vm631_vm4 = vcmp.eq.f32.partialorder %v630_v22, 8.507059e+37 }
 0x777   :  { %v2483_v46 = vpop.eup %2482 }
 0x778   :  { %v553_v47 = vmul.f32 %v2483_v46, %v551_v43  ;;  %v2485_v49 = vpop.eup %2484  ;;  %vm558_vm13 = vweird.f32 %v2483_v46 }
 0x779   :  { %v622_v53 = vmul.f32 %v2485_v49, %v620_v45  ;;  %vm559_vm15 = vmor %vm557_vm14, %vm558_vm13  ;;  %vm627_vm1 = vweird.f32 %v2485_v49  ;;  %vm75_vm13 = vcmp.gt.s32.totalorder %v2893_v19, 4 }
 0x77a   :  { %v554_v48 = vsub.f32 1.0, %v553_v47  ;;  %vm628_vm3 = vmor %vm626_vm2, %vm627_vm1  ;;  %v76_v16 = vsel %vm75_vm13, 1, %v4065_v2 }
 0x77b   :  { %v623_v58 = vsub.f32 1.0, %v622_v53 }
 0x77c   :  { %v555_v51 = vmul.f32 %v2483_v46, %v554_v48  ;;  %v2324_v48 = vld [vmem:[%s4052_s2 + $0x6] sm:$0x3] }
 0x77d   :  { %v624_v7 = vmul.f32 %v2485_v49, %v623_v58 }
 0x77e   :  { %v556_v55 = vadd.f32 %v2483_v46, %v555_v51 }
 0x77f   :  { %v625_v18 = vadd.f32 %v2485_v49, %v624_v7 }
 0x780   :  { %v560_v63 = vsel %vm559_vm15, %v2483_v46, %v556_v55 }
 0x781   :  { %v565_v13 = vsel %vm562_vm0, %v564_v9, %v560_v63  ;;  %v629_v57 = vsel %vm628_vm3, %v2485_v49, %v625_v18 }
 0x782   :  { %v634_v27 = vsel %vm631_vm4, %v633_v23, %v629_v57  ;;  %v568_v33 = vmul.f32 %v565_v13, %v3089_v54 }
 0x783   :  { %v637_v36 = vmul.f32 %v634_v27, %v3099_v35 }
 0x7c0   :  { %v571_v11 = vpop.permute.xlu1 %570 }
 0x7c1   :  { %v573_v17 = vmul.f32 %v571_v11, %v565_v13 }
 0x7c3   :  { %575 = vrot.lane.b32.xlu0 %v573_v17, %s2760_s0 }
 0x7c8   :  { %v640_v25 = vpop.permute.xlu2 %639 }
 0x7c9   :  { %v642_v6 = vmul.f32 %v640_v25, %v634_v27 }
 0x7cb   :  { %644 = vrot.lane.b32.xlu1 %v642_v6, %s2760_s0 }
 0x7d3   :  { %72 = vperm.xlu1 %2424, %v70_v30  }
 0x835   :  { %v576_v34 = vpop.permute.xlu0 %575 }
 0x836   :  { %v3092_v15 = vadd.f32 %v576_v34, %v568_v33 }
 0x838   :  { %2486 = vtanh.f32 %v3092_v15 }
 0x83d   :  { %v645_v37 = vpop.permute.xlu1 %644 }
 0x83e   :  { %v2487_v38 = vpop.eup %2486  ;;  %v3102_v0 = vadd.f32 %v645_v37, %v637_v36 }
 0x83f   :  { %581 = vrot.lane.b32.xlu2 %v2487_v38, %s2759_s18 }
 0x840   :  { %2488 = vtanh.f32 %v3102_v0 }
 0x845   :  { %v3109_v52 = vpop.permute.xlu1 %72 }
 0x846   :  { %v2489_v20 = vpop.eup %2488  ;;  %vm74_vm14 = vcmp.eq.s32.totalorder %v3109_v52, 1 }
 0x847   :  { %650 = vrot.lane.b32.xlu0 %v2489_v20, %s2759_s18  ;;  %78 = vperm.xlu2 %2425, %v76_v16  }
 0x899   :  { %v582_v24 = vpop.permute.xlu2 %581 }
 0x89a   :  { %v3111_v3 = vmul.f32 %v582_v24, %v565_v13 }
 0x89c   :  { %v3118_v39 = vsel %vm74_vm14, %v3111_v3, %v3048_v50 }
 0x89d   :  { %v665_v19 = vpack.c.bf16 %v3118_v39, %v3118_v39 }
 0x89f   :  { %667 = vrot.lane.b32.xlu0 %v665_v19, %s2760_s0 }
 0x8a1   :  { %v3123_v1 = vpop.permute.xlu2 %78 }
 0x8a2   :  { %vm4072_vm15 = vcmp.eq.s32.totalorder %v3123_v1, 1 }
 0x8b9   :  { %v651_v4 = vpop.permute.xlu0 %650 }
 0x8ba   :  { %v3125_v40 = vmul.f32 %v651_v4, %v634_v27 }
 0x8bc   :  { %v3132_v41 = vsel %vm4072_vm15, %v3125_v40, %v3062_v32 }
 0x8bd   :  { %v733_v50 = vpack.c.bf16 %v3132_v41, %v3132_v41 }
 0x8bf   :  { %735 = vrot.lane.b32.xlu1 %v733_v50, %s2760_s0 }
 0x911   :  { %v668_v42 = vpop.permute.xlu0 %667 }
 0x912   :  { %2322 = vmatmul.msk.bf16.vlgmr.msra.gmra.mxu0 %vm112_vm12, %v668_v42 }
 0x931   :  { %v736_v43 = vpop.permute.xlu1 %735 }
 0x932   :  { %2325 = vmatmul.msk.bf16.vlgmr.msra.gmra.mxu1 %vm112_vm12, %v736_v43  ;;  %v3153_v43 = vsel %vm74_vm14, %v3092_v15, %v3089_v54 }
 0x98f   :  { %v681_v45 = vpop.f32.mrf.mxu0 }
 0x990   :  { %v685_v46 = vadd.f32 %v2321_v44, %v681_v45 }
 0x992   :  { %2490 = vtanh.f32 %v685_v46  ;;  %v2323_v58 = vmul.f32 -1.442695, %v685_v46 }
 0x997   :  { %v683_v32 = vpop.f32.mrf.mxu0 }
 0x998   :  { %v2491_v47 = vpop.eup %2490 }
 0x999   :  { %708 = vrot.lane.b32.xlu2 %v2491_v47, %s2759_s18  ;;  %v3164_v47 = vsel %vm4072_vm15, %v3102_v0, %v3099_v35 }
 0x9af   :  { %v749_v49 = vpop.f32.mrf.mxu1 }
 0x9b0   :  { %v753_v51 = vadd.f32 %v2324_v48, %v749_v49 }
 0x9b2   :  { %2492 = vtanh.f32 %v753_v51  ;;  %v2326_v27 = vmul.f32 -1.442695, %v753_v51 }
 0x9b3   :  { %2494 = vpow2.f32 %v2323_v58 }
 0x9b7   :  { %v751_v53 = vpop.f32.mrf.mxu1 }
 0x9b8   :  { %v2493_v55 = vpop.eup %2492 }
 0x9b9   :  { %776 = vrot.lane.b32.xlu0 %v2493_v55, %s2759_s18  ;;  %v2495_v60 = vpop.eup %2494 }
 0x9ba   :  { %v689_v62 = vadd.f32 1.0, %v2495_v60 }
 0x9bc   :  { %2496 = vrcp.f32 %v689_v62  ;;  %v701_v17 = vand.u32 2147483648, %v689_v62  ;;  %vm695_vm1 = vweird.f32 %v689_v62  ;;  %v699_v18 = vand.u32 2147483647, %v689_v62 }
 0x9bd   :  { %2498 = vpow2.f32 %v2326_v27 }
 0x9be   :  { %v702_v22 = vor.u32 1.1754944e-38, %v701_v17  ;;  %vm700_vm3 = vcmp.eq.f32.partialorder %v699_v18, 8.507059e+37  ;;  %v2330_v17 = vld [vmem:[%s4052_s2 + $0x4] sm:$0x3] }
 0x9c2   :  { %v2497_v63 = vpop.eup %2496 }
 0x9c3   :  { %v691_v7 = vmul.f32 %v2497_v63, %v689_v62  ;;  %vm696_vm0 = vweird.f32 %v2497_v63  ;;  %v2499_v6 = vpop.eup %2498 }
 0x9c4   :  { %vm697_vm2 = vmor %vm695_vm1, %vm696_vm0  ;;  %v757_v30 = vadd.f32 1.0, %v2499_v6 }
 0x9c5   :  { %v692_v9 = vsub.f32 1.0, %v691_v7  ;;  %v2327_v7 = vld [vmem:[%s4051_s1 + $0xa] sm:$0x3] }
 0x9c6   :  { %2500 = vrcp.f32 %v757_v30  ;;  %v769_v16 = vand.u32 2147483648, %v757_v30  ;;  %vm763_vm5 = vweird.f32 %v757_v30  ;;  %v767_v20 = vand.u32 2147483647, %v757_v30 }
 0x9c7   :  { %v693_v11 = vmul.f32 %v2497_v63, %v692_v9 }
 0x9c8   :  { %v770_v19 = vor.u32 1.1754944e-38, %v769_v16  ;;  %vm768_vm0 = vcmp.eq.f32.partialorder %v767_v20, 8.507059e+37 }
 0x9c9   :  { %v694_v13 = vadd.f32 %v2497_v63, %v693_v11 }
 0x9cb   :  { %v698_v21 = vsel %vm697_vm2, %v2497_v63, %v694_v13 }
 0x9cc   :  { %v703_v23 = vsel %vm700_vm3, %v702_v22, %v698_v21  ;;  %v2501_v33 = vpop.eup %2500 }
 0x9cd   :  { %v759_v34 = vmul.f32 %v2501_v33, %v757_v30  ;;  %vm764_vm4 = vweird.f32 %v2501_v33  ;;  %v706_v44 = vmul.f32 %v703_v23, %v3153_v43 }
 0x9ce   :  { %vm765_vm13 = vmor %vm763_vm5, %vm764_vm4 }
 0x9cf   :  { %v760_v36 = vsub.f32 1.0, %v759_v34 }
 0x9d1   :  { %v761_v37 = vmul.f32 %v2501_v33, %v760_v36 }
 0x9d3   :  { %v762_v38 = vadd.f32 %v2501_v33, %v761_v37 }
 0x9d5   :  { %v766_v24 = vsel %vm765_vm13, %v2501_v33, %v762_v38 }
 0x9d6   :  { %v771_v4 = vsel %vm768_vm0, %v770_v19, %v766_v24 }
 0x9d7   :  { %v774_v48 = vmul.f32 %v771_v4, %v3164_v47 }
 0x9f3   :  { %v709_v57 = vpop.permute.xlu2 %708 }
 0x9f4   :  { %v711_v25 = vmul.f32 %v709_v57, %v703_v23 }
 0x9f6   :  { %713 = vrot.lane.b32.xlu1 %v711_v25, %s2760_s0 }
 0xa2b   :  { %v777_v50 = vpop.permute.xlu0 %776 }
 0xa2c   :  { %v779_v42 = vmul.f32 %v777_v50, %v771_v4 }
 0xa2e   :  { %781 = vrot.lane.b32.xlu2 %v779_v42, %s2760_s0 }
 0xa68   :  { %v714_v45 = vpop.permute.xlu1 %713 }
 0xa69   :  { %v3156_v46 = vadd.f32 %v714_v45, %v706_v44 }
 0xa6b   :  { %2502 = vtanh.f32 %v3156_v46 }
 0xa71   :  { %v2503_v32 = vpop.eup %2502 }
 0xa72   :  { %719 = vrot.lane.b32.xlu0 %v2503_v32, %s2759_s18 }
 0xa88   :  { %v782_v54 = vpop.permute.xlu2 %781 }
 0xa89   :  { %v3167_v15 = vadd.f32 %v782_v54, %v774_v48 }
 0xa8b   :  { %2504 = vtanh.f32 %v3167_v15 }
 0xa91   :  { %v2505_v49 = vpop.eup %2504 }
 0xa92   :  { %787 = vrot.lane.b32.xlu1 %v2505_v49, %s2759_s18 }
 0xae4   :  { %v720_v51 = vpop.permute.xlu0 %719 }
 0xae5   :  { %v3171_v53 = vmul.f32 %v720_v51, %v703_v23 }
 0xae7   :  { %v3177_v55 = vsel %vm4072_vm15, %v3171_v53, %v3118_v39 }
 0xae8   :  { %v801_v35 = vpack.c.bf16 %v3177_v55, %v3177_v55 }
 0xaea   :  { %803 = vrot.lane.b32.xlu2 %v801_v35, %s2760_s0 }
 0xb04   :  { %v788_v0 = vpop.permute.xlu1 %787 }
 0xb05   :  { %v3182_v58 = vmul.f32 %v788_v0, %v771_v4 }
 0xb07   :  { %v3188_v60 = vsel %vm74_vm14, %v3182_v58, %v3132_v41 }
 0xb08   :  { %v869_v62 = vpack.c.bf16 %v3188_v60, %v3188_v60 }
 0xb0a   :  { %871 = vrot.lane.b32.xlu0 %v869_v62, %s2760_s0 }
 0xb44   :  { %v804_v39 = vpop.permute.xlu2 %803 }
 0xb45   :  { %2328 = vmatmul.msk.bf16.vlgmr.msra.gmra.mxu2 %vm112_vm12, %v804_v39 }
 0xb7c   :  { %v872_v63 = vpop.permute.xlu0 %871 }
 0xb7d   :  { %2331 = vmatmul.msk.bf16.vlgmr.msra.gmra.mxu3 %vm112_vm12, %v872_v63 }
 0xbc8   :  { %v817_v9 = vpop.f32.mrf.mxu2 }
 0xbc9   :  { %v821_v11 = vadd.f32 %v2327_v7, %v817_v9  ;;  %v3209_v9 = vsel %vm4072_vm15, %v3156_v46, %v3153_v43 }
 0xbcb   :  { %2506 = vtanh.f32 %v821_v11  ;;  %v2329_v23 = vmul.f32 -1.442695, %v821_v11 }
 0xbd0   :  { %v819_v41 = vpop.f32.mrf.mxu2 }
 0xbd1   :  { %v2507_v13 = vpop.eup %2506 }
 0xbd2   :  { %844 = vrot.lane.b32.xlu1 %v2507_v13, %s2759_s18 }
 0xc00   :  { %v885_v18 = vpop.f32.mrf.mxu3 }
 0xc01   :  { %v889_v21 = vadd.f32 %v2330_v17, %v885_v18  ;;  %v3220_v18 = vsel %vm74_vm14, %v3167_v15, %v3164_v47 }
 0xc03   :  { %2508 = vtanh.f32 %v889_v21  ;;  %v2332_v34 = vmul.f32 -1.442695, %v889_v21 }
 0xc04   :  { %2510 = vpow2.f32 %v2329_v23 }
 0xc08   :  { %v887_v22 = vpop.f32.mrf.mxu3 }
 0xc09   :  { %v2509_v57 = vpop.eup %2508 }
 0xc0a   :  { %912 = vrot.lane.b32.xlu2 %v2509_v57, %s2759_s18  ;;  %v2511_v25 = vpop.eup %2510 }
 0xc0b   :  { %v825_v27 = vadd.f32 1.0, %v2511_v25 }
 0xc0d   :  { %2512 = vrcp.f32 %v825_v27  ;;  %v837_v38 = vand.u32 2147483648, %v825_v27  ;;  %vm831_vm2 = vweird.f32 %v825_v27  ;;  %v835_v16 = vand.u32 2147483647, %v825_v27 }
 0xc0e   :  { %2514 = vpow2.f32 %v2332_v34  ;;  %v3267_v34 = vld [vmem:[%s4059_s9 + $0x8] sm:$0xff] }
 0xc0f   :  { %v838_v19 = vor.u32 1.1754944e-38, %v837_v38  ;;  %vm836_vm4 = vcmp.eq.f32.partialorder %v835_v16, 8.507059e+37  ;;  %1413 = vmatpush.bf16.msra.mxu1 %v3267_v34  ;;  %1647 = vmatpush.bf16.msra.mxu3 %v3267_v34  ;;  %v2333_v38 = vld [vmem:[%s4051_s1 + $0xc] sm:$0x3] }
 0xc13   :  { %v2513_v6 = vpop.eup %2512 }
 0xc14   :  { %v827_v30 = vmul.f32 %v2513_v6, %v825_v27  ;;  %vm832_vm1 = vweird.f32 %v2513_v6  ;;  %v2515_v20 = vpop.eup %2514 }
 0xc15   :  { %vm833_vm3 = vmor %vm831_vm2, %vm832_vm1  ;;  %v893_v4 = vadd.f32 1.0, %v2515_v20 }
 0xc16   :  { %v828_v33 = vsub.f32 1.0, %v827_v30 }
 0xc17   :  { %2516 = vrcp.f32 %v893_v4  ;;  %v905_v51 = vand.u32 2147483648, %v893_v4  ;;  %vm899_vm13 = vweird.f32 %v893_v4  ;;  %v903_v35 = vand.u32 2147483647, %v893_v4 }
 0xc18   :  { %v829_v36 = vmul.f32 %v2513_v6, %v828_v33  ;;  %v3258_v33 = vld [vmem:[%s4058_s8] sm:$0xff] }
 0xc19   :  { %v906_v62 = vor.u32 1.1754944e-38, %v905_v51  ;;  %vm904_vm1 = vcmp.eq.f32.partialorder %v903_v35, 8.507059e+37 }
 0xc1a   :  { %v830_v37 = vadd.f32 %v2513_v6, %v829_v36  ;;  %v3274_v36 = vld [vmem:[%s4059_s9] sm:$0xff] }
 0xc1b   :  { %1414 = vmatpush.bf16.msra.mxu1 %v3274_v36  ;;  %1648 = vmatpush.bf16.msra.mxu3 %v3274_v36 }
 0xc1c   :  { %v834_v24 = vsel %vm833_vm3, %v2513_v6, %v830_v37 }
 0xc1d   :  { %v839_v42 = vsel %vm836_vm4, %v838_v19, %v834_v24  ;;  %v2517_v45 = vpop.eup %2516 }
 0xc1e   :  { %v895_v32 = vmul.f32 %v2517_v45, %v893_v4  ;;  %vm900_vm5 = vweird.f32 %v2517_v45  ;;  %v842_v11 = vmul.f32 %v839_v42, %v3209_v9  ;;  %v1273_v4 = vld [vmem:[%s4056_s6] sm:$0xff] }
 0xc1f   :  { %vm901_vm0 = vmor %vm899_vm13, %vm900_vm5 }
 0xc20   :  { %v896_v48 = vsub.f32 1.0, %v895_v32 }
 0xc22   :  { %v897_v54 = vmul.f32 %v2517_v45, %v896_v48 }
 0xc24   :  { %v898_v49 = vadd.f32 %v2517_v45, %v897_v54  ;;  %v2336_v54 = vld [vmem:[%s4052_s2 + $0x2] sm:$0x3] }
 0xc26   :  { %v902_v0 = vsel %vm901_vm0, %v2517_v45, %v898_v49 }
 0xc27   :  { %v907_v63 = vsel %vm904_vm1, %v906_v62, %v902_v0 }
 0xc28   :  { %v910_v21 = vmul.f32 %v907_v63, %v3220_v18 }
 0xc44   :  { %v845_v50 = vpop.permute.xlu1 %844 }
 0xc45   :  { %v847_v44 = vmul.f32 %v845_v50, %v839_v42 }
 0xc47   :  { %849 = vrot.lane.b32.xlu0 %v847_v44, %s2760_s0  ;;  %v1274_v44 = vld [vmem:[%s4056_s6 + $0x8] sm:$0xf] }
 0xc64   :  { %v913_v39 = vpop.permute.xlu2 %912 }
 0xc65   :  { %v915_v7 = vmul.f32 %v913_v39, %v907_v63  ;;  %v2354_v39 = vld [vmem:[%s4057_s7 + $0x30] sm:$0xff] }
 0xc67   :  { %917 = vrot.lane.b32.xlu1 %v915_v7, %s2760_s0 }
 0xcb9   :  { %v850_v41 = vpop.permute.xlu0 %849 }
 0xcba   :  { %v3212_v13 = vadd.f32 %v850_v41, %v842_v11  ;;  %v2355_v11 = vld [vmem:[%s4057_s7 + $0x38] sm:$0xf] }
 0xcbc   :  { %2518 = vtanh.f32 %v3212_v13 }
 0xcc2   :  { %v2519_v17 = vpop.eup %2518 }
 0xcc3   :  { %855 = vrot.lane.b32.xlu2 %v2519_v17, %s2759_s18 }
 0xcd9   :  { %v918_v43 = vpop.permute.xlu1 %917 }
 0xcda   :  { %v3223_v46 = vadd.f32 %v918_v43, %v910_v21 }
 0xcdc   :  { %2520 = vtanh.f32 %v3223_v46 }
 0xce2   :  { %v2521_v22 = vpop.eup %2520 }
 0xce3   :  { %923 = vrot.lane.b32.xlu0 %v2521_v22, %s2759_s18 }
 0xd1d   :  { %v856_v57 = vpop.permute.xlu2 %855 }
 0xd1e   :  { %v3227_v23 = vmul.f32 %v856_v57, %v839_v42 }
 0xd20   :  { %v3233_v25 = vsel %vm4071_vm9, %v3227_v23, %v3177_v55  ;;  %v3252_v55 = vld [vmem:[%s4058_s8 + $0x8] sm:$0xff] }
 0xd21   :  { %v937_v47 = vpack.c.bf16 %v3233_v25, %v3233_v25  ;;  %1293 = vmatpush.bf16.msra.mxu0 %v3252_v55  ;;  %1530 = vmatpush.bf16.msra.mxu2 %v3252_v55 }
 0xd23   :  { %939 = vrot.lane.b32.xlu1 %v937_v47, %s2760_s0 }
 0xd25   :  { %1294 = vmatpush.bf16.msra.mxu0 %v3258_v33  ;;  %1531 = vmatpush.bf16.msra.mxu2 %v3258_v33 }
 0xd55   :  { %v924_v15 = vpop.permute.xlu0 %923 }
 0xd56   :  { %v3238_v27 = vmul.f32 %v924_v15, %v907_v63 }
 0xd58   :  { %v3244_v6 = vsel %vm68_vm6, %v3238_v27, %v3188_v60 }
 0xd59   :  { %v1005_v30 = vpack.c.bf16 %v3244_v6, %v3244_v6 }
 0xd5b   :  { %1007 = vrot.lane.b32.xlu2 %v1005_v30, %s2760_s0 }
 0xd95   :  { %v940_v60 = vpop.permute.xlu1 %939 }
 0xd96   :  { %2334 = vmatmul.msk.bf16.vlgmr.msrb.gmra.mxu0 %vm112_vm12, %v940_v60 }
 0xd97   :  { %1764 = vmatpush.bf16.msrb.mxu0 %v3252_v55 }
 0xd9b   :  { %1765 = vmatpush.bf16.msrb.mxu0 %v3258_v33 }
 0xda6   :  { %1295 = vmatmul.bf16.vlgmr.msra.gmra.mxu0 %v4065_v2 }
 0xdb5   :  { %v1008_v37 = vpop.permute.xlu2 %1007 }
 0xdb6   :  { %2337 = vmatmul.msk.bf16.vlgmr.msrb.gmra.mxu1 %vm112_vm12, %v1008_v37 }
 0xdb7   :  { %1880 = vmatpush.bf16.msrb.mxu1 %v3267_v34 }
 0xdbb   :  { %1881 = vmatpush.bf16.msrb.mxu1 %v3274_v36 }
 0xdc6   :  { %1415 = vmatmul.bf16.vlgmr.msra.gmra.mxu1 %v4065_v2 }
 0xe13   :  { %v953_v16 = vpop.f32.mrf.mxu0 }
 0xe14   :  { %v957_v20 = vadd.f32 %v2333_v38, %v953_v16 }
 0xe16   :  { %2522 = vtanh.f32 %v957_v20  ;;  %v2335_v57 = vmul.f32 -1.442695, %v957_v20 }
 0xe1b   :  { %v955_v24 = vpop.f32.mrf.mxu0 }
 0xe1c   :  { %v2523_v19 = vpop.eup %2522 }
 0xe1d   :  { %980 = vrot.lane.b32.xlu0 %v2523_v19, %s2759_s18 }
 0xe23   :  { %v1296_v50 = vpop.f32.mrf.mxu0 }
 0xe24   :  { %v1301_v42 = vadd.f32 %v1296_v50, %v1273_v4 }
 0xe26   :  { %2524 = vtanh.f32 %v1301_v42  ;;  %v2352_v22 = vmul.f32 -1.442695, %v1301_v42 }
 0xe2b   :  { %v1298_v45 = vpop.f32.mrf.mxu0 }
 0xe2c   :  { %v2525_v32 = vpop.eup %2524  ;;  %v1302_v48 = vadd.f32 %v1298_v45, %v1274_v44 }
 0xe2d   :  { %1347 = vrot.lane.b32.xlu2 %v2525_v32, %s2759_s18 }
 0xe2e   :  { %2526 = vtanh.f32 %v1302_v48  ;;  %v2353_v19 = vmul.f32 -1.442695, %v1302_v48 }
 0xe33   :  { %v1021_v49 = vpop.f32.mrf.mxu1 }
 0xe34   :  { %v2527_v51 = vpop.eup %2526  ;;  %v1025_v35 = vadd.f32 %v2336_v54, %v1021_v49 }
 0xe35   :  { %1349 = vrot.lane.b32.xlu0 %v2527_v51, %s2759_s18 }
 0xe36   :  { %2528 = vtanh.f32 %v1025_v35  ;;  %v2338_v32 = vmul.f32 -1.442695, %v1025_v35 }
 0xe3b   :  { %v1023_v0 = vpop.f32.mrf.mxu1 }
 0xe3c   :  { %v2529_v62 = vpop.eup %2528 }
 0xe3d   :  { %1048 = vrot.lane.b32.xlu1 %v2529_v62, %s2759_s18 }
 0xe43   :  { %v1416_v63 = vpop.f32.mrf.mxu1 }
 0xe44   :  { %v3304_v7 = vadd.f32 %v2354_v39, %v1416_v63 }
 0xe46   :  { %2530 = vtanh.f32 %v3304_v7 }
 0xe4b   :  { %v1418_v41 = vpop.f32.mrf.mxu1 }
 0xe4c   :  { %v2531_v17 = vpop.eup %2530  ;;  %v1422_v21 = vadd.f32 %v2355_v11, %v1418_v41 }
 0xe4d   :  { %1467 = vrot.lane.b32.xlu1 %v2531_v17, %s2759_s18 }
 0xe4e   :  { %2532 = vtanh.f32 %v1422_v21  ;;  %v2365_v54 = vmul.f32 -1.442695, %v1422_v21 }
 0xe4f   :  { %2534 = vpow2.f32 %v2352_v22 }
 0xe50   :  { %2536 = vpow2.f32 %v2335_v57 }
 0xe54   :  { %v2533_v43 = vpop.eup %2532 }
 0xe55   :  { %1469 = vrot.lane.b32.xlu2 %v2533_v43, %s2759_s18  ;;  %v2535_v47 = vpop.eup %2534 }
 0xe56   :  { %v1309_v15 = vadd.f32 1.0, %v2535_v47  ;;  %v2537_v30 = vpop.eup %2536 }
 0xe57   :  { %v961_v60 = vadd.f32 1.0, %v2537_v30 }
 0xe58   :  { %2538 = vrcp.f32 %v1309_v15  ;;  %vm1316_vm2 = vweird.f32 %v1309_v15  ;;  %v1322_v42 = vand.u32 2147483648, %v1309_v15  ;;  %v1320_v20 = vand.u32 2147483647, %v1309_v15 }
 0xe59   :  { %2540 = vrcp.f32 %v961_v60  ;;  %v973_v17 = vand.u32 2147483648, %v961_v60  ;;  %vm967_vm0 = vweird.f32 %v961_v60  ;;  %v971_v35 = vand.u32 2147483647, %v961_v60 }
 0xe5a   :  { %2542 = vpow2.f32 %v2353_v19  ;;  %v1323_v49 = vor.u32 1.1754944e-38, %v1322_v42  ;;  %vm1321_vm5 = vcmp.eq.f32.partialorder %v1320_v20, 8.507059e+37  ;;  %v2364_v19 = vmul.f32 -1.442695, %v3304_v7 }
 0xe5b   :  { %2544 = vpow2.f32 %v2338_v32  ;;  %v974_v57 = vor.u32 1.1754944e-38, %v973_v17 }
 0xe5c   :  { %2546 = vpow2.f32 %v2365_v54 }
 0xe5e   :  { %v2539_v37 = vpop.eup %2538 }
 0xe5f   :  { %v1312_v38 = vmul.f32 %v2539_v37, %v1309_v15  ;;  %v2541_v24 = vpop.eup %2540  ;;  %vm1317_vm3 = vweird.f32 %v2539_v37 }
 0xe60   :  { %v963_v50 = vmul.f32 %v2541_v24, %v961_v60  ;;  %vm1318_vm4 = vmor %vm1316_vm2, %vm1317_vm3  ;;  %v2543_v51 = vpop.eup %2542  ;;  %vm968_vm13 = vweird.f32 %v2541_v24  ;;  %vm972_vm2 = vcmp.eq.f32.partialorder %v971_v35, 8.507059e+37 }
 0xe61   :  { %v1313_v16 = vsub.f32 1.0, %v1312_v38  ;;  %v1310_v48 = vadd.f32 1.0, %v2543_v51  ;;  %v2545_v21 = vpop.eup %2544  ;;  %vm969_vm1 = vmor %vm967_vm0, %vm968_vm13 }
 0xe62   :  { %v964_v45 = vsub.f32 1.0, %v963_v50  ;;  %v2547_v43 = vpop.eup %2546  ;;  %v1029_v47 = vadd.f32 1.0, %v2545_v21 }
 0xe63   :  { %v1314_v4 = vmul.f32 %v2539_v37, %v1313_v16  ;;  %2548 = vrcp.f32 %v1310_v48  ;;  %v1430_v15 = vadd.f32 1.0, %v2547_v43  ;;  %vm1331_vm3 = vweird.f32 %v1310_v48 }
 0xe64   :  { %v965_v62 = vmul.f32 %v2541_v24, %v964_v45  ;;  %2550 = vrcp.f32 %v1029_v47  ;;  %v1337_v54 = vand.u32 2147483648, %v1310_v48  ;;  %v1335_v51 = vand.u32 2147483647, %v1310_v48 }
 0xe65   :  { %v1315_v44 = vadd.f32 %v2539_v37, %v1314_v4  ;;  %2552 = vrcp.f32 %v1430_v15 }
 0xe66   :  { %v966_v41 = vadd.f32 %v2541_v24, %v965_v62  ;;  %2554 = vpow2.f32 %v2364_v19  ;;  %v1338_v62 = vor.u32 1.1754944e-38, %v1337_v54  ;;  %vm1336_vm13 = vcmp.eq.f32.partialorder %v1335_v51, 8.507059e+37 }
 0xe67   :  { %v1319_v0 = vsel %vm1318_vm4, %v2539_v37, %v1315_v44 }
 0xe68   :  { %v3312_v39 = vsel %vm1321_vm5, %v1323_v49, %v1319_v0  ;;  %v970_v22 = vsel %vm969_vm1, %v2541_v24, %v966_v41 }
 0xe69   :  { %v3316_v30 = vsel %vm972_vm2, %v974_v57, %v970_v22  ;;  %v2549_v16 = vpop.eup %2548  ;;  %vm1035_vm2 = vweird.f32 %v1029_v47 }
 0xe6a   :  { %v1327_v60 = vmul.f32 %v2549_v16, %v1310_v48  ;;  %v2551_v4 = vpop.eup %2550  ;;  %vm1332_vm4 = vweird.f32 %v2549_v16  ;;  %v1041_v48 = vand.u32 2147483648, %v1029_v47 }
 0xe6b   :  { %v2553_v50 = vpop.eup %2552  ;;  %v1031_v20 = vmul.f32 %v2551_v4, %v1029_v47  ;;  %vm1333_vm5 = vmor %vm1331_vm3, %vm1332_vm4  ;;  %vm1036_vm0 = vweird.f32 %v2551_v4  ;;  %vm1451_vm4 = vweird.f32 %v1430_v15 }
 0xe6c   :  { %v1328_v24 = vsub.f32 1.0, %v1327_v60  ;;  %v2555_v42 = vpop.eup %2554  ;;  %v1447_v45 = vmul.f32 %v2553_v50, %v1430_v15  ;;  %vm1452_vm1 = vweird.f32 %v2553_v50  ;;  %vm1037_vm3 = vmor %vm1035_vm2, %vm1036_vm0 }
 0xe6d   :  { %v1429_v32 = vadd.f32 1.0, %v2555_v42  ;;  %v1032_v0 = vsub.f32 1.0, %v1031_v20  ;;  %v1042_v42 = vor.u32 1.1754944e-38, %v1041_v48 }
 0xe6e   :  { %v1329_v44 = vmul.f32 %v2549_v16, %v1328_v24  ;;  %v1448_v7 = vsub.f32 1.0, %v1447_v45 }
 0xe6f   :  { %2556 = vrcp.f32 %v1429_v32 }
 0xe70   :  { %v1330_v49 = vadd.f32 %v2549_v16, %v1329_v44  ;;  %v1449_v41 = vmul.f32 %v2553_v50, %v1448_v7  ;;  %v1440_v7 = vand.u32 2147483647, %v1429_v32 }
 0xe72   :  { %v1450_v22 = vadd.f32 %v2553_v50, %v1449_v41 }
 0xe75   :  { %v2557_v57 = vpop.eup %2556 }
 0xe76   :  { %v1432_v24 = vmul.f32 %v2557_v57, %v1429_v32  ;;  %vm1437_vm0 = vweird.f32 %v2557_v57 }
 0xe87   :  { %v1348_v63 = vpop.permute.xlu2 %1347 }
 0xe88   :  { %v1353_v11 = vmul.f32 %v1348_v63, %v3312_v39  ;;  %v1334_v63 = vsel %vm1333_vm5, %v2549_v16, %v1330_v49  ;;  %v1455_v16 = vand.u32 2147483647, %v1430_v15  ;;  %vm1453_vm5 = vmor %vm1451_vm4, %vm1452_vm1  ;;  %vm1436_vm1 = vweird.f32 %v1429_v32 }
 0xe89   :  { %v3321_v17 = vsel %vm1336_vm13, %v1338_v62, %v1334_v63  ;;  %v1454_v60 = vsel %vm1453_vm5, %v2553_v50, %v1450_v22  ;;  %v1442_v50 = vand.u32 2147483648, %v1429_v32  ;;  %vm1438_vm2 = vmor %vm1436_vm1, %vm1437_vm0  ;;  %v3346_v32 = vsel %vm4071_vm9, %v3212_v13, %v3209_v9 }
 0xe8a   :  { %1357 = vrot.lane.b32.xlu2 %v1353_v11, %s2760_s0  ;;  %v1033_v11 = vmul.f32 %v2551_v4, %v1032_v0  ;;  %vm1456_vm11 = vcmp.eq.f32.partialorder %v1455_v16, 8.507059e+37  ;;  %v1433_v0 = vsub.f32 1.0, %v1432_v24 }
 0xe8b   :  { %v1443_v63 = vor.u32 1.1754944e-38, %v1442_v50 }
 0xe8c   :  { %v1034_v43 = vadd.f32 %v2551_v4, %v1033_v11 }
 0xe8e   :  { %v1038_v19 = vsel %vm1037_vm3, %v2551_v4, %v1034_v43 }
 0xe8f   :  { %v981_v37 = vpop.permute.xlu0 %980 }
 0xe90   :  { %v983_v38 = vmul.f32 %v981_v37, %v3316_v30  ;;  %v1457_v37 = vand.u32 2147483648, %v1430_v15  ;;  %v1434_v15 = vmul.f32 %v2557_v57, %v1433_v0 }
 0xe92   :  { %985 = vrot.lane.b32.xlu0 %v983_v38, %s2760_s0  ;;  %v1039_v38 = vand.u32 2147483647, %v1029_v47  ;;  %v1458_v44 = vor.u32 1.1754944e-38, %v1457_v37  ;;  %v1435_v4 = vadd.f32 %v2557_v57, %v1434_v15 }
 0xe94   :  { %vm1040_vm13 = vcmp.eq.f32.partialorder %v1039_v38, 8.507059e+37  ;;  %v3327_v54 = vsel %vm1456_vm11, %v1458_v44, %v1454_v60  ;;  %v1439_v62 = vsel %vm1438_vm2, %v2557_v57, %v1435_v4  ;;  %vm1441_vm11 = vcmp.eq.f32.partialorder %v1440_v7, 8.507059e+37  ;;  %v3385_v7 = vld [vmem:[%s4055_s5 + $0x8] sm:$0xf] }
 0xe95   :  { %v3325_v45 = vsel %vm1040_vm13, %v1042_v42, %v1038_v19  ;;  %v3333_v41 = vsel %vm1441_vm11, %v1443_v63, %v1439_v62  ;;  %v978_v57 = vmul.f32 %v3316_v30, %v3346_v32  ;;  %v1464_v16 = vmul.f32 0.0, %v3327_v54  ;;  %v3359_v42 = vld [vmem:[%s4055_s5] sm:$0xff] }
 0xe96   :  { %vm1225_vm3 = vcmp.gt.s32.totalorder %v3359_v42, 0  ;;  %vm1261_vm4 = vcmp.gt.s32.totalorder %v3359_v42, 3  ;;  %v1344_v44 = vmul.f32 0.0, %v3321_v17  ;;  %vm1262_vm5 = vcmp.gt.s32.totalorder %v3385_v7, 3 }
 0xe97   :  { %v1227_v9 = vsel %vm1225_vm3, 1, %v4065_v2  ;;  %v1463_v62 = vmul.f32 0.0, %v3333_v41  ;;  %vm1226_vm13 = vcmp.gt.s32.totalorder %v3385_v7, 0 }
 0xea7   :  { %v1350_v35 = vpop.permute.xlu0 %1349 }
 0xea8   :  { %v1354_v21 = vmul.f32 %v1350_v35, %v3321_v17 }
 0xeaa   :  { %1359 = vrot.lane.b32.xlu0 %v1354_v21, %s2760_s0  ;;  %v1343_v21 = vmul.f32 0.0, %v3312_v39 }
 0xeaf   :  { %v1049_v20 = vpop.permute.xlu1 %1048  ;;  %v1470_v49 = vpop.permute.xlu2 %1469 }
 0xeb0   :  { %v1051_v51 = vmul.f32 %v1049_v20, %v3325_v45  ;;  %v1474_v47 = vmul.f32 %v1470_v49, %v3327_v54  ;;  %v1263_v20 = vsel %vm1261_vm4, 1, %v4065_v2 }
 0xeb2   :  { %1053 = vrot.lane.b32.xlu1 %v1051_v51, %s2760_s0  ;;  %1479 = vrot.lane.b32.xlu2 %v1474_v47, %s2760_s0  ;;  %v3376_v47 = vsel %vm68_vm6, %v3223_v46, %v3220_v18  ;;  %v1264_v18 = vsel %vm1262_vm5, 1, %v4065_v2 }
 0xeb3   :  { %v1046_v0 = vmul.f32 %v3325_v45, %v3376_v47 }
 0xebf   :  { %v1468_v11 = vpop.permute.xlu1 %1467 }
 0xec0   :  { %v1473_v35 = vmul.f32 %v1468_v11, %v3333_v41 }
 0xec2   :  { %1477 = vrot.lane.b32.xlu1 %v1473_v35, %s2760_s0 }
 0xee4   :  { %v1358_v43 = vpop.permute.xlu2 %1357 }
 0xee5   :  { %v3338_v22 = vadd.f32 %v1358_v43, %v1343_v21  ;;  %v1228_v21 = vsel %vm1226_vm13, 1, %v4065_v2 }
 0xee7   :  { %2558 = vtanh.f32 %v3338_v22 }
 0xeed   :  { %v2559_v48 = vpop.eup %2558 }
 0xeee   :  { %1369 = vrot.lane.b32.xlu2 %v2559_v48, %s2759_s18 }
 0xf04   :  { %v986_v37 = vpop.permute.xlu0 %985 }
 0xf05   :  { %v3350_v38 = vadd.f32 %v986_v37, %v978_v57 }
 0xf07   :  { %2560 = vtanh.f32 %v3350_v38 }
 0xf0c   :  { %v1480_v19 = vpop.permute.xlu2 %1479 }
 0xf0d   :  { %v2561_v60 = vpop.eup %2560  ;;  %v3354_v24 = vadd.f32 %v1480_v19, %v1464_v16 }
 0xf0e   :  { %991 = vrot.lane.b32.xlu0 %v2561_v60, %s2759_s18 }
 0xf0f   :  { %2562 = vtanh.f32 %v3354_v24 }
 0xf15   :  { %v2563_v13 = vpop.eup %2562 }
 0xf16   :  { %1491 = vrot.lane.b32.xlu2 %v2563_v13, %s2759_s18  ;;  %1230 = vperm.xlu0 %2423, %v1227_v9  }
 0xf1c   :  { %v1360_v49 = vpop.permute.xlu0 %1359 }
 0xf1d   :  { %v3369_v51 = vadd.f32 %v1360_v49, %v1344_v44 }
 0xf1e   :  { %1266 = vperm.xlu2 %2425, %v1263_v20  }
 0xf1f   :  { %2564 = vtanh.f32 %v3369_v51 }
 0xf24   :  { %v1054_v15 = vpop.permute.xlu1 %1053 }
 0xf25   :  { %v2565_v4 = vpop.eup %2564  ;;  %v3380_v50 = vadd.f32 %v1054_v15, %v1046_v0 }
 0xf26   :  { %1371 = vrot.lane.b32.xlu0 %v2565_v4, %s2759_s18 }
 0xf27   :  { %2566 = vtanh.f32 %v3380_v50 }
 0xf2d   :  { %v2567_v46 = vpop.eup %2566 }
 0xf2e   :  { %1059 = vrot.lane.b32.xlu1 %v2567_v46, %s2759_s18  ;;  %1269 = vperm.xlu0 %2423, %v1264_v18  }
 0xf34   :  { %v1478_v63 = vpop.permute.xlu1 %1477 }
 0xf35   :  { %v3393_v11 = vadd.f32 %v1478_v63, %v1463_v62 }
 0xf37   :  { %2568 = vtanh.f32 %v3393_v11 }
 0xf3d   :  { %v2569_v35 = vpop.eup %2568 }
 0xf3e   :  { %1489 = vrot.lane.b32.xlu1 %v2569_v35, %s2759_s18 }
 0xf46   :  { %1233 = vperm.xlu1 %2424, %v1228_v21  }
 0xf48   :  { %v1370_v19 = vpop.permute.xlu2 %1369 }
 0xf70   :  { %v1492_v44 = vpop.permute.xlu2 %1491 }
 0xf71   :  { %v1496_v0 = vmul.f32 %v1492_v44, %v3327_v54  ;;  %v1375_v54 = vmul.f32 %v1370_v19, %v3312_v39 }
 0xf78   :  { %v3427_v49 = vpop.permute.xlu2 %1266 }
 0xf79   :  { %4105 = vst [vmem:[#allocation16_spill] sm:$0xff] %v3427_v49  ;;  %vm4096_vm1 = vcmp.eq.s32.totalorder %v3427_v49, 1 }
 0xf80   :  { %v992_v43 = vpop.permute.xlu0 %991 }
 0xf81   :  { %v3400_v48 = vmul.f32 %v992_v43, %v3316_v30 }
 0xf83   :  { %v3406_v57 = vsel %vm92_vm8, %v3400_v48, %v3233_v25  ;;  %v995_v52 = vsel %vm92_vm8, %v3400_v48, 0.0 }
 0xf84   :  { %4100 = vst [vmem:[#allocation11_spill] sm:$0xff] %v3406_v57  ;;  %v1073_v37 = vpack.c.bf16 %v3406_v57, %v3406_v57 }
 0xf86   :  { %1075 = vrot.lane.b32.xlu1 %v1073_v37, %s2760_s0 }
 0xf88   :  { %v3411_v16 = vpop.permute.xlu0 %1230 }
 0xf89   :  { %4101 = vst [vmem:[#allocation12_spill] sm:$0xff] %v3411_v16  ;;  %vm4095_vm2 = vcmp.eq.s32.totalorder %v3411_v16, 1 }
 0xf8a   :  { %v3452_v62 = vsel %vm4095_vm2, %v1375_v54, 0.0  ;;  %v2369_v54 = vld [vmem:[%s4056_s6 + $0x18] sm:$0xf] }
 0xf8b   :  { %4109 = vst [vmem:[#allocation20_spill] sm:$0xff] %v3452_v62 }
 0xf98   :  { %v1372_v30 = vpop.permute.xlu0 %1371 }
 0xfa0   :  { %v1060_v60 = vpop.permute.xlu1 %1059  ;;  %v3425_v20 = vpop.permute.xlu0 %1269 }
 0xfa1   :  { %v3414_v9 = vmul.f32 %v1060_v60, %v3325_v45  ;;  %4104 = vst [vmem:[#allocation15_spill] sm:$0xff] %v3425_v20  ;;  %vm4089_vm0 = vcmp.eq.s32.totalorder %v3425_v20, 1 }
 0xfa3   :  { %4102 = vst [vmem:[#allocation13_spill] sm:$0xff] %v3414_v9  ;;  %v3420_v13 = vsel %vm4097_vm7, %v3414_v9, %v3244_v6  ;;  %v3435_v6 = vsel %vm4089_vm0, %v1496_v0, 0.0  ;;  %v2376_v0 = vld [vmem:[%s4057_s7 + $0x28] sm:$0xf] }
 0xfa4   :  { %4103 = vst [vmem:[#allocation14_spill] sm:$0xff] %v3420_v13  ;;  %v1139_v25 = vpack.c.bf16 %v3420_v13, %v3420_v13 }
 0xfa5   :  { %4106 = vst [vmem:[#allocation17_spill] sm:$0xff] %v3435_v6 }
 0xfa6   :  { %1141 = vrot.lane.b32.xlu2 %v1139_v25, %s2760_s0 }
 0xfb0   :  { %v1490_v45 = vpop.permute.xlu1 %1489 }
 0xfb1   :  { %v1495_v15 = vmul.f32 %v1490_v45, %v3333_v41  ;;  %v1376_v41 = vmul.f32 %v1372_v30, %v3321_v17 }
 0xfb3   :  { %v3439_v4 = vsel %vm4096_vm1, %v1495_v15, 0.0 }
 0xfb4   :  { %4107 = vst [vmem:[#allocation18_spill] sm:$0xff] %v3439_v4  ;;  %v1634_v18 = vpack.c.bf16 %v3435_v6, %v3439_v4 }
 0xfb6   :  { %1636 = vrot.lane.b32.xlu1 %v1634_v18, %s2760_s0 }
 0xfb8   :  { %v3447_v46 = vpop.permute.xlu1 %1233 }
 0xfb9   :  { %4108 = vst [vmem:[#allocation19_spill] sm:$0xff] %v3447_v46  ;;  %vm4093_vm11 = vcmp.eq.s32.totalorder %v3447_v46, 1 }
 0xfba   :  { %v3456_v63 = vsel %vm4093_vm11, %v1376_v41, 0.0 }
 0xfbb   :  { %4110 = vst [vmem:[#allocation21_spill] sm:$0xff] %v3456_v63  ;;  %v1517_v35 = vpack.c.bf16 %v3456_v63, %v3452_v62 }
 0xfbd   :  { %1519 = vrot.lane.b32.xlu0 %v1517_v35, %s2760_s0 }
 0xff8   :  { %v1076_v39 = vpop.permute.xlu1 %1075 }
 0xff9   :  { %2340 = vmatmul.msk.bf16.vlgmr.msrb.gmra.mxu2 %vm112_vm12, %v1076_v39 }
 0xffa   :  { %1996 = vmatpush.bf16.msrb.mxu2 %v3252_v55 }
 0xffe   :  { %1997 = vmatpush.bf16.msrb.mxu2 %v3258_v33  ;;  %v2375_v33 = vld [vmem:[%s4057_s7 + $0x20] sm:$0xff] }
0x1000   :  { %v1142_v17 = vpop.permute.xlu2 %1141 }
0x1001   :  { %2342 = vmatmul.msk.bf16.vlgmr.msrb.gmra.mxu3 %vm112_vm12, %v1142_v17 }
0x1002   :  { %2109 = vmatpush.bf16.msrb.mxu3 %v3267_v34 }
0x1006   :  { %2110 = vmatpush.bf16.msrb.mxu3 %v3274_v36  ;;  %v2368_v36 = vld [vmem:[%s4056_s6 + $0x10] sm:$0xff] }
0x1028   :  { %v1637_v21 = vpop.permute.xlu1 %1636 }
0x1029   :  { %2377 = vmatmul.msk.bf16.vlgmr.msra.gmra.mxu3 %vm112_vm12, %v1637_v21 }
0x102f   :  { %v1520_v43 = vpop.permute.xlu0 %1519 }
0x1030   :  { %2370 = vmatmul.msk.bf16.vlgmr.msra.gmra.mxu2 %vm112_vm12, %v1520_v43 }
0x107c   :  { %v3469_v37 = vpop.f32.mrf.mxu2 }
0x1084   :  { %v1091_v19 = vpop.f32.mrf.mxu2  ;;  %v3471_v60 = vpop.f32.mrf.mxu3 }
0x108c   :  { %v1157_v55 = vpop.f32.mrf.mxu3 }
0x10ac   :  { %v1650_v30 = vpop.f32.mrf.mxu3 }
0x10ad   :  { %v1655_v34 = vadd.f32 %v2375_v33, %v1650_v30 }
0x10af   :  { %2570 = vtanh.f32 %v1655_v34  ;;  %v2378_v30 = vmul.f32 -1.442695, %v1655_v34 }
0x10b3   :  { %v1533_v25 = vpop.f32.mrf.mxu2 }
0x10b4   :  { %v1538_v44 = vadd.f32 %v2368_v36, %v1533_v25  ;;  %v1652_v15 = vpop.f32.mrf.mxu3 }
0x10b5   :  { %v2571_v45 = vpop.eup %2570  ;;  %v1656_v18 = vadd.f32 %v2376_v0, %v1652_v15 }
0x10b6   :  { %2572 = vtanh.f32 %v1538_v44  ;;  %1701 = vrot.lane.b32.xlu1 %v2571_v45, %s2759_s18  ;;  %v2371_v43 = vmul.f32 -1.442695, %v1538_v44 }
0x10b7   :  { %2574 = vtanh.f32 %v1656_v18  ;;  %v2379_v19 = vmul.f32 -1.442695, %v1656_v18 }
0x10bb   :  { %v1535_v41 = vpop.f32.mrf.mxu2 }
0x10bc   :  { %v2573_v35 = vpop.eup %2572  ;;  %v1539_v39 = vadd.f32 %v2369_v54, %v1535_v41 }
0x10bd   :  { %1584 = vrot.lane.b32.xlu2 %v2573_v35, %s2759_s18  ;;  %v2575_v17 = vpop.eup %2574 }
0x10be   :  { %2576 = vtanh.f32 %v1539_v39 }
0x10bf   :  { %2578 = vpow2.f32 %v2371_v43 }
0x10c0   :  { %2580 = vpow2.f32 %v2379_v19 }
0x10c4   :  { %v2577_v21 = vpop.eup %2576 }
0x10c5   :  { %1703 = vrot.lane.b32.xlu2 %v2575_v17, %s2759_s18  ;;  %1586 = vrot.lane.b32.xlu0 %v2577_v21, %s2759_s18  ;;  %v2579_v55 = vpop.eup %2578  ;;  %v2372_v17 = vmul.f32 -1.442695, %v1539_v39 }
0x10c6   :  { %v1546_v33 = vadd.f32 1.0, %v2579_v55  ;;  %v2581_v36 = vpop.eup %2580 }
0x10c7   :  { %v1664_v25 = vadd.f32 1.0, %v2581_v36 }
0x10c8   :  { %2582 = vrcp.f32 %v1546_v33  ;;  %v1559_v34 = vand.u32 2147483648, %v1546_v33  ;;  %vm1553_vm4 = vweird.f32 %v1546_v33  ;;  %v1557_v55 = vand.u32 2147483647, %v1546_v33 }
0x10c9   :  { %2584 = vpow2.f32 %v2378_v30  ;;  %vm1685_vm9 = vweird.f32 %v1664_v25 }
0x10ca   :  { %2586 = vrcp.f32 %v1664_v25  ;;  %v1560_v13 = vor.u32 1.1754944e-38, %v1559_v34  ;;  %vm1558_vm13 = vcmp.eq.f32.partialorder %v1557_v55, 8.507059e+37 }
0x10ce   :  { %v2583_v45 = vpop.eup %2582 }
0x10cf   :  { %v1549_v0 = vmul.f32 %v2583_v45, %v1546_v33  ;;  %v2585_v15 = vpop.eup %2584  ;;  %vm1554_vm3 = vweird.f32 %v2583_v45  ;;  %v1689_v33 = vand.u32 2147483647, %v1664_v25 }
0x10d0   :  { %v1663_v54 = vadd.f32 1.0, %v2585_v15  ;;  %v2587_v35 = vpop.eup %2586  ;;  %vm1555_vm5 = vmor %vm1553_vm4, %vm1554_vm3 }
0x10d1   :  { %v1550_v41 = vsub.f32 1.0, %v1549_v0  ;;  %v1681_v21 = vmul.f32 %v2587_v35, %v1664_v25  ;;  %vm1686_vm10 = vweird.f32 %v2587_v35  ;;  %vm1690_vm4 = vcmp.eq.f32.partialorder %v1689_v33, 8.507059e+37 }
0x10d2   :  { %2588 = vrcp.f32 %v1663_v54  ;;  %vm1687_vm3 = vmor %vm1685_vm9, %vm1686_vm10  ;;  %vm1237_vm9 = vcmp.gt.s32.totalorder %v3359_v42, 1 }
0x10d3   :  { %v1551_v44 = vmul.f32 %v2583_v45, %v1550_v41  ;;  %2590 = vpow2.f32 %v2372_v17  ;;  %v1682_v43 = vsub.f32 1.0, %v1681_v21 }
0x10d5   :  { %v1552_v18 = vadd.f32 %v2583_v45, %v1551_v44  ;;  %v1683_v2 = vmul.f32 %v2587_v35, %v1682_v43  ;;  %v1691_v44 = vand.u32 2147483648, %v1664_v25 }
0x10d7   :  { %v1556_v36 = vsel %vm1555_vm5, %v2583_v45, %v1552_v18  ;;  %v1684_v17 = vadd.f32 %v2587_v35, %v1683_v2  ;;  %v1692_v18 = vor.u32 1.1754944e-38, %v1691_v44 }
0x10d8   :  { %v2589_v19 = vpop.eup %2588  ;;  %v3489_v61 = vsel %vm1558_vm13, %v1560_v13, %v1556_v36  ;;  %v1676_v36 = vand.u32 2147483648, %v1663_v54  ;;  %vm1670_vm13 = vweird.f32 %v1663_v54 }
0x10d9   :  { %v2591_v30 = vpop.eup %2590  ;;  %v1666_v15 = vmul.f32 %v2589_v19, %v1663_v54  ;;  %v1688_v45 = vsel %vm1687_vm3, %v2587_v35, %v1684_v17  ;;  %vm1671_vm5 = vweird.f32 %v2589_v19 }
0x10da   :  { %v1547_v0 = vadd.f32 1.0, %v2591_v30  ;;  %v3493_v34 = vsel %vm1690_vm4, %v1692_v18, %v1688_v45  ;;  %vm1672_vm15 = vmor %vm1670_vm13, %vm1671_vm5  ;;  %v1677_v35 = vor.u32 1.1754944e-38, %v1676_v36  ;;  %v4111_v45 = vmov 0  }
0x10db   :  { %v1667_v21 = vsub.f32 1.0, %v1666_v15  ;;  %v1674_v15 = vand.u32 2147483647, %v1663_v54  ;;  %v1239_v18 = vsel %vm1237_vm9, 1, %v4111_v45  ;;  %vm1238_vm13 = vcmp.gt.s32.totalorder %v3385_v7, 1 }
0x10dc   :  { %2592 = vrcp.f32 %v1547_v0  ;;  %v1574_v54 = vand.u32 2147483648, %v1547_v0  ;;  %vm1568_vm4 = vweird.f32 %v1547_v0  ;;  %vm1250_vm9 = vcmp.gt.s32.totalorder %v3385_v7, 2 }
0x10dd   :  { %v1668_v43 = vmul.f32 %v2589_v19, %v1667_v21  ;;  %vm1675_vm10 = vcmp.eq.f32.partialorder %v1674_v15, 8.507059e+37 }
0x10df   :  { %v1669_v2 = vadd.f32 %v2589_v19, %v1668_v43 }
0x10e2   :  { %v2593_v30 = vpop.eup %2592 }
0x10e3   :  { %v1564_v25 = vmul.f32 %v2593_v30, %v1547_v0  ;;  %vm1569_vm3 = vweird.f32 %v2593_v30 }
0x10e5   :  { %v1565_v44 = vsub.f32 1.0, %v1564_v25  ;;  %v3507_v25 = vsel %vm4096_vm1, %v3393_v11, 0.0 }
0x10e7   :  { %v1566_v33 = vmul.f32 %v2593_v30, %v1565_v44 }
0x10e9   :  { %v1567_v43 = vadd.f32 %v2593_v30, %v1566_v33  ;;  %v3529_v33 = vsel %vm4089_vm0, %v3354_v24, 0.0 }
0x1117   :  { %v1585_v39 = vpop.permute.xlu2 %1584 }
0x1118   :  { %v1590_v41 = vmul.f32 %v1585_v39, %v3489_v61  ;;  %v1673_v39 = vsel %vm1672_vm15, %v2589_v19, %v1669_v2  ;;  %v1572_v19 = vand.u32 2147483647, %v1547_v0  ;;  %vm1570_vm15 = vmor %vm1568_vm4, %vm1569_vm3 }
0x1119   :  { %v3497_v17 = vsel %vm1675_vm10, %v1677_v35, %v1673_v39  ;;  %vm1249_vm10 = vcmp.gt.s32.totalorder %v3359_v42, 2  ;;  %v1252_v42 = vsel %vm1250_vm9, 1, %v4111_v45 }
0x111a   :  { %1594 = vrot.lane.b32.xlu0 %v1590_v41, %s2760_s0  ;;  %vm1573_vm5 = vcmp.eq.f32.partialorder %v1572_v19, 8.507059e+37  ;;  %v1697_v39 = vmul.f32 %v3497_v17, %v3507_v25  ;;  %v1251_v24 = vsel %vm1249_vm10, 1, %v4111_v45 }
0x111f   :  { %v1704_v13 = vpop.permute.xlu2 %1703 }
0x1120   :  { %v1708_v55 = vmul.f32 %v1704_v13, %v3493_v34  ;;  %v1571_v13 = vsel %vm1570_vm15, %v2593_v30, %v1567_v43  ;;  %v3517_v30 = vsel %vm4095_vm2, %v3338_v22, 0.0  ;;  %v1698_v22 = vmul.f32 %v3493_v34, %v3529_v33 }
0x1121   :  { %v1240_v43 = vsel %vm1238_vm13, 1, %v4111_v45 }
0x1122   :  { %1713 = vrot.lane.b32.xlu0 %v1708_v55, %s2760_s0  ;;  %v1575_v55 = vor.u32 1.1754944e-38, %v1574_v54 }
0x1124   :  { %v1576_v36 = vsel %vm1573_vm5, %v1575_v55, %v1571_v13  ;;  %v3544_v55 = vsel %vm4093_vm11, %v3369_v51, 0.0 }
0x1128   :  { %v1702_v41 = vpop.permute.xlu1 %1701 }
0x1129   :  { %v1707_v21 = vmul.f32 %v1702_v41, %v3497_v17  ;;  %v1580_v41 = vmul.f32 %v3489_v61, %v3517_v30 }
0x112b   :  { %1711 = vrot.lane.b32.xlu2 %v1707_v21, %s2760_s0 }
0x1133   :  { %1242 = vperm.xlu2 %2425, %v1239_v18  }
0x1137   :  { %v1587_v2 = vpop.permute.xlu0 %1586 }
0x1138   :  { %v1591_v15 = vmul.f32 %v1587_v2, %v1576_v36  ;;  %v1581_v2 = vmul.f32 %v1576_v36, %v3544_v55 }
0x113a   :  { %1596 = vrot.lane.b32.xlu1 %v1591_v15, %s2760_s0 }
0x1185   :  { %v1712_v35 = vpop.permute.xlu2 %1711 }
0x1186   :  { %v3511_v0 = vadd.f32 %v1712_v35, %v1697_v39 }
0x1188   :  { %2594 = vtanh.f32 %v3511_v0 }
0x118c   :  { %v1595_v44 = vpop.permute.xlu0 %1594 }
0x118d   :  { %v3521_v21 = vadd.f32 %v1595_v44, %v1580_v41  ;;  %v3553_v44 = vpop.permute.xlu2 %1242 }
0x118e   :  { %v2595_v11 = vpop.eup %2594  ;;  %vm1247_vm3 = vcmp.eq.s32.totalorder %v3553_v44, 1 }
0x118f   :  { %2596 = vtanh.f32 %v3521_v21  ;;  %1723 = vrot.lane.b32.xlu0 %v2595_v11, %s2759_s18 }
0x1194   :  { %v1714_v18 = vpop.permute.xlu0 %1713 }
0x1195   :  { %v2597_v54 = vpop.eup %2596  ;;  %v3534_v19 = vadd.f32 %v1714_v18, %v1698_v22 }
0x1196   :  { %1606 = vrot.lane.b32.xlu1 %v2597_v54, %s2759_s18 }
0x1197   :  { %2598 = vtanh.f32 %v3534_v19  ;;  %1245 = vperm.xlu0 %2423, %v1240_v43  }
0x119d   :  { %v2599_v13 = vpop.eup %2598 }
0x119e   :  { %1725 = vrot.lane.b32.xlu1 %v2599_v13, %s2759_s18 }
0x11a6   :  { %1254 = vperm.xlu1 %2424, %v1251_v24  }
0x11ac   :  { %v1597_v15 = vpop.permute.xlu1 %1596 }
0x11ad   :  { %v3547_v39 = vadd.f32 %v1597_v15, %v1581_v2 }
0x11af   :  { %2600 = vtanh.f32 %v3547_v39 }
0x11b5   :  { %v2601_v35 = vpop.eup %2600 }
0x11b6   :  { %1608 = vrot.lane.b32.xlu2 %v2601_v35, %s2759_s18 }
0x11be   :  { %1257 = vperm.xlu2 %2425, %v1252_v42  }
0x1201   :  { %v1724_v41 = vpop.permute.xlu0 %1723 }
0x1208   :  { %v1607_v51 = vpop.permute.xlu1 %1606 }
0x1209   :  { %v3556_v11 = vmul.f32 %v1607_v51, %v3489_v61  ;;  %v3558_v22 = vpop.permute.xlu0 %1245 }
0x120a   :  { %vm1248_vm4 = vcmp.eq.s32.totalorder %v3558_v22, 1 }
0x120b   :  { %4112 = vst [vmem:[#allocation22_spill] sm:$0xff] %v3556_v11  ;;  %v3568_v7 = vsel %vm1247_vm3, %v3556_v11, %v3452_v62 }
0x1210   :  { %v1726_v18 = vpop.permute.xlu1 %1725  ;;  %v1609_v43 = vpop.permute.xlu2 %1608 }
0x1211   :  { %v3560_v54 = vmul.f32 %v1609_v43, %v1576_v36  ;;  %v3580_v36 = vmul.f32 %v1724_v41, %v3497_v17  ;;  %v3583_v13 = vmul.f32 %v1726_v18, %v3493_v34  ;;  %v2382_v41 = vld [vmem:[%s4056_s6 + $0x20] sm:$0xff]  ;;  %v2389_v43 = vld [vmem:[%s4057_s7 + $0x10] sm:$0xff] }
0x1213   :  { %4113 = vst [vmem:[#allocation23_spill] sm:$0xff] %v3560_v54  ;;  %v3574_v61 = vsel %vm1248_vm4, %v3560_v54, %v3456_v63 }
0x1214   :  { %v1751_v45 = vpack.c.bf16 %v3574_v61, %v3568_v7  ;;  %4114 = vst [vmem:[#allocation24_spill] sm:$0xff] %v3580_v36 }
0x1215   :  { %4115 = vst [vmem:[#allocation25_spill] sm:$0xff] %v3583_v13 }
0x1216   :  { %1753 = vrot.lane.b32.xlu0 %v1751_v45, %s2760_s0  ;;  %v2383_v45 = vld [vmem:[%s4056_s6 + $0x28] sm:$0xf] }
0x1218   :  { %v3585_v24 = vpop.permute.xlu1 %1254  ;;  %v3587_v2 = vpop.permute.xlu2 %1257 }
0x1219   :  { %vm1259_vm15 = vcmp.eq.s32.totalorder %v3585_v24, 1  ;;  %vm1260_vm5 = vcmp.eq.s32.totalorder %v3587_v2, 1 }
0x121a   :  { %v3595_v15 = vsel %vm1259_vm15, %v3580_v36, %v3439_v4  ;;  %v3601_v34 = vsel %vm1260_vm5, %v3583_v13, %v3435_v6 }
0x121b   :  { %v1867_v17 = vpack.c.bf16 %v3601_v34, %v3595_v15 }
0x121d   :  { %1869 = vrot.lane.b32.xlu1 %v1867_v17, %s2760_s0 }
0x1288   :  { %v1754_v35 = vpop.permute.xlu0 %1753 }
0x1289   :  { %2384 = vmatmul.msk.bf16.vlgmr.msrb.gmra.mxu0 %vm112_vm12, %v1754_v35 }
0x128f   :  { %v1870_v42 = vpop.permute.xlu1 %1869 }
0x1290   :  { %2391 = vmatmul.msk.bf16.vlgmr.msrb.gmra.mxu1 %vm112_vm12, %v1870_v42 }
0x1306   :  { %v1767_v51 = vpop.f32.mrf.mxu0 }
0x1307   :  { %v1772_v18 = vadd.f32 %v2382_v41, %v1767_v51  ;;  %v2390_v41 = vld [vmem:[%s4057_s7 + $0x18] sm:$0xf] }
0x1309   :  { %2602 = vtanh.f32 %v1772_v18 }
0x130d   :  { %v1883_v17 = vpop.f32.mrf.mxu1 }
0x130e   :  { %v1888_v35 = vadd.f32 %v2389_v43, %v1883_v17  ;;  %v1769_v20 = vpop.f32.mrf.mxu0 }
0x130f   :  { %v2603_v46 = vpop.eup %2602  ;;  %v1773_v42 = vadd.f32 %v2383_v45, %v1769_v20  ;;  %v2385_v20 = vmul.f32 -1.442695, %v1772_v18 }
0x1310   :  { %2604 = vtanh.f32 %v1888_v35  ;;  %1818 = vrot.lane.b32.xlu2 %v2603_v46, %s2759_s18  ;;  %v2392_v4 = vmul.f32 -1.442695, %v1888_v35 }
0x1311   :  { %2606 = vtanh.f32 %v1773_v42 }
0x1315   :  { %v1885_v51 = vpop.f32.mrf.mxu1 }
0x1316   :  { %v2605_v16 = vpop.eup %2604  ;;  %v1889_v49 = vadd.f32 %v2390_v41, %v1885_v51 }
0x1317   :  { %v2607_v36 = vpop.eup %2606  ;;  %1934 = vrot.lane.b32.xlu1 %v2605_v16, %s2759_s18  ;;  %v2386_v16 = vmul.f32 -1.442695, %v1773_v42 }
0x1318   :  { %2608 = vtanh.f32 %v1889_v49  ;;  %1820 = vrot.lane.b32.xlu0 %v2607_v36, %s2759_s18  ;;  %v2393_v17 = vmul.f32 -1.442695, %v1889_v49 }
0x1319   :  { %2610 = vpow2.f32 %v2385_v20 }
0x131e   :  { %v2609_v43 = vpop.eup %2608 }
0x131f   :  { %1936 = vrot.lane.b32.xlu2 %v2609_v43, %s2759_s18  ;;  %v2611_v46 = vpop.eup %2610 }
0x1320   :  { %v1780_v45 = vadd.f32 1.0, %v2611_v46 }
0x1322   :  { %2612 = vrcp.f32 %v1780_v45  ;;  %v1793_v18 = vand.u32 2147483648, %v1780_v45  ;;  %vm1787_vm10 = vweird.f32 %v1780_v45  ;;  %v1791_v20 = vand.u32 2147483647, %v1780_v45 }
0x1323   :  { %2614 = vpow2.f32 %v2393_v17 }
0x1324   :  { %v1794_v57 = vor.u32 1.1754944e-38, %v1793_v18  ;;  %vm1792_vm0 = vcmp.eq.f32.partialorder %v1791_v20, 8.507059e+37 }
0x1328   :  { %v2613_v13 = vpop.eup %2612 }
0x1329   :  { %v2615_v54 = vpop.eup %2614  ;;  %v1783_v11 = vmul.f32 %v2613_v13, %v1780_v45  ;;  %vm1788_vm13 = vweird.f32 %v2613_v13 }
0x132a   :  { %v1897_v41 = vadd.f32 1.0, %v2615_v54  ;;  %vm1789_vm9 = vmor %vm1787_vm10, %vm1788_vm13 }
0x132b   :  { %v1784_v51 = vsub.f32 1.0, %v1783_v11 }
0x132c   :  { %2616 = vrcp.f32 %v1897_v41  ;;  %v1924_v62 = vand.u32 2147483648, %v1897_v41  ;;  %vm1918_vm10 = vweird.f32 %v1897_v41 }
0x132d   :  { %v1785_v63 = vmul.f32 %v2613_v13, %v1784_v51  ;;  %2618 = vpow2.f32 %v2392_v4 }
0x132e   :  { %2620 = vpow2.f32 %v2386_v16 }
0x132f   :  { %v1786_v43 = vadd.f32 %v2613_v13, %v1785_v63 }
0x1331   :  { %v1790_v6 = vsel %vm1789_vm9, %v2613_v13, %v1786_v43  ;;  %v1922_v43 = vand.u32 2147483647, %v1897_v41 }
0x1332   :  { %v2617_v36 = vpop.eup %2616  ;;  %v3624_v35 = vsel %vm1792_vm0, %v1794_v57, %v1790_v6  ;;  %v1925_v6 = vor.u32 1.1754944e-38, %v1924_v62 }
0x1333   :  { %v2619_v49 = vpop.eup %2618  ;;  %v1914_v46 = vmul.f32 %v2617_v36, %v1897_v41  ;;  %vm1919_vm13 = vweird.f32 %v2617_v36  ;;  %vm1923_vm0 = vcmp.eq.f32.partialorder %v1922_v43, 8.507059e+37 }
0x1334   :  { %v2621_v17 = vpop.eup %2620  ;;  %v1896_v54 = vadd.f32 1.0, %v2619_v49  ;;  %vm1920_vm9 = vmor %vm1918_vm10, %vm1919_vm13 }
0x1335   :  { %v1781_v11 = vadd.f32 1.0, %v2621_v17  ;;  %v1915_v4 = vsub.f32 1.0, %v1914_v46 }
0x1336   :  { %2622 = vrcp.f32 %v1896_v54  ;;  %v1909_v41 = vand.u32 2147483648, %v1896_v54  ;;  %vm1903_vm10 = vweird.f32 %v1896_v54  ;;  %v1907_v62 = vand.u32 2147483647, %v1896_v54 }
0x1337   :  { %2624 = vrcp.f32 %v1781_v11  ;;  %v1916_v63 = vmul.f32 %v2617_v36, %v1915_v4 }
0x1338   :  { %vm1908_vm1 = vcmp.eq.f32.partialorder %v1907_v62, 8.507059e+37 }
0x1339   :  { %v1917_v45 = vadd.f32 %v2617_v36, %v1916_v63 }
0x133b   :  { %v1921_v18 = vsel %vm1920_vm9, %v2617_v36, %v1917_v45  ;;  %v1808_v36 = vand.u32 2147483648, %v1781_v11  ;;  %v1806_v45 = vand.u32 2147483647, %v1781_v11 }
0x133c   :  { %v2623_v16 = vpop.eup %2622  ;;  %v3628_v49 = vsel %vm1923_vm0, %v1925_v6, %v1921_v18  ;;  %vm1802_vm0 = vweird.f32 %v1781_v11  ;;  %v1910_v18 = vor.u32 1.1754944e-38, %v1909_v41 }
0x133d   :  { %v2625_v13 = vpop.eup %2624  ;;  %v1899_v57 = vmul.f32 %v2623_v16, %v1896_v54  ;;  %vm1904_vm11 = vweird.f32 %v2623_v16  ;;  %v1809_v6 = vor.u32 1.1754944e-38, %v1808_v36  ;;  %vm1807_vm7 = vcmp.eq.f32.partialorder %v1806_v45, 8.507059e+37  ;;  %v2339_v45 = vld [vmem:[%s4051_s1 + $0xe] sm:$0x3]  ;;  %s2765_s1 = smov 128  }
0x133e   :  { %v1798_v20 = vmul.f32 %v2625_v13, %v1781_v11  ;;  %vm1803_vm13 = vweird.f32 %v2625_v13  ;;  %vm1905_vm9 = vmor %vm1903_vm10, %vm1904_vm11  ;;  %vm4116_vm10 = vcmp.eq.s32.totalorder %v2969_v8, 1 }
0x133f   :  { %vm1804_vm2 = vmor %vm1802_vm0, %vm1803_vm13 }
0x1340   :  { %v1799_v4 = vsub.f32 1.0, %v1798_v20 }
0x1342   :  { %v1800_v63 = vmul.f32 %v2625_v13, %v1799_v4 }
0x1344   :  { %v1801_v9 = vadd.f32 %v2625_v13, %v1800_v63 }
0x136a   :  { %v1819_v42 = vpop.permute.xlu2 %1818 }
0x136b   :  { %v1824_v51 = vmul.f32 %v1819_v42, %v3624_v35  ;;  %v1900_v42 = vsub.f32 1.0, %v1899_v57  ;;  %v1805_v57 = vsel %vm1804_vm2, %v2625_v13, %v1801_v9 }
0x136c   :  { %v1810_v4 = vsel %vm1807_vm7, %v1809_v6, %v1805_v57 }
0x136d   :  { %1828 = vrot.lane.b32.xlu0 %v1824_v51, %s2760_s0  ;;  %v1901_v51 = vmul.f32 %v2623_v16, %v1900_v42 }
0x136f   :  { %v1902_v56 = vadd.f32 %v2623_v16, %v1901_v51 }
0x1371   :  { %v1906_v43 = vsel %vm1905_vm9, %v2623_v16, %v1902_v56  ;;  %v3638_v56 = vsel %vm1247_vm3, %v3521_v21, %v3517_v30  ;;  %v3649_v16 = vsel %vm1259_vm15, %v3511_v0, %v3507_v25  ;;  %v3660_v21 = vsel %vm1260_vm5, %v3534_v19, %v3529_v33 }
0x1372   :  { %v1814_v9 = vmul.f32 %v3624_v35, %v3638_v56  ;;  %v1931_v25 = vmul.f32 %v3628_v49, %v3660_v21  ;;  %v3677_v33 = vsel %vm1248_vm4, %v3547_v39, %v3544_v55  ;;  %v1138_v55 = vld [vmem:[%s4052_s2] sm:$0x3]  ;;  %s2233_s2 = sshll.u32 %s2762_s24, 4  ;;  %s2766_s24 = smov 8   ;;  %s2234_s2 = int_to_ptr.vmem [resolvable:$true] %s2233_s2 }
0x1373   :  { %v1815_v19 = vmul.f32 %v1810_v4, %v3677_v33 }
0x1379   :  { %v1937_v46 = vpop.permute.xlu2 %1936 }
0x137a   :  { %v1941_v17 = vmul.f32 %v1937_v46, %v3628_v49  ;;  %v1911_v46 = vsel %vm1908_vm1, %v1910_v18, %v1906_v43  ;;  %v1093_v43 = vadd.f32 %v2339_v45, %v3469_v37 }
0x137b   :  { %v1930_v13 = vmul.f32 %v1911_v46, %v3649_v16 }
0x137c   :  { %1946 = vrot.lane.b32.xlu0 %v1941_v17, %s2760_s0 }
0x1389   :  { %v1935_v20 = vpop.permute.xlu1 %1934 }
0x138a   :  { %v1940_v17 = vmul.f32 %v1935_v20, %v1911_v46  ;;  %v1821_v42 = vpop.permute.xlu0 %1820 }
0x138b   :  { %v1825_v51 = vmul.f32 %v1821_v42, %v1810_v4 }
0x138c   :  { %1944 = vrot.lane.b32.xlu2 %v1940_v17, %s2760_s0 }
0x138d   :  { %1830 = vrot.lane.b32.xlu1 %v1825_v51, %s2760_s0 }
0x13df   :  { %v1829_v54 = vpop.permute.xlu0 %1828 }
0x13e0   :  { %v3642_v11 = vadd.f32 %v1829_v54, %v1814_v9  ;;  %v1159_v9 = vadd.f32 %v3471_v60, %v1138_v55 }
0x13e2   :  { %2626 = vtanh.f32 %v3642_v11  ;;  %v1862_v12 = vsel %vm1259_vm15, %v3642_v11, %v3638_v56 }
0x13e6   :  { %v1945_v63 = vpop.permute.xlu2 %1944 }
0x13e7   :  { %v3652_v41 = vadd.f32 %v1945_v63, %v1930_v13 }
0x13e8   :  { %v2627_v30 = vpop.eup %2626 }
0x13e9   :  { %2628 = vtanh.f32 %v3652_v41  ;;  %1840 = vrot.lane.b32.xlu1 %v2627_v30, %s2759_s18 }
0x13ee   :  { %v1947_v0 = vpop.permute.xlu0 %1946 }
0x13ef   :  { %v2629_v62 = vpop.eup %2628  ;;  %v3664_v36 = vadd.f32 %v1947_v0, %v1931_v25 }
0x13f0   :  { %1956 = vrot.lane.b32.xlu0 %v2629_v62, %s2759_s18 }
0x13f1   :  { %2630 = vtanh.f32 %v3664_v36 }
0x13f2   :  { %2632 = vtanh.f32 %v1093_v43 }
0x13f7   :  { %v2631_v18 = vpop.eup %2630 }
0x13f8   :  { %1958 = vrot.lane.b32.xlu1 %v2631_v18, %s2759_s18  ;;  %v2633_v57 = vpop.eup %2632 }
0x13ff   :  { %v1831_v6 = vpop.permute.xlu1 %1830 }
0x1400   :  { %v3680_v20 = vadd.f32 %v1831_v6, %v1815_v19  ;;  %1116 = vrot.lane.b32.xlu1 %v2633_v57, %s2759_s18  ;;  %v2397_v57 = vld [vmem:[%s4056_s6 + $0x38] sm:$0xf] }
0x1402   :  { %2634 = vtanh.f32 %v3680_v20 }
0x1403   :  { %2636 = vtanh.f32 %v1159_v9 }
0x1408   :  { %v2635_v37 = vpop.eup %2634 }
0x1409   :  { %1842 = vrot.lane.b32.xlu2 %v2635_v37, %s2759_s18  ;;  %v2637_v25 = vpop.eup %2636 }
0x145b   :  { %v1841_v17 = vpop.permute.xlu1 %1840 }
0x145c   :  { %v3686_v42 = vmul.f32 %v1841_v17, %v3624_v35 }
0x145e   :  { %v3698_v13 = vsel %vm1259_vm15, %v3686_v42, %v3568_v7 }
0x1462   :  { %v1957_v54 = vpop.permute.xlu0 %1956 }
0x1463   :  { %v1843_v39 = vpop.permute.xlu2 %1842 }
0x1464   :  { %v3691_v51 = vmul.f32 %v1843_v39, %v1810_v4  ;;  %v3708_v4 = vmul.f32 %v1957_v54, %v1911_v46  ;;  %v2341_v39 = vmul.f32 -1.442695, %v1093_v43 }
0x1466   :  { %v3704_v35 = vsel %vm1260_vm5, %v3691_v51, %v3574_v61  ;;  %v3718_v7 = vsel %vm1247_vm3, %v3708_v4, %v3595_v15  ;;  %v2343_v15 = vmul.f32 -1.442695, %v1159_v9  ;;  %v1964_v22 = vsel %vm1247_vm3, %v3708_v4, 0.0 }
0x1467   :  { %v1983_v63 = vpack.c.bf16 %v3704_v35, %v3698_v13 }
0x1468   :  { %2638 = vpow2.f32 %v2343_v15 }
0x1469   :  { %1985 = vrot.lane.b32.xlu2 %v1983_v63, %s2760_s0 }
0x146a   :  { %v1959_v60 = vpop.permute.xlu1 %1958 }
0x146b   :  { %v3712_v30 = vmul.f32 %v1959_v60, %v3628_v49 }
0x146d   :  { %v3724_v61 = vsel %vm1248_vm4, %v3712_v30, %v3601_v34  ;;  %v2396_v34 = vld [vmem:[%s4056_s6 + $0x30] sm:$0xff] }
0x146e   :  { %v2096_v46 = vpack.c.bf16 %v3724_v61, %v3718_v7  ;;  %v2639_v18 = vpop.eup %2638 }
0x146f   :  { %v1163_v19 = vadd.f32 1.0, %v2639_v18 }
0x1470   :  { %2098 = vrot.lane.b32.xlu0 %v2096_v46, %s2760_s0 }
0x1471   :  { %1182 = vrot.lane.b32.xlu2 %v2637_v25, %s2759_s18  ;;  %vm1169_vm1 = vweird.f32 %v1163_v19  ;;  %v1173_v18 = vand.u32 2147483647, %v1163_v19 }
0x1473   :  { %vm1174_vm11 = vcmp.eq.f32.partialorder %v1173_v18, 8.507059e+37 }
0x14c3   :  { %v1986_v49 = vpop.permute.xlu2 %1985 }
0x14c4   :  { %2398 = vmatmul.msk.bf16.vlgmr.msrb.gmra.mxu2 %vm112_vm12, %v1986_v49  ;;  %v2094_v49 = vld [vmem:[%s4057_s7] sm:$0xff] }
0x14e2   :  { %v2099_v0 = vpop.permute.xlu0 %2098 }
0x14e3   :  { %2403 = vmatmul.msk.bf16.vlgmr.msrb.gmra.mxu3 %vm112_vm12, %v2099_v0 }
0x1547   :  { %v1999_v62 = vpop.f32.mrf.mxu2 }
0x1548   :  { %v3735_v45 = vadd.f32 %v2396_v34, %v1999_v62  ;;  %v1175_v34 = vand.u32 2147483648, %v1163_v19  ;;  %v378_v62 = vsel %vm92_vm8, %v2985_v14, 0.0 }
0x154a   :  { %2640 = vtanh.f32 %v3735_v45 }
0x154b   :  { %2642 = vrcp.f32 %v1163_v19 }
0x154f   :  { %v2001_v6 = vpop.f32.mrf.mxu2 }
0x1550   :  { %v2641_v37 = vpop.eup %2640  ;;  %v3741_v17 = vadd.f32 %v2397_v57, %v2001_v6  ;;  %v1176_v57 = vor.u32 1.1754944e-38, %v1175_v34  ;;  %v1183_v6 = vpop.permute.xlu2 %1182 }
0x1551   :  { %2050 = vrot.lane.b32.xlu0 %v2641_v37, %s2759_s18  ;;  %v2643_v55 = vpop.eup %2642  ;;  %v2095_v37 = vld [vmem:[%s4057_s7 + $0x8] sm:$0xf] }
0x1552   :  { %2644 = vtanh.f32 %v3741_v17  ;;  %v1165_v54 = vmul.f32 %v2643_v55, %v1163_v19  ;;  %vm1170_vm7 = vweird.f32 %v2643_v55 }
0x1553   :  { %2646 = vpow2.f32 %v2341_v39  ;;  %vm1171_vm2 = vmor %vm1169_vm1, %vm1170_vm7  ;;  %vm4117_vm1 = vcmp.eq.s32.totalorder %v3123_v1, 1 }
0x1554   :  { %v1166_v63 = vsub.f32 1.0, %v1165_v54 }
0x1556   :  { %v1167_v46 = vmul.f32 %v2643_v55, %v1166_v63 }
0x1558   :  { %v2645_v9 = vpop.eup %2644  ;;  %v1168_v15 = vadd.f32 %v2643_v55, %v1167_v46 }
0x1559   :  { %2052 = vrot.lane.b32.xlu1 %v2645_v9, %s2759_s18  ;;  %v2647_v60 = vpop.eup %2646 }
0x155a   :  { %v1097_v25 = vadd.f32 1.0, %v2647_v60 }
0x155c   :  { %2648 = vrcp.f32 %v1097_v25  ;;  %v1109_v34 = vand.u32 2147483648, %v1097_v25  ;;  %vm1103_vm9 = vweird.f32 %v1097_v25  ;;  %v1107_v18 = vand.u32 2147483647, %v1097_v25 }
0x155e   :  { %vm1108_vm7 = vcmp.eq.f32.partialorder %v1107_v18, 8.507059e+37 }
0x1561   :  { %169 = vrot.lane.b32.xlu1 %v2914_v59, %s2760_s0  ;;  %v1172_v59 = vsel %vm1171_vm2, %v2643_v55, %v1168_v15  ;;  %vm4118_vm2 = vcmp.eq.s32.totalorder %v3053_v29, 1 }
0x1562   :  { %v2649_v39 = vpop.eup %2648  ;;  %v3758_v9 = vsel %vm1174_vm11, %v1176_v57, %v1172_v59  ;;  %v1110_v59 = vor.u32 1.1754944e-38, %v1109_v34  ;;  %v1117_v57 = vpop.permute.xlu1 %1116 }
0x1563   :  { %v1185_v14 = vmul.f32 %v1183_v6, %v3758_v9  ;;  %v1099_v55 = vmul.f32 %v2649_v39, %v1097_v25  ;;  %vm1104_vm13 = vweird.f32 %v2649_v39  ;;  %v2399_v25 = vmul.f32 -1.442695, %v3735_v45 }
0x1564   :  { %vm1105_vm0 = vmor %vm1103_vm9, %vm1104_vm13 }
0x1565   :  { %v1100_v60 = vsub.f32 1.0, %v1099_v55 }
0x1566   :  { %v2112_v0 = vpop.f32.mrf.mxu3 }
0x1567   :  { %v2117_v43 = vadd.f32 %v2112_v0, %v2094_v49  ;;  %v585_v49 = vsel %vm74_vm14, %v3111_v3, 0.0  ;;  %v1101_v0 = vmul.f32 %v2649_v39, %v1100_v60 }
0x1569   :  { %2650 = vtanh.f32 %v2117_v43  ;;  %380 = vrot.lane.b32.xlu1 %v378_v62, %s2759_s18  ;;  %v1102_v15 = vadd.f32 %v2649_v39, %v1101_v0  ;;  %v447_v62 = vsel %vm68_vm6, %v3041_v28, 0.0  ;;  %v654_v28 = vsel %vm4117_vm1, %v3125_v40, 0.0 }
0x156b   :  { %v1106_v3 = vsel %vm1105_vm0, %v2649_v39, %v1102_v15  ;;  %v2404_v39 = vmul.f32 -1.442695, %v2117_v43 }
0x156c   :  { %v3778_v6 = vsel %vm1108_vm7, %v1110_v59, %v1106_v3 }
0x156e   :  { %v2114_v54 = vpop.f32.mrf.mxu3 }
0x156f   :  { %v2651_v63 = vpop.eup %2650  ;;  %v2118_v19 = vadd.f32 %v2114_v54, %v2095_v37  ;;  %v1119_v37 = vmul.f32 %v1117_v57, %v3778_v6  ;;  %v2400_v54 = vmul.f32 -1.442695, %v3741_v17 }
0x1570   :  { %2163 = vrot.lane.b32.xlu2 %v2651_v63, %s2759_s18 }
0x1571   :  { %2652 = vtanh.f32 %v2118_v19  ;;  %1187 = vrot.lane.b32.xlu1 %v1185_v14, %s2760_s0  ;;  %v2405_v3 = vmul.f32 -1.442695, %v2118_v19 }
0x1572   :  { %2654 = vpow2.f32 %v2399_v25 }
0x1573   :  { %2656 = vpow2.f32 %v2404_v39 }
0x1574   :  { %2658 = vpow2.f32 %v2400_v54 }
0x1577   :  { %v2653_v46 = vpop.eup %2652 }
0x1578   :  { %242 = vrot.lane.b32.xlu2 %v2924_v5, %s2759_s18  ;;  %2165 = vrot.lane.b32.xlu0 %v2653_v46, %s2759_s18  ;;  %v309_v5 = vsel %vm4116_vm10, %v2971_v10, 0.0  ;;  %v516_v10 = vsel %vm4118_vm2, %v3056_v31, 0.0  ;;  %v2655_v63 = vpop.eup %2654 }
0x1579   :  { %587 = vrot.lane.b32.xlu1 %v585_v49, %s2760_s0  ;;  %v2012_v40 = vadd.f32 1.0, %v2655_v63  ;;  %v2657_v14 = vpop.eup %2656 }
0x157a   :  { %v2659_v55 = vpop.eup %2658  ;;  %v2125_v60 = vadd.f32 1.0, %v2657_v14 }
0x157b   :  { %2660 = vrcp.f32 %v2012_v40  ;;  %v2013_v46 = vadd.f32 1.0, %v2659_v55  ;;  %v2025_v59 = vand.u32 2147483648, %v2012_v40  ;;  %vm2019_vm13 = vweird.f32 %v2012_v40 }
0x157c   :  { %2662 = vrcp.f32 %v2125_v60  ;;  %v2023_v57 = vand.u32 2147483647, %v2012_v40  ;;  %v2138_v55 = vand.u32 2147483648, %v2125_v60  ;;  %vm2132_vm1 = vweird.f32 %v2125_v60 }
0x157d   :  { %2664 = vrcp.f32 %v2013_v46  ;;  %v2026_v25 = vor.u32 1.1754944e-38, %v2025_v59  ;;  %v2136_v19 = vand.u32 2147483647, %v2125_v60 }
0x157e   :  { %2666 = vpow2.f32 %v2405_v3  ;;  %vm2024_vm9 = vcmp.eq.f32.partialorder %v2023_v57, 8.507059e+37 }
0x1580   :  { %449 = vrot.lane.b32.xlu2 %v447_v62, %s2760_s0  ;;  %311 = vrot.lane.b32.xlu0 %v309_v5, %s2760_s0 }
0x1581   :  { %v2661_v49 = vpop.eup %2660 }
0x1582   :  { %v2015_v31 = vmul.f32 %v2661_v49, %v2012_v40  ;;  %v2663_v0 = vpop.eup %2662  ;;  %vm2020_vm11 = vweird.f32 %v2661_v49  ;;  %v2040_v40 = vand.u32 2147483648, %v2013_v46 }
0x1583   :  { %v2665_v45 = vpop.eup %2664  ;;  %v2128_v34 = vmul.f32 %v2663_v0, %v2125_v60  ;;  %vm2021_vm10 = vmor %vm2019_vm13, %vm2020_vm11  ;;  %vm2133_vm0 = vweird.f32 %v2663_v0  ;;  %vm2034_vm11 = vweird.f32 %v2013_v46 }
0x1584   :  { %v2016_v15 = vsub.f32 1.0, %v2015_v31  ;;  %v2030_v62 = vmul.f32 %v2665_v45, %v2013_v46  ;;  %vm2035_vm7 = vweird.f32 %v2665_v45  ;;  %vm2134_vm2 = vmor %vm2132_vm1, %vm2133_vm0  ;;  %vm246_vm0 = vcmask 517376  }
0x1585   :  { %v2129_v17 = vsub.f32 1.0, %v2128_v34  ;;  %vm2036_vm13 = vmor %vm2034_vm11, %vm2035_vm7  ;;  %vm172_vm7 = vcmask 254976   ;;  %vm4119_vm1 = vcmp.eq.s32.totalorder %v3123_v1, 1  ;;  %v927_v1 = vsel %vm68_vm6, %v3238_v27, 0.0 }
0x1586   :  { %v2017_v43 = vmul.f32 %v2661_v49, %v2016_v15  ;;  %v2031_v18 = vsub.f32 1.0, %v2030_v62  ;;  %v2667_v15 = vpop.eup %2666 }
0x1588   :  { %656 = vrot.lane.b32.xlu2 %v654_v28, %s2759_s18  ;;  %1121 = vrot.lane.b32.xlu0 %v1119_v37, %s2760_s0  ;;  %v2018_v5 = vadd.f32 %v2661_v49, %v2017_v43  ;;  %v2130_v37 = vmul.f32 %v2663_v0, %v2129_v17  ;;  %v2139_v43 = vor.u32 1.1754944e-38, %v2138_v55  ;;  %v2041_v17 = vor.u32 1.1754944e-38, %v2040_v40 }
0x158a   :  { %v2022_v28 = vsel %vm2021_vm10, %v2661_v49, %v2018_v5  ;;  %v2131_v63 = vadd.f32 %v2663_v0, %v2130_v37  ;;  %v2038_v49 = vand.u32 2147483647, %v2013_v46  ;;  %vm2137_vm10 = vcmp.eq.f32.partialorder %v2136_v19, 8.507059e+37 }
0x158b   :  { %v3792_v54 = vsel %vm2024_vm9, %v2026_v25, %v2022_v28  ;;  %v2126_v5 = vadd.f32 1.0, %v2667_v15  ;;  %v791_v28 = vsel %vm74_vm14, %v3182_v58, 0.0  ;;  %vm4120_vm14 = vcmp.eq.s32.totalorder %v2969_v8, 1 }
0x158c   :  { %v2135_v34 = vsel %vm2134_vm2, %v2663_v0, %v2131_v63  ;;  %vm2039_vm9 = vcmp.eq.f32.partialorder %v2038_v49, 8.507059e+37  ;;  %v1070_v58 = vsel %vm4120_vm14, %v3380_v50, %v3376_v47  ;;  %v1863_v8 = vsel %vm1260_vm5, %v3680_v20, %v3677_v33 }
0x158d   :  { %2668 = vrcp.f32 %v2126_v5  ;;  %v2153_v49 = vand.u32 2147483648, %v2126_v5  ;;  %vm2147_vm11 = vweird.f32 %v2126_v5  ;;  %v2151_v26 = vand.u32 2147483647, %v2126_v5 }
0x158f   :  { %v2154_v15 = vor.u32 1.1754944e-38, %v2153_v49  ;;  %v4126_v49 = vld [vmem:[#allocation20_spill] sm:$0xff] }
0x1590   :  { %518 = vrot.lane.b32.xlu0 %v516_v10, %s2759_s18  ;;  %v2032_v10 = vmul.f32 %v2665_v45, %v2031_v18  ;;  %v3796_v18 = vsel %vm2137_vm10, %v2139_v43, %v2135_v34  ;;  %vm4121_vm10 = vcmp.eq.s32.totalorder %v3053_v29, 1 }
0x1592   :  { %v2033_v31 = vadd.f32 %v2665_v45, %v2032_v10  ;;  %v723_v10 = vsel %vm4119_vm1, %v3171_v53, 0.0 }
0x1594   :  { %v2037_v62 = vsel %vm2036_vm13, %v2665_v45, %v2033_v31  ;;  %v2669_v45 = vpop.eup %2668  ;;  %v1180_v31 = vmul.f32 %v3758_v9, %v1070_v58  ;;  %vm2152_vm13 = vcmp.eq.f32.partialorder %v2151_v26, 8.507059e+37 }
0x1595   :  { %v3799_v57 = vsel %vm2039_vm9, %v2041_v17, %v2037_v62  ;;  %v2143_v25 = vmul.f32 %v2669_v45, %v2126_v5  ;;  %vm2148_vm2 = vweird.f32 %v2669_v45  ;;  %v859_v5 = vsel %vm4121_vm10, %v3227_v23, 0.0  ;;  %vm4123_vm9 = vmmov %vm4120_vm14 }
0x1596   :  { %vm2149_vm6 = vmor %vm2147_vm11, %vm2148_vm2 }
0x15c3   :  { %v2051_v39 = vpop.permute.xlu0 %2050 }
0x15c4   :  { %v2056_v14 = vmul.f32 %v2051_v39, %v3792_v54 }
0x15c6   :  { %2060 = vrot.lane.b32.xlu2 %v2056_v14, %s2760_s0  ;;  %v2144_v14 = vsub.f32 1.0, %v2143_v25 }
0x15c8   :  { %v2145_v53 = vmul.f32 %v2669_v45, %v2144_v14 }
0x15ca   :  { %v2164_v3 = vpop.permute.xlu2 %2163  ;;  %v2146_v19 = vadd.f32 %v2669_v45, %v2145_v53 }
0x15cb   :  { %v2169_v60 = vmul.f32 %v2164_v3, %v3796_v18  ;;  %v2053_v59 = vpop.permute.xlu1 %2052  ;;  %v1002_v3 = vsel %vm92_vm8, %v3350_v38, %v3346_v32  ;;  %v2046_v32 = vmul.f32 %v3792_v54, %v1862_v12  ;;  %v4139_v12 = vld [vmem:[#allocation24_spill] sm:$0xff] }
0x15cc   :  { %v2057_v37 = vmul.f32 %v2053_v59, %v3799_v57  ;;  %v2150_v27 = vsel %vm2149_vm6, %v2669_v45, %v2146_v19 }
0x15cd   :  { %2173 = vrot.lane.b32.xlu1 %v2169_v60, %s2760_s0  ;;  %v3830_v34 = vsel %vm2152_vm13, %v2154_v15, %v2150_v27  ;;  %v1114_v60 = vmul.f32 %v3778_v6, %v1002_v3  ;;  %v4127_v15 = vld [vmem:[#allocation11_spill] sm:$0xff]  ;;  %vm1508_vm13 = vcmask 523520  }
0x15ce   :  { %2062 = vrot.lane.b32.xlu0 %v2057_v37, %s2760_s0 }
0x15d2   :  { %v243_v46 = vpop.permute.xlu2 %242 }
0x15d3   :  { %247 = vst.msk [vmem:[#allocation2 + $0xe] sm:$0x3] %vm246_vm0, %v243_v46  ;;  %v170_v0 = vpop.permute.xlu1 %169  ;;  %v4122_v46 = vld [vmem:[#allocation13_spill] sm:$0xff] }
0x15d4   :  { %173 = vst.msk [vmem:[#allocation2] sm:$0x3] %vm172_vm7, %v170_v0  ;;  %v1063_v0 = vsel %vm4123_vm9, %v4122_v46, 0.0 }
0x15d5   :  { %793 = vrot.lane.b32.xlu1 %v791_v28, %s2759_s18 }
0x15d6   :  { %725 = vrot.lane.b32.xlu0 %v723_v10, %s2760_s0  ;;  %v2047_v10 = vmul.f32 %v3799_v57, %v1863_v8 }
0x15da   :  { %v450_v39 = vpop.permute.xlu2 %449 }
0x15db   :  { %453 = vst.msk [vmem:[#allocation2 + $0x4] sm:$0x3] %vm172_vm7, %v450_v39  ;;  %v381_v63 = vpop.permute.xlu1 %380 }
0x15dc   :  { %384 = vst.msk [vmem:[#allocation2 + $0xc] sm:$0x3] %vm246_vm0, %v381_v63  ;;  %v1979_v63 = vsel %vm1248_vm4, %v3664_v36, %v3660_v21 }
0x15dd   :  { %997 = vrot.lane.b32.xlu1 %v995_v52, %s2760_s0  ;;  %v2160_v56 = vmul.f32 %v3830_v34, %v1979_v63  ;;  %v4143_v63 = vld [vmem:[#allocation12_spill] sm:$0xff] }
0x15de   :  { %929 = vrot.lane.b32.xlu0 %v927_v1, %s2759_s18 }
0x15e2   :  { %v657_v55 = vpop.permute.xlu2 %656 }
0x15e3   :  { %660 = vst.msk [vmem:[#allocation2 + $0x8] sm:$0x3] %vm246_vm0, %v657_v55  ;;  %v1188_v48 = vpop.permute.xlu1 %1187  ;;  %v4124_v55 = vld [vmem:[#allocation9_spill] sm:$0xff] }
0x15e4   :  { %v1190_v40 = vadd.f32 %v1188_v48, %v1180_v31  ;;  %vm4125_vm8 = vcmp.eq.s32.totalorder %v4124_v55, 1  ;;  %v1978_v48 = vsel %vm1247_vm3, %v3652_v41, %v3649_v16  ;;  %v4131_v41 = vld [vmem:[#allocation17_spill] sm:$0xff] }
0x15e5   :  { %v2159_v19 = vmul.f32 %v3796_v18, %v1978_v48  ;;  %vm4133_vm2 = vmmov %vm4125_vm8 }
0x15e6   :  { %2670 = vtanh.f32 %v1190_v40 }
0x15ea   :  { %v2166_v47 = vpop.permute.xlu0 %2165 }
0x15eb   :  { %v2170_v50 = vmul.f32 %v2166_v47, %v3830_v34  ;;  %v588_v43 = vpop.permute.xlu1 %587  ;;  %v4128_v47 = vld [vmem:[#allocation10_spill] sm:$0xff] }
0x15ec   :  { %v2671_v62 = vpop.eup %2670  ;;  %591 = vst.msk [vmem:[#allocation2 + $0x6] sm:$0x3] %vm172_vm7, %v588_v43  ;;  %vm4129_vm1 = vcmp.eq.s32.totalorder %v4128_v47, 1  ;;  %v4132_v43 = vld [vmem:[#allocation14_spill] sm:$0xff] }
0x15ed   :  { %2175 = vrot.lane.b32.xlu2 %v2170_v50, %s2760_s0  ;;  %1193 = vrot.lane.b32.xlu1 %v2671_v62, %s2759_s18  ;;  %vm4130_vm14 = vmmov %vm4129_vm1 }
0x15f2   :  { %v312_v17 = vpop.permute.xlu0 %311 }
0x15f3   :  { %315 = vst.msk [vmem:[#allocation2 + $0x2] sm:$0x3] %vm172_vm7, %v312_v17  ;;  %v4134_v17 = vld [vmem:[#allocation21_spill] sm:$0xff] }
0x15f5   :  { %861 = vrot.lane.b32.xlu2 %v859_v5, %s2760_s0 }
0x15fa   :  { %v1122_v59 = vpop.permute.xlu0 %1121 }
0x15fb   :  { %v1124_v37 = vadd.f32 %v1122_v59, %v1114_v60  ;;  %v1965_v60 = vsel %vm1248_vm4, %v3712_v30, 0.0  ;;  %v4135_v59 = vld [vmem:[#allocation18_spill] sm:$0xff] }
0x15fd   :  { %2672 = vtanh.f32 %v1124_v37  ;;  %1065 = vrot.lane.b32.xlu2 %v1063_v0, %s2759_s18  ;;  %v4136_v37 = vld [vmem:[#allocation22_spill] sm:$0xff]  ;;  %v4137_v0 = vld [vmem:[#allocation23_spill] sm:$0xff] }
0x15fe   :  { %v1614_v46 = vsel %vm1247_vm3, %v4136_v37, 0.0  ;;  %v1615_v30 = vsel %vm1248_vm4, %v4137_v0, 0.0  ;;  %vm1388_vm4 = vcmask 257024  }
0x1602   :  { %v519_v29 = vpop.permute.xlu0 %518 }
0x1603   :  { %v2673_v23 = vpop.eup %2672  ;;  %522 = vst.msk [vmem:[#allocation2 + $0xa] sm:$0x3] %vm246_vm0, %v519_v29  ;;  %v4138_v29 = vld [vmem:[#allocation25_spill] sm:$0xff] }
0x1604   :  { %1127 = vrot.lane.b32.xlu0 %v2673_v23, %s2759_s18  ;;  %v1732_v23 = vsel %vm1260_vm5, %v4138_v29, 0.0 }
0x1620   :  { %v2061_v38 = vpop.permute.xlu2 %2060 }
0x1621   :  { %v2066_v45 = vadd.f32 %v2061_v38, %v2046_v32  ;;  %v1731_v32 = vsel %vm1259_vm15, %v4139_v12, 0.0  ;;  %v1849_v38 = vsel %vm1260_vm5, %v3691_v51, 0.0  ;;  %vm4144_vm5 = vcmp.eq.s32.totalorder %v4143_v63, 1 }
0x1622   :  { %vm4147_vm6 = vmmov %vm4144_vm5 }
0x163f   :  { %v2174_v28 = vpop.permute.xlu1 %2173 }
0x1640   :  { %v2063_v25 = vpop.permute.xlu0 %2062  ;;  %v2179_v40 = vadd.f32 %v2174_v28, %v2159_v19 }
0x1641   :  { %v2067_v39 = vadd.f32 %v2063_v25, %v2047_v10  ;;  %v4140_v10 = vld [vmem:[#allocation16_spill] sm:$0xff] }
0x1642   :  { %2674 = vtanh.f32 %v2179_v40  ;;  %vm4141_vm3 = vcmp.eq.s32.totalorder %v4140_v10, 1 }
0x1643   :  { %2676 = vtanh.f32 %v2066_v45 }
0x1644   :  { %2678 = vtanh.f32 %v2067_v39 }
0x1647   :  { %v794_v11 = vpop.permute.xlu1 %793  ;;  %v2176_v14 = vpop.permute.xlu2 %2175 }
0x1648   :  { %796 = vst.msk [vmem:[#allocation2 + $0x6] sm:$0x3] %vm246_vm0, %v794_v11  ;;  %v2180_v52 = vadd.f32 %v2176_v14, %v2160_v56  ;;  %v726_v1 = vpop.permute.xlu0 %725  ;;  %v2675_v26 = vpop.eup %2674 }
0x1649   :  { %728 = vst.msk [vmem:[#allocation2 + $0x8] sm:$0x3] %vm172_vm7, %v726_v1  ;;  %v2677_v5 = vpop.eup %2676 }
0x164a   :  { %v2679_v3 = vpop.eup %2678  ;;  %2680 = vtanh.f32 %v2180_v52 }
0x164f   :  { %v998_v33 = vpop.permute.xlu1 %997  ;;  %v862_v20 = vpop.permute.xlu2 %861 }
0x1650   :  { %1000 = vst.msk [vmem:[#allocation2 + $0xc] sm:$0x3] %vm172_vm7, %v998_v33  ;;  %v930_v53 = vpop.permute.xlu0 %929 }
0x1651   :  { %864 = vst.msk [vmem:[#allocation2 + $0xa] sm:$0x3] %vm172_vm7, %v862_v20 }
0x1652   :  { %932 = vst.msk [vmem:[#allocation2 + $0x4] sm:$0x3] %vm246_vm0, %v930_v53 }
0x1657   :  { %v1066_v21 = vpop.permute.xlu2 %1065 }
0x1658   :  { %1068 = vst.msk [vmem:[#allocation2 + $0x2] sm:$0x3] %vm246_vm0, %v1066_v21 }
0x165f   :  { %v1194_v36 = vpop.permute.xlu1 %1193 }
0x1660   :  { %v1196_v58 = vmul.f32 %v1194_v36, %v3758_v9  ;;  %v4148_v36 = vld [vmem:[#allocation15_spill] sm:$0xff] }
0x1661   :  { %vm4149_vm10 = vcmp.eq.s32.totalorder %v4148_v36, 1 }
0x1662   :  { %v1197_v31 = vsel %vm4125_vm8, %v1196_v58, 0.0  ;;  %v1203_v62 = vsel %vm4133_vm2, %v1196_v58, %v4132_v43  ;;  %vm4150_vm9 = vmmov %vm4149_vm10 }
0x1663   :  { %1199 = vrot.lane.b32.xlu1 %v1197_v31, %s2759_s18 }
0x166b   :  { %1381 = vrot.lane.b32.xlu1 %v4126_v49, %s2760_s0 }
0x1673   :  { %2185 = vrot.lane.b32.xlu1 %v2675_v26, %s2759_s18 }
0x1676   :  { %v1128_v9 = vpop.permute.xlu0 %1127 }
0x1677   :  { %v1130_v27 = vmul.f32 %v1128_v9, %v3778_v6  ;;  %v1848_v6 = vsel %vm1259_vm15, %v3686_v42, 0.0  ;;  %v2681_v42 = vpop.eup %2680  ;;  %vm4142_vm15 = vmmov %vm4141_vm3 }
0x1679   :  { %v1137_v50 = vsel %vm4129_vm1, %v1130_v27, %v4127_v15  ;;  %v1131_v16 = vsel %vm4130_vm14, %v1130_v27, 0.0  ;;  %vm2225_vm1 = vcmask 523264   ;;  %vm2227_vm14 = vcmask 519168  }
0x167a   :  { %1205 = vrot.lane.b32.xlu2 %v1137_v50, %s2760_s0  ;;  %1133 = vrot.lane.b32.xlu0 %v1131_v16, %s2760_s0 }
0x167b   :  { %1503 = vrot.lane.b32.xlu1 %v4131_v41, %s2759_s18 }
0x1682   :  { %1383 = vrot.lane.b32.xlu2 %v4134_v17, %s2760_s0  ;;  %1209 = vrot.lane.b32.xlu0 %v1203_v62, %s2759_s18 }
0x1683   :  { %1852 = vrot.lane.b32.xlu1 %v1848_v6, %s2760_s0 }
0x168a   :  { %2074 = vrot.lane.b32.xlu0 %v2679_v3, %s2759_s18  ;;  %2072 = vrot.lane.b32.xlu2 %v2677_v5, %s2759_s18 }
0x168b   :  { %1970 = vrot.lane.b32.xlu1 %v1965_v60, %s2759_s18 }
0x1692   :  { %1501 = vrot.lane.b32.xlu0 %v4135_v59, %s2759_s18  ;;  %2187 = vrot.lane.b32.xlu2 %v2681_v42, %s2759_s18 }
0x169a   :  { %1620 = vrot.lane.b32.xlu0 %v1615_v30, %s2760_s0  ;;  %1618 = vrot.lane.b32.xlu2 %v1614_v46, %s2760_s0 }
0x16a2   :  { %1737 = vrot.lane.b32.xlu0 %v1732_v23, %s2759_s18  ;;  %1735 = vrot.lane.b32.xlu2 %v1731_v32, %s2759_s18 }
0x16aa   :  { %1968 = vrot.lane.b32.xlu0 %v1964_v22, %s2759_s18  ;;  %1854 = vrot.lane.b32.xlu2 %v1849_v38, %s2760_s0 }
0x16d4   :  { %v1206_v45 = vpop.permute.xlu2 %1205 }
0x16d5   :  { %v1200_v8 = vpop.permute.xlu1 %1199 }
0x16d6   :  { %1202 = vst.msk [vmem:[#allocation2] sm:$0x3] %vm246_vm0, %v1200_v8  ;;  %vm1510_vm0 = vcmask 519424  }
0x16dc   :  { %v1384_v24 = vpop.permute.xlu2 %1383 }
0x16dd   :  { %1389 = vst.msk [vmem:[%s4062_s12 + $0x8] sm:$0xf] %vm1388_vm4, %v1384_v24  ;;  %v1382_v44 = vpop.permute.xlu1 %1381 }
0x16de   :  { %1387 = vst.msk [vmem:[%s4062_s12] sm:$0xff] %vm112_vm12, %v1382_v44 }
0x16e4   :  { %v2073_v2 = vpop.permute.xlu2 %2072 }
0x16e5   :  { %v2078_v51 = vmul.f32 %v2073_v2, %v3792_v54  ;;  %v2186_v4 = vpop.permute.xlu1 %2185 }
0x16e6   :  { %v2191_v28 = vmul.f32 %v2186_v4, %v3796_v18 }
0x16e7   :  { %v2080_v25 = vsel %vm4141_vm3, %v2078_v51, 0.0  ;;  %v2092_v39 = vsel %vm4142_vm15, %v2078_v51, %v3698_v13  ;;  %v4145_v13 = vld [vmem:[#allocation19_spill] sm:$0xff] }
0x16e8   :  { %2209 = vrot.lane.b32.xlu1 %v2092_v39, %s2760_s0  ;;  %2084 = vrot.lane.b32.xlu2 %v2080_v25, %s2760_s0  ;;  %v2205_v56 = vsel %vm4144_vm5, %v2191_v28, %v3718_v7  ;;  %vm4146_vm11 = vcmp.eq.s32.totalorder %v4145_v13, 1 }
0x16e9   :  { %2217 = vrot.lane.b32.xlu0 %v2205_v56, %s2759_s18  ;;  %vm4151_vm8 = vmmov %vm4146_vm11 }
0x16ec   :  { %v1134_v54 = vpop.permute.xlu0 %1133  ;;  %v2188_v18 = vpop.permute.xlu2 %2187 }
0x16ed   :  { %1136 = vst.msk [vmem:[#allocation2 + $0xe] sm:$0x3] %vm172_vm7, %v1134_v54  ;;  %v2192_v11 = vmul.f32 %v2188_v18, %v3830_v34  ;;  %v1504_v14 = vpop.permute.xlu1 %1503  ;;  %vm1213_vm7 = vcmask 517120  }
0x16ee   :  { %2367 = vst.msk [vmem:[%s4062_s12 + $0x38] sm:$0xf] %vm1510_vm0, %v1504_v14 }
0x16ef   :  { %v2206_v52 = vsel %vm4146_vm11, %v2192_v11, %v3724_v61  ;;  %v2193_v61 = vsel %vm4147_vm6, %v2191_v28, 0.0  ;;  %2241 = dma.vmem_to_hbm [thread:$0]  %s2234_s2, 256, %s2236_s22, [#allocation3], %s2760_s0, %s2760_s0, %s2763_s11   ;;  %v2194_v31 = vsel %vm4151_vm8, %v2192_v11, 0.0 }
0x16f0   :  { %2219 = vrot.lane.b32.xlu1 %v2206_v52, %s2759_s18 }
0x16f4   :  { %v1210_v7 = vpop.permute.xlu0 %1209  ;;  %v1619_v34 = vpop.permute.xlu2 %1618 }
0x16f5   :  { %v1212_v1 = vsel %vm112_vm12, %v1206_v45, %v1210_v7  ;;  %2373 = vst.msk [vmem:[%s4062_s12 + $0x10] sm:$0xff] %vm112_vm12, %v1619_v34  ;;  %v1853_v53 = vpop.permute.xlu1 %1852 }
0x16f6   :  { %1214 = vst.msk [vmem:[#allocation4] sm:$0x3] %vm1213_vm7, %v1212_v1 }
0x16f7   :  { %2252 = dma.vmem_to_hbm [thread:$0]  %s2248_s4, 32, %s2250_s19, [#allocation5]  }
0x16f8   :  { %2197 = vrot.lane.b32.xlu1 %v2193_v61, %s2759_s18 }
0x16fc   :  { %v2075_v33 = vpop.permute.xlu0 %2074  ;;  %v1736_v20 = vpop.permute.xlu2 %1735 }
0x16fd   :  { %v2079_v21 = vmul.f32 %v2075_v33, %v3799_v57  ;;  %2380 = vst.msk [vmem:[%s4062_s12 + $0x20] sm:$0xff] %vm1508_vm13, %v1736_v20  ;;  %v1971_v19 = vpop.permute.xlu1 %1970 }
0x16fe   :  { %2387 = vst.msk [vmem:[%s4062_s12 + $0x20] sm:$0xff] %vm112_vm12, %v1853_v53 }
0x16ff   :  { %v2081_v58 = vsel %vm4149_vm10, %v2079_v21, 0.0  ;;  %v2093_v55 = vsel %vm4150_vm9, %v2079_v21, %v3704_v35 }
0x1700   :  { %2086 = vrot.lane.b32.xlu0 %v2081_v58, %s2760_s0  ;;  %2211 = vrot.lane.b32.xlu2 %v2093_v55, %s2760_s0 }
0x1704   :  { %v1502_v57 = vpop.permute.xlu0 %1501  ;;  %v1855_v40 = vpop.permute.xlu2 %1854 }
0x1705   :  { %2366 = vst.msk [vmem:[%s4062_s12 + $0x30] sm:$0xff] %vm1508_vm13, %v1502_v57 }
0x1708   :  { %2199 = vrot.lane.b32.xlu2 %v2194_v31, %s2759_s18 }
0x170c   :  { %v1621_v48 = vpop.permute.xlu0 %1620 }
0x170d   :  { %2374 = vst.msk [vmem:[%s4062_s12 + $0x18] sm:$0xf] %vm1388_vm4, %v1621_v48 }
0x170e   :  { %2395 = vst.msk [vmem:[%s4062_s12 + $0x18] sm:$0xf] %vm1510_vm0, %v1971_v19 }
0x1714   :  { %v1738_v35 = vpop.permute.xlu0 %1737 }
0x1715   :  { %2381 = vst.msk [vmem:[%s4062_s12 + $0x28] sm:$0xf] %vm1510_vm0, %v1738_v35 }
0x1716   :  { %2388 = vst.msk [vmem:[%s4062_s12 + $0x28] sm:$0xf] %vm1388_vm4, %v1855_v40 }
0x171c   :  { %v1969_v49 = vpop.permute.xlu0 %1968 }
0x171d   :  { %2394 = vst.msk [vmem:[%s4062_s12 + $0x10] sm:$0xff] %vm1508_vm13, %v1969_v49 }
0x1742   :  { %v2085_v26 = vpop.permute.xlu2 %2084 }
0x1743   :  { %2401 = vst.msk [vmem:[%s4062_s12 + $0x30] sm:$0xff] %vm112_vm12, %v2085_v26 }
0x175a   :  { %v2210_v9 = vpop.permute.xlu1 %2209  ;;  %v2212_v27 = vpop.permute.xlu2 %2211 }
0x175b   :  { %v2218_v15 = vpop.permute.xlu0 %2217 }
0x175c   :  { %v2223_v47 = vsel %vm112_vm12, %v2210_v9, %v2218_v15 }
0x175d   :  { %2226 = vst.msk [vmem:[#allocation6] sm:$0xff] %vm2225_vm1, %v2223_v47 }
0x1762   :  { %v2220_v50 = vpop.permute.xlu1 %2219  ;;  %v2200_v16 = vpop.permute.xlu2 %2199 }
0x1763   :  { %v2224_v41 = vsel %vm112_vm12, %v2212_v27, %v2220_v50  ;;  %2204 = vst.msk [vmem:[%s4062_s12 + $0x8] sm:$0xf] %vm1510_vm0, %v2200_v16 }
0x1764   :  { %2228 = vst.msk [vmem:[#allocation6 + $0x8] sm:$0xf] %vm2227_vm14, %v2224_v41 }
0x1765   :  { %2267 = dma.vmem_to_hbm [thread:$0]  %s2260_s17, 256, %s2262_s21, [#allocation5], %s2765_s1, %s2765_s1, %s2766_s24  }
0x176a   :  { %v2198_v43 = vpop.permute.xlu1 %2197 }
0x176b   :  { %2203 = vst.msk [vmem:[%s4062_s12] sm:$0xff] %vm1508_vm13, %v2198_v43 }
0x1772   :  { %v2087_v62 = vpop.permute.xlu0 %2086 }
0x1773   :  { %2402 = vst.msk [vmem:[%s4062_s12 + $0x38] sm:$0xf] %vm1388_vm4, %v2087_v62 }
0x1774   :  { %2754 = dma.done.wait [#allocation3], 256  }
0x1775   :  { %2755 = vsyncadd [#allocation3], 4294967040 }
0x1776   :  { %2756 = dma.done.wait [#allocation5], 288  }
0x1777   :  { %2757 = vsyncadd [#allocation5], 4294967008 }
0x1778   :  { %2282 = vsyncpa [#allocation3], 1 }
0x1779   :  { %2283 = vsyncpa [#allocation5], 1 }

</bundles_post_ra>
